<compile_context>
chip_gen: v7x
topology: tpu7x:2x2x1
jax: 0.10.0
libtpu: 0.0.40
codegen_flags: <defaults>
</compile_context>

<pallas_src>
import jax
import jax.numpy as jnp
from jax import lax
from jax.experimental import pallas as pl
from jax.experimental.pallas import tpu as pltpu

LANE = 128  # TPU lane width — channel padding target.


def _basic_block_kernel(x_ref, w1_ref, b1_ref, w2_ref, b2_ref, out_ref, xpad_ref):
    # x_ref:    (H, W, Cp)       input block (residual source), original dtype
    # w*_ref:   (9*Cp, Cp)       scale-folded im2col weights (mxu_dtype)
    # b*_ref:   (1, Cp)          folded BN bias (f32)
    # out_ref:  (H, W, Cp)
    # xpad_ref: (H+2, W+2, Cp)   VMEM scratch (mxu_dtype), zero halo, reused
    #                            for both convs.  Invariant: the interior
    #                            writes below never touch the halo ring.
    H, W, Cp = out_ref.shape
    HW = H * W

    def conv3x3(w_ref):
        # im2col: single MXU matmul, K = 9*Cp (tap order ki-major, kj, ci —
        # matches pad_w's reshape).  Slices/concat stay in the (narrow) MXU
        # dtype; accumulation is f32.
        cols = [xpad_ref[ki:ki + H, kj:kj + W, :]
                for ki in range(3) for kj in range(3)]
        patches = jnp.concatenate(cols, axis=-1).reshape(HW, 9 * Cp)
        return jnp.dot(patches, w_ref[...], preferred_element_type=jnp.float32)

    # Zero-fill the scratch (halo must be zero); interior is overwritten
    # before each conv.  Done every step — see header note on why a
    # program_id==0 guard is unsafe under megacore grid splitting.
    xpad_ref[...] = jnp.zeros_like(xpad_ref)

    # Load the input block once; reuse for conv1 input and the residual.
    xv = x_ref[...]                                                # (H, W, Cp)

    # conv1 (BN1 scale folded into w1) -> +bias1 -> ReLU
    xpad_ref[1:H + 1, 1:W + 1, :] = xv.astype(xpad_ref.dtype)
    y1 = jnp.maximum(conv3x3(w1_ref) + b1_ref[...], 0.0)          # (HW, Cp) f32

    # conv2 (BN2 scale folded into w2) -> +bias2 -> +residual -> ReLU
    xpad_ref[1:H + 1, 1:W + 1, :] = y1.reshape(H, W, Cp).astype(xpad_ref.dtype)
    y2 = conv3x3(w2_ref) + b2_ref[...]
    y2 = y2 + xv.astype(jnp.float32).reshape(HW, Cp)               # residual (f32)
    out_ref[...] = jnp.maximum(y2, 0.0).reshape(H, W, Cp).astype(out_ref.dtype)


def _vmem_limit_bytes():
    """~3/4 of physical VMEM: ~96 MiB on v5e/v6e, ~48 MiB on v7x."""
    try:
        cap = int(pltpu.get_tpu_info().vmem_capacity_bytes)
    except Exception:  # pragma: no cover - conservative fallback
        cap = 128 * 1024 * 1024
    return int(min(cap * 3 // 4, 100 * 1024 * 1024))


def basic_block_forward_nhwc(x_nhwc, params, *, mxu_dtype=jnp.bfloat16):
    """BasicBlock forward on NHWC input (channels last, lane-dense).

    In a full network, keep activations NHWC (and channel-padded) across
    blocks to avoid per-block transpose/pad HBM passes.  mxu_dtype=bf16 is
    the default (f32 accumulation either way); pass jnp.float32 for
    bit-faithful parity with the f32 PyTorch module.
    """
    N, H, W, C = x_nhwc.shape
    Cp = ((C + LANE - 1) // LANE) * LANE
    eps = 1e-5

    # Fold BN (inference form): y = conv(x, w)*s + b  ==  conv(x, w*s) + b.
    s1 = params["gamma1"] / jnp.sqrt(params["var1"] + eps)
    b1 = params["beta1"] - params["mean1"] * s1
    s2 = params["gamma2"] / jnp.sqrt(params["var2"] + eps)
    b2 = params["beta2"] - params["mean2"] * s2
    w1 = params["w1"] * s1            # (3,3,Cin,Cout) * (Cout,)
    w2 = params["w2"] * s2

    def pad_w(w):                      # -> (9*Cp, Cp) im2col weight slab
        w = jnp.pad(w, ((0, 0), (0, 0), (0, Cp - C), (0, Cp - C)))
        return w.reshape(9 * Cp, Cp).astype(mxu_dtype)

    def pad_b(b):                      # -> (1, Cp) f32
        return jnp.pad(b, (0, Cp - C)).reshape(1, Cp).astype(jnp.float32)

    # Pad channels to the lane width.  No spatial padding in HBM.
    x = jnp.pad(x_nhwc, ((0, 0), (0, 0), (0, 0), (0, Cp - C)))

    out = pl.pallas_call(
        _basic_block_kernel,
        out_shape=jax.ShapeDtypeStruct((N, H, W, Cp), x.dtype),
        grid_spec=pltpu.PrefetchScalarGridSpec(
            num_scalar_prefetch=0,
            grid=(N,),
            in_specs=[
                pl.BlockSpec((None, H, W, Cp), lambda n: (n, 0, 0, 0)),
                pl.BlockSpec((9 * Cp, Cp), lambda n: (0, 0)),
                pl.BlockSpec((1, Cp), lambda n: (0, 0)),
                pl.BlockSpec((9 * Cp, Cp), lambda n: (0, 0)),
                pl.BlockSpec((1, Cp), lambda n: (0, 0)),
            ],
            out_specs=pl.BlockSpec((None, H, W, Cp), lambda n: (n, 0, 0, 0)),
            scratch_shapes=[pltpu.VMEM((H + 2, W + 2, Cp), mxu_dtype)],
        ),
        compiler_params=pltpu.CompilerParams(
            dimension_semantics=("parallel",),
            vmem_limit_bytes=_vmem_limit_bytes(),
        ),
    )(x, pad_w(w1), pad_b(b1), pad_w(w2), pad_b(b2))

    return out[..., :C]                                  # drop channel padding


def basic_block_forward(x_nchw, params, *, mxu_dtype=jnp.bfloat16):
    """BasicBlock forward. x_nchw: (N, C, H, W) float32 -> (N, C, H, W)."""
    x = jnp.transpose(x_nchw, (0, 2, 3, 1))              # NCHW -> NHWC
    out = basic_block_forward_nhwc(x, params, mxu_dtype=mxu_dtype)
    return jnp.transpose(out, (0, 3, 1, 2))              # -> NCHW


def _reference_forward(x_nchw, params):
    """Pure-JAX reference (NHWC conv via lax) for verification."""
    x = jnp.transpose(x_nchw, (0, 2, 3, 1))
    eps = 1e-5
    dn = ("NHWC", "HWIO", "NHWC")

    def conv(a, w):
        return lax.conv_general_dilated(a, w, (1, 1), ((1, 1), (1, 1)),
                                        dimension_numbers=dn)

    s1 = params["gamma1"] / jnp.sqrt(params["var1"] + eps)
    b1 = params["beta1"] - params["mean1"] * s1
    s2 = params["gamma2"] / jnp.sqrt(params["var2"] + eps)
    b2 = params["beta2"] - params["mean2"] * s2

    o = jnp.maximum(conv(x, params["w1"]) * s1 + b1, 0.0)
    o = conv(o, params["w2"]) * s2 + b2
    o = jnp.maximum(o + x, 0.0)
    return jnp.transpose(o, (0, 3, 1, 2))


if __name__ == "__main__":
    N, C, H, W = 2, 4, 16, 16          # inplanes == planes == 4, stride=1
    key = jax.random.PRNGKey(0)
    ks = jax.random.split(key, 8)

    x = jax.random.normal(ks[0], (N, C, H, W), dtype=jnp.float32)

    params = {
        "w1": jax.random.normal(ks[1], (3, 3, C, C), jnp.float32) * 0.1,
        "w2": jax.random.normal(ks[2], (3, 3, C, C), jnp.float32) * 0.1,
        "gamma1": 1.0 + 0.1 * jax.random.normal(ks[3], (C,), jnp.float32),
        "beta1": 0.1 * jax.random.normal(ks[4], (C,), jnp.float32),
        "mean1": 0.05 * jnp.arange(C, dtype=jnp.float32),
        "var1": 1.0 + 0.02 * jnp.arange(C, dtype=jnp.float32),
        "gamma2": 1.0 + 0.1 * jax.random.normal(ks[5], (C,), jnp.float32),
        "beta2": 0.1 * jax.random.normal(ks[6], (C,), jnp.float32),
        "mean2": 0.03 * jnp.arange(C, dtype=jnp.float32),
        "var2": 1.0 + 0.01 * jnp.arange(C, dtype=jnp.float32),
    }

    ref = jax.block_until_ready(_reference_forward(x, params))

    # f32 MXU path: bit-close to the f32 PyTorch/JAX reference.
    out_f32 = jax.block_until_ready(
        basic_block_forward(x, params, mxu_dtype=jnp.float32))
    assert out_f32.shape == (N, C, H, W)
    assert jnp.allclose(out_f32, ref, atol=1e-4, rtol=1e-4), "f32 mismatch"

    # bf16 MXU path (default, v6e/v7x fast path): loose tolerance.
    out_bf16 = jax.block_until_ready(basic_block_forward(x, params))
    assert out_bf16.shape == (N, C, H, W)
    assert jnp.allclose(out_bf16, ref, atol=5e-2, rtol=5e-2), "bf16 mismatch"

    print("KERNEL_OK")
</pallas_src>

<mosaic_0001>
module attributes {stable_mosaic.version = 11 : i64} {
  func.func @_basic_block_kernel(%arg0: i32, %arg1: memref<1x16x16x128xf32, #tpu.memory_space<vmem>>, %arg2: memref<1152x128xf32, #tpu.memory_space<vmem>>, %arg3: memref<1x128xf32, #tpu.memory_space<vmem>>, %arg4: memref<1152x128xf32, #tpu.memory_space<vmem>>, %arg5: memref<1x128xf32, #tpu.memory_space<vmem>>, %arg6: memref<1x16x16x128xf32, #tpu.memory_space<vmem>>, %arg7: memref<18x18x128xf32, #tpu.memory_space<vmem>>) attributes {dimension_semantics = [#tpu.dimension_semantics<parallel>], iteration_bounds = array<i64: 2>, scalar_prefetch = 0 : i64, scratch_operands = 1 : i64, tpu.core_type = #tpu.core_type<tc>, window_params = [{transform_indices = @transform_0, window_bounds = array<i64: 1, 16, 16, 128>}, {pipeline_mode = #tpu.pipeline_mode<synchronous>, transform_indices = @transform_1, window_bounds = array<i64: 1152, 128>}, {pipeline_mode = #tpu.pipeline_mode<synchronous>, transform_indices = @transform_2, window_bounds = array<i64: 1, 128>}, {pipeline_mode = #tpu.pipeline_mode<synchronous>, transform_indices = @transform_3, window_bounds = array<i64: 1152, 128>}, {pipeline_mode = #tpu.pipeline_mode<synchronous>, transform_indices = @transform_4, window_bounds = array<i64: 1, 128>}, {transform_indices = @transform_5, window_bounds = array<i64: 1, 16, 16, 128>}]} {
    %cst = arith.constant 0.000000e+00 : f32
    %0 = vector.broadcast %cst : f32 to vector<18x18x128xf32>
    %c0 = arith.constant 0 : index
    %c0_0 = arith.constant 0 : index
    %c0_1 = arith.constant 0 : index
    %1 = vector.load %arg7[%c0, %c0_0, %c0_1] : memref<18x18x128xf32, #tpu.memory_space<vmem>>, vector<18x18x128xf32>
    tpu.vector_store %arg7[%c0, %c0_0, %c0_1], %0 {strides = array<i32>} : memref<18x18x128xf32, #tpu.memory_space<vmem>>, vector<18x18x128xf32>,
    %c0_2 = arith.constant 0 : index
    %c0_3 = arith.constant 0 : index
    %c0_4 = arith.constant 0 : index
    %c0_5 = arith.constant 0 : index
    %2 = vector.load %arg1[%c0_2, %c0_3, %c0_4, %c0_5] : memref<1x16x16x128xf32, #tpu.memory_space<vmem>>, vector<1x16x16x128xf32>
    %3 = vector.shape_cast %2 : vector<1x16x16x128xf32> to vector<16x16x128xf32>
    %c1 = arith.constant 1 : index
    %c1_6 = arith.constant 1 : index
    %c0_7 = arith.constant 0 : index
    %4 = vector.load %arg7[%c1, %c1_6, %c0_7] : memref<18x18x128xf32, #tpu.memory_space<vmem>>, vector<16x16x128xf32>
    tpu.vector_store %arg7[%c1, %c1_6, %c0_7], %3 {strides = array<i32>} : memref<18x18x128xf32, #tpu.memory_space<vmem>>, vector<16x16x128xf32>,
    %c0_8 = arith.constant 0 : index
    %c0_9 = arith.constant 0 : index
    %c0_10 = arith.constant 0 : index
    %5 = vector.load %arg7[%c0_8, %c0_9, %c0_10] : memref<18x18x128xf32, #tpu.memory_space<vmem>>, vector<16x16x128xf32>
    %c0_11 = arith.constant 0 : index
    %c1_12 = arith.constant 1 : index
    %c0_13 = arith.constant 0 : index
    %6 = vector.load %arg7[%c0_11, %c1_12, %c0_13] : memref<18x18x128xf32, #tpu.memory_space<vmem>>, vector<16x16x128xf32>
    %c0_14 = arith.constant 0 : index
    %c2 = arith.constant 2 : index
    %c0_15 = arith.constant 0 : index
    %7 = vector.load %arg7[%c0_14, %c2, %c0_15] : memref<18x18x128xf32, #tpu.memory_space<vmem>>, vector<16x16x128xf32>
    %c1_16 = arith.constant 1 : index
    %c0_17 = arith.constant 0 : index
    %c0_18 = arith.constant 0 : index
    %8 = vector.load %arg7[%c1_16, %c0_17, %c0_18] : memref<18x18x128xf32, #tpu.memory_space<vmem>>, vector<16x16x128xf32>
    %c1_19 = arith.constant 1 : index
    %c1_20 = arith.constant 1 : index
    %c0_21 = arith.constant 0 : index
    %9 = vector.load %arg7[%c1_19, %c1_20, %c0_21] : memref<18x18x128xf32, #tpu.memory_space<vmem>>, vector<16x16x128xf32>
    %c1_22 = arith.constant 1 : index
    %c2_23 = arith.constant 2 : index
    %c0_24 = arith.constant 0 : index
    %10 = vector.load %arg7[%c1_22, %c2_23, %c0_24] : memref<18x18x128xf32, #tpu.memory_space<vmem>>, vector<16x16x128xf32>
    %c2_25 = arith.constant 2 : index
    %c0_26 = arith.constant 0 : index
    %c0_27 = arith.constant 0 : index
    %11 = vector.load %arg7[%c2_25, %c0_26, %c0_27] : memref<18x18x128xf32, #tpu.memory_space<vmem>>, vector<16x16x128xf32>
    %c2_28 = arith.constant 2 : index
    %c1_29 = arith.constant 1 : index
    %c0_30 = arith.constant 0 : index
    %12 = vector.load %arg7[%c2_28, %c1_29, %c0_30] : memref<18x18x128xf32, #tpu.memory_space<vmem>>, vector<16x16x128xf32>
    %c2_31 = arith.constant 2 : index
    %c2_32 = arith.constant 2 : index
    %c0_33 = arith.constant 0 : index
    %13 = vector.load %arg7[%c2_31, %c2_32, %c0_33] : memref<18x18x128xf32, #tpu.memory_space<vmem>>, vector<16x16x128xf32>
    %14 = tpu.concatenate %5, %6, %7, %8, %9, %10, %11, %12, %13 in 2 : vector<16x16x128xf32>, vector<16x16x128xf32>, vector<16x16x128xf32>, vector<16x16x128xf32>, vector<16x16x128xf32>, vector<16x16x128xf32>, vector<16x16x128xf32>, vector<16x16x128xf32>, vector<16x16x128xf32> -> vector<16x16x1152xf32>
    %15 = vector.shape_cast %14 : vector<16x16x1152xf32> to vector<256x1152xf32>
    %c0_34 = arith.constant 0 : index
    %c0_35 = arith.constant 0 : index
    %16 = vector.load %arg2[%c0_34, %c0_35] : memref<1152x128xf32, #tpu.memory_space<vmem>>, vector<1152x128xf32>
    %cst_36 = arith.constant dense<0.000000e+00> : vector<256x128xf32>
    %17 = tpu.matmul %15, %16, %cst_36 {dimension_numbers = #tpu.dot_dimension_numbers<[1], [0], [0], [1], [0, 0, 1, 1], [], []>} : vector<256x1152xf32>, vector<1152x128xf32>, vector<256x128xf32> -> vector<256x128xf32>
    %c0_37 = arith.constant 0 : index
    %c0_38 = arith.constant 0 : index
    %18 = vector.load %arg3[%c0_37, %c0_38] : memref<1x128xf32, #tpu.memory_space<vmem>>, vector<1x128xf32>
    %19 = vector.broadcast %18 : vector<1x128xf32> to vector<256x128xf32>
    %20 = arith.addf %17, %19 : vector<256x128xf32>
    %cst_39 = arith.constant 0.000000e+00 : f32
    %21 = vector.broadcast %cst_39 : f32 to vector<256x128xf32>
    %22 = arith.maximumf %20, %21 : vector<256x128xf32>
    %23 = vector.shape_cast %22 : vector<256x128xf32> to vector<16x16x128xf32>
    %c1_40 = arith.constant 1 : index
    %c1_41 = arith.constant 1 : index
    %c0_42 = arith.constant 0 : index
    %24 = vector.load %arg7[%c1_40, %c1_41, %c0_42] : memref<18x18x128xf32, #tpu.memory_space<vmem>>, vector<16x16x128xf32>
    tpu.vector_store %arg7[%c1_40, %c1_41, %c0_42], %23 {strides = array<i32>} : memref<18x18x128xf32, #tpu.memory_space<vmem>>, vector<16x16x128xf32>,
    %c0_43 = arith.constant 0 : index
    %c0_44 = arith.constant 0 : index
    %c0_45 = arith.constant 0 : index
    %25 = vector.load %arg7[%c0_43, %c0_44, %c0_45] : memref<18x18x128xf32, #tpu.memory_space<vmem>>, vector<16x16x128xf32>
    %c0_46 = arith.constant 0 : index
    %c1_47 = arith.constant 1 : index
    %c0_48 = arith.constant 0 : index
    %26 = vector.load %arg7[%c0_46, %c1_47, %c0_48] : memref<18x18x128xf32, #tpu.memory_space<vmem>>, vector<16x16x128xf32>
    %c0_49 = arith.constant 0 : index
    %c2_50 = arith.constant 2 : index
    %c0_51 = arith.constant 0 : index
    %27 = vector.load %arg7[%c0_49, %c2_50, %c0_51] : memref<18x18x128xf32, #tpu.memory_space<vmem>>, vector<16x16x128xf32>
    %c1_52 = arith.constant 1 : index
    %c0_53 = arith.constant 0 : index
    %c0_54 = arith.constant 0 : index
    %28 = vector.load %arg7[%c1_52, %c0_53, %c0_54] : memref<18x18x128xf32, #tpu.memory_space<vmem>>, vector<16x16x128xf32>
    %c1_55 = arith.constant 1 : index
    %c1_56 = arith.constant 1 : index
    %c0_57 = arith.constant 0 : index
    %29 = vector.load %arg7[%c1_55, %c1_56, %c0_57] : memref<18x18x128xf32, #tpu.memory_space<vmem>>, vector<16x16x128xf32>
    %c1_58 = arith.constant 1 : index
    %c2_59 = arith.constant 2 : index
    %c0_60 = arith.constant 0 : index
    %30 = vector.load %arg7[%c1_58, %c2_59, %c0_60] : memref<18x18x128xf32, #tpu.memory_space<vmem>>, vector<16x16x128xf32>
    %c2_61 = arith.constant 2 : index
    %c0_62 = arith.constant 0 : index
    %c0_63 = arith.constant 0 : index
    %31 = vector.load %arg7[%c2_61, %c0_62, %c0_63] : memref<18x18x128xf32, #tpu.memory_space<vmem>>, vector<16x16x128xf32>
    %c2_64 = arith.constant 2 : index
    %c1_65 = arith.constant 1 : index
    %c0_66 = arith.constant 0 : index
    %32 = vector.load %arg7[%c2_64, %c1_65, %c0_66] : memref<18x18x128xf32, #tpu.memory_space<vmem>>, vector<16x16x128xf32>
    %c2_67 = arith.constant 2 : index
    %c2_68 = arith.constant 2 : index
    %c0_69 = arith.constant 0 : index
    %33 = vector.load %arg7[%c2_67, %c2_68, %c0_69] : memref<18x18x128xf32, #tpu.memory_space<vmem>>, vector<16x16x128xf32>
    %34 = tpu.concatenate %25, %26, %27, %28, %29, %30, %31, %32, %33 in 2 : vector<16x16x128xf32>, vector<16x16x128xf32>, vector<16x16x128xf32>, vector<16x16x128xf32>, vector<16x16x128xf32>, vector<16x16x128xf32>, vector<16x16x128xf32>, vector<16x16x128xf32>, vector<16x16x128xf32> -> vector<16x16x1152xf32>
    %35 = vector.shape_cast %34 : vector<16x16x1152xf32> to vector<256x1152xf32>
    %c0_70 = arith.constant 0 : index
    %c0_71 = arith.constant 0 : index
    %36 = vector.load %arg4[%c0_70, %c0_71] : memref<1152x128xf32, #tpu.memory_space<vmem>>, vector<1152x128xf32>
    %cst_72 = arith.constant dense<0.000000e+00> : vector<256x128xf32>
    %37 = tpu.matmul %35, %36, %cst_72 {dimension_numbers = #tpu.dot_dimension_numbers<[1], [0], [0], [1], [0, 0, 1, 1], [], []>} : vector<256x1152xf32>, vector<1152x128xf32>, vector<256x128xf32> -> vector<256x128xf32>
    %c0_73 = arith.constant 0 : index
    %c0_74 = arith.constant 0 : index
    %38 = vector.load %arg5[%c0_73, %c0_74] : memref<1x128xf32, #tpu.memory_space<vmem>>, vector<1x128xf32>
    %39 = vector.broadcast %38 : vector<1x128xf32> to vector<256x128xf32>
    %40 = arith.addf %37, %39 : vector<256x128xf32>
    %41 = vector.shape_cast %3 : vector<16x16x128xf32> to vector<256x128xf32>
    %42 = arith.addf %40, %41 : vector<256x128xf32>
    %cst_75 = arith.constant 0.000000e+00 : f32
    %43 = vector.broadcast %cst_75 : f32 to vector<256x128xf32>
    %44 = arith.maximumf %42, %43 : vector<256x128xf32>
    %45 = vector.shape_cast %44 : vector<256x128xf32> to vector<16x16x128xf32>
    %c0_76 = arith.constant 0 : index
    %c0_77 = arith.constant 0 : index
    %c0_78 = arith.constant 0 : index
    %c0_79 = arith.constant 0 : index
    %46 = vector.load %arg6[%c0_76, %c0_77, %c0_78, %c0_79] : memref<1x16x16x128xf32, #tpu.memory_space<vmem>>, vector<1x16x16x128xf32>
    %47 = vector.shape_cast %46 : vector<1x16x16x128xf32> to vector<16x16x128xf32>
    %48 = vector.shape_cast %45 : vector<16x16x128xf32> to vector<1x16x16x128xf32>
    tpu.vector_store %arg6[%c0_76, %c0_77, %c0_78, %c0_79], %48 {strides = array<i32>} : memref<1x16x16x128xf32, #tpu.memory_space<vmem>>, vector<1x16x16x128xf32>,
    return
  }
  func.func @transform_0(%arg0: i32) -> (i32, i32, i32, i32) {
    %c0_i32 = arith.constant 0 : i32
    %c0_i32_0 = arith.constant 0 : i32
    %c0_i32_1 = arith.constant 0 : i32
    %c0_i32_2 = arith.constant 0 : i32
    return %arg0, %c0_i32, %c0_i32_0, %c0_i32_1 : i32, i32, i32, i32
  }
  func.func @transform_1(%arg0: i32) -> (i32, i32) {
    %c0_i32 = arith.constant 0 : i32
    %c0_i32_0 = arith.constant 0 : i32
    %c0_i32_1 = arith.constant 0 : i32
    return %c0_i32, %c0_i32_0 : i32, i32
  }
  func.func @transform_2(%arg0: i32) -> (i32, i32) {
    %c0_i32 = arith.constant 0 : i32
    %c0_i32_0 = arith.constant 0 : i32
    %c0_i32_1 = arith.constant 0 : i32
    return %c0_i32, %c0_i32_0 : i32, i32
  }
  func.func @transform_3(%arg0: i32) -> (i32, i32) {
    %c0_i32 = arith.constant 0 : i32
    %c0_i32_0 = arith.constant 0 : i32
    %c0_i32_1 = arith.constant 0 : i32
    return %c0_i32, %c0_i32_0 : i32, i32
  }
  func.func @transform_4(%arg0: i32) -> (i32, i32) {
    %c0_i32 = arith.constant 0 : i32
    %c0_i32_0 = arith.constant 0 : i32
    %c0_i32_1 = arith.constant 0 : i32
    return %c0_i32, %c0_i32_0 : i32, i32
  }
  func.func @transform_5(%arg0: i32) -> (i32, i32, i32, i32) {
    %c0_i32 = arith.constant 0 : i32
    %c0_i32_0 = arith.constant 0 : i32
    %c0_i32_1 = arith.constant 0 : i32
    %c0_i32_2 = arith.constant 0 : i32
    return %arg0, %c0_i32, %c0_i32_0, %c0_i32_1 : i32, i32, i32, i32
  }
}

</mosaic_0001>

<bundles_post_ra>
// kernel: tpu_custom_call.1
= control target key start
LH: loop header
LB: loop body
LE: loop exit
PB: predicated region body
PF: predicated region fallthrough
CT: control target
= control target key end

     0   :  { %10 = vsyncpa [#allocation4], 0  ;;  %s7178_s0 = inlined_call_operand.hbm [shape: f32[2,16,16,128], index: 0, kind: input, shape index: {}]   ;;  %s7179_s1 = inlined_call_operand.hbm [shape: f32[1152,128], index: 1, kind: input, shape index: {}]   ;;  %s7180_s2 = inlined_call_operand.hbm [shape: f32[1,128], index: 2, kind: input, shape index: {}]   ;;  %s7181_s3 = inlined_call_operand.hbm [shape: f32[1152,128], index: 3, kind: input, shape index: {}]   ;;  %s7182_s4 = inlined_call_operand.hbm [shape: f32[1,128], index: 4, kind: input, shape index: {}]   ;;  %s7183_s5 = inlined_call_operand.hbm [shape: f32[2,16,16,128], index: 5, kind: output, shape index: {}]  }
   0x1   :  { %12 = vsyncpa [#allocation4 + $0x1], 0 }
   0x2   :  { %13 = vsyncpa [#allocation7], 0 }
   0x3   :  { %14 = vsyncpa [#allocation10], 0 }
   0x4   :  { %15 = vsyncpa [#allocation5], 0 }
   0x5   :  { %17 = vsyncpa [#allocation5 + $0x1], 0  ;;  %s5411_s18 = smov 0   ;;  %s5413_s19 = smov 0  }
   0x6   :  { %s5415_s20 = smov 0   ;;  %s5417_s21 = smov 0  }
   0x7 LB: > { %s5432_s22 = sadd.s32 4294967295, %s5367_s21   ;;  %s3830_s23 = sadd.s32 4294967294, %s5367_s21   ;;  %s5367_s21 = sphi %s5417_s21, %s7373_s21   ;;  %s5363_s20 = sphi %s5415_s20, %s7372_s20   ;;  %s5359_s19 = sphi %s5413_s19, %s7371_s19   ;;  %s5355_s18 = sphi %s5411_s18, %s7370_s18  }
   0x8   : > { %p43_p0 = scmp.ne.s32.totalorder %s5359_s19, %s5355_s18  ;;  %p7184_p1 = scmp.eq.s32.totalorder %s5432_s22, 0 }
   0x9   : > { %p157_p3 = scmp.eq.s32.totalorder %s3830_s23, 1  ;;  %p3831_p5 = scmp.ge.s32.totalorder %s5367_s21, 1 }
   0xa   : > { %p5441_p4 = por %p7184_p1, %p43_p0  ;;  %p164_p7 = scmp.lt.s32.totalorder %s5367_s21, 3 }
   0xb   : > { %p5446_p6 = por %p157_p3, %p43_p0  ;;  %s5369_s27 = smov [#allocation6]  }
   0xc   : > { %s7251_s24 = scalar_select %p5441_p4, 1, 0 }
   0xd   : > { %s7252_s25 = scalar_select %p5446_p6, 1, 0 }
   0xe   : > { %p5451_p8 = pnand %p3831_p5, %p164_p7  ;;  %s176_s28 = sshll.u32 %s5369_s27, 4  ;;  %s5455_s28 = int_to_ptr.vmem [resolvable:$true] %s176_s28 }
   0xf   : > { %s5370_s30 = smov [#allocation9]   ;;  %s5371_s7 = smov [#allocation8]  }
  0x10   : > { %s7253_s26 = scalar_select %p5451_p8, 1, 0 }
  0x11   : > { %p5044_p9 = pneg %p5451_p8  ;;  %s200_s6 = sshll.u32 %s5370_s30, 4  ;;  %s5466_s6 = int_to_ptr.vmem [resolvable:$true] %s200_s6 }
  0x12   : > { %s5468_s8 = sshll.u32 %s5371_s7, 4  ;;  %s5151_s11 = scalar_lea.hbm %s7179_s1, 18432  ;;  %s191_s8 = int_to_ptr.vmem [resolvable:$true] %s5468_s8 }
  0x13   : > { %p5462_p11 = pnand %p5044_p9, %p7184_p1  ;;  %p5152_p12 = scmp.ne.s32.totalorder %s7179_s1, %s5151_s11 }
  0x14   : > { %p5158_p5 = scmp.lt.u32.totalorder %s5151_s11, %s7179_s1 }
  0x15   : > { %p5478_p13 = pneg %p5462_p11 }
  0x17   : > { %p5154_p0 = pnand %p5478_p13, %p5152_p12 }
  0x19   : > { %p5155_p3 = pneg %p5154_p0 }
  0x1b   : > { %p5160_p7 = pnand %p5158_p5, %p5155_p3 }
  0x1d   : > { %5163 = shalt.err (!%p5160_p7)
}
  0x1e   : > { %s5164_s17 = scalar_lea.vmem %s5455_s28, 18432  ;;  %p5172_p2 = scmp.lt.s32.totalorder %s5455_s28, %s5455_s28 }
  0x1f   : > { %p5165_p9 = scmp.ne.s32.totalorder %s5455_s28, %s5164_s17  ;;  %p5173_p6 = scmp.lt.s32.totalorder %s5164_s17, %s5164_s17 }
  0x21   : > { %p5167_p10 = pnand %p5165_p9, %p5478_p13  ;;  %p5174_p12 = por %p5173_p6, %p5172_p2 }
  0x23   : > { %p5168_p1 = pneg %p5167_p10 }
  0x25   : > { %p5175_p0 = pnand %p5174_p12, %p5168_p1 }
  0x27   : > { %5178 = shalt.err (!%p5175_p0)
}
  0x28   : > { %s5372_s23 = smov 128   ;;  %s5373_s27 = smov 8  }
  0x29   : > { %5047 = dma.hbm_to_vmem [thread:$0]  (!%p5462_p11), %s7179_s1, 18432, %s5455_s28, [#allocation7], %s5372_s23, %s5372_s23, %s5373_s27  }
  0x2a   : > { %s5179_s11 = scalar_lea.hbm %s7181_s3, 18432 }
  0x2b   : > { %p5180_p1 = scmp.ne.s32.totalorder %s7181_s3, %s5179_s11  ;;  %p5186_p10 = scmp.lt.u32.totalorder %s5179_s11, %s7181_s3 }
  0x2d   : > { %p5182_p2 = pnand %p5180_p1, %p5478_p13 }
  0x2f   : > { %p5183_p6 = pneg %p5182_p2 }
  0x31   : > { %p5188_p3 = pnand %p5186_p10, %p5183_p6 }
  0x33   : > { %5191 = shalt.err (!%p5188_p3)
}
  0x34   : > { %s5192_s28 = scalar_lea.vmem %s5466_s6, 18432  ;;  %p5200_p12 = scmp.lt.s32.totalorder %s5466_s6, %s5466_s6 }
  0x35   : > { %p5193_p5 = scmp.ne.s32.totalorder %s5466_s6, %s5192_s28  ;;  %p5201_p0 = scmp.lt.s32.totalorder %s5192_s28, %s5192_s28 }
  0x37   : > { %p5195_p7 = pnand %p5193_p5, %p5478_p13  ;;  %p5202_p1 = por %p5201_p0, %p5200_p12 }
  0x39   : > { %p5196_p9 = pneg %p5195_p7 }
  0x3b   : > { %p5203_p2 = pnand %p5202_p1, %p5196_p9 }
  0x3d   : > { %5206 = shalt.err (!%p5203_p2)
}
  0x3e   : > { %5053 = dma.hbm_to_vmem [thread:$0]  (!%p5462_p11), %s7181_s3, 18432, %s5466_s6, [#allocation10], %s5372_s23, %s5372_s23, %s5373_s27  }
  0x3f   : > { %s5207_s10 = scalar_lea.hbm %s7180_s2, 16 }
  0x40   : > { %p5208_p6 = scmp.ne.s32.totalorder %s7180_s2, %s5207_s10  ;;  %p5214_p5 = scmp.lt.u32.totalorder %s5207_s10, %s7180_s2 }
  0x42   : > { %p5210_p10 = pnand %p5208_p6, %p5478_p13 }
  0x44   : > { %p5211_p3 = pneg %p5210_p10 }
  0x46   : > { %p5216_p7 = pnand %p5214_p5, %p5211_p3 }
  0x48   : > { %5219 = shalt.err (!%p5216_p7)
}
  0x49   : > { %s5220_s16 = scalar_lea.vmem %s191_s8, 16  ;;  %s5227_s6 = scalar_lea.vmem %s191_s8, 32 }
  0x4a   : > { %p5221_p9 = scmp.ne.s32.totalorder %s191_s8, %s5220_s16  ;;  %p5228_p1 = scmp.lt.s32.totalorder %s191_s8, %s191_s8 }
  0x4b   : > { %p5229_p2 = scmp.lt.s32.totalorder %s5227_s6, %s5220_s16 }
  0x4c   : > { %p5223_p12 = pnand %p5221_p9, %p5478_p13 }
  0x4d   : > { %p5230_p4 = por %p5229_p2, %p5228_p1 }
  0x4e   : > { %p5224_p0 = pneg %p5223_p12 }
  0x50   : > { %p5231_p8 = pnand %p5230_p4, %p5224_p0 }
  0x52   : > { %5234 = shalt.err (!%p5231_p8)
}
  0x53   : > { %5050 = dma.hbm_to_vmem [thread:$0]  (!%p5462_p11), %s7180_s2, 16, %s191_s8, [#allocation7]  }
  0x54   : > { %s5374_s30 = smov [#allocation11]   ;;  %s5235_s11 = scalar_lea.hbm %s7182_s4, 16 }
  0x55   : > { %s214_s7 = sshll.u32 %s5374_s30, 4  ;;  %p5236_p6 = scmp.ne.s32.totalorder %s7182_s4, %s5235_s11  ;;  %s215_s7 = int_to_ptr.vmem [resolvable:$true] %s214_s7 }
  0x56   : > { %p5242_p10 = scmp.lt.u32.totalorder %s5235_s11, %s7182_s4 }
  0x57   : > { %p5238_p4 = pnand %p5236_p6, %p5478_p13 }
  0x59   : > { %p5239_p8 = pneg %p5238_p4 }
  0x5b   : > { %p5244_p3 = pnand %p5242_p10, %p5239_p8 }
  0x5d   : > { %5247 = shalt.err (!%p5244_p3)
}
  0x5e   : > { %s5248_s8 = scalar_lea.vmem %s215_s7, 16  ;;  %s5255_s6 = scalar_lea.vmem %s215_s7, 32 }
  0x5f   : > { %p5249_p5 = scmp.ne.s32.totalorder %s215_s7, %s5248_s8  ;;  %p5256_p12 = scmp.lt.s32.totalorder %s215_s7, %s215_s7 }
  0x60   : > { %p5257_p0 = scmp.lt.s32.totalorder %s5255_s6, %s5248_s8 }
  0x61   : > { %p5251_p7 = pnand %p5249_p5, %p5478_p13 }
  0x62   : > { %p5258_p1 = por %p5257_p0, %p5256_p12 }
  0x63   : > { %p5252_p9 = pneg %p5251_p7 }
  0x65   : > { %p5259_p2 = pnand %p5258_p1, %p5252_p9 }
  0x67   : > { %5262 = shalt.err (!%p5259_p2)
}
  0x68   : > { %5056 = dma.hbm_to_vmem [thread:$0]  (!%p5462_p11), %s7182_s4, 16, %s215_s7, [#allocation10]  }
  0x69   : > { %s5566_s14 = sadd.s32 1, %s5367_s21   ;;  %s30_s30 = sadd.s32 1, %s5363_s20 }
  0x6a   : > { %s27_s29 = ssub.s32 %s5367_s21, %s5566_s14  ;;  %p37_p13 = scmp.ne.s32.totalorder %s5363_s20, %s5359_s19 }
  0x6b   : > { %p28_p6 = scmp.eq.s32.totalorder %s27_s29, 0  ;;  %p38_p4 = scmp.eq.s32.totalorder %s5367_s21, 0 }
  0x6c   : > { %p7256_p8 = scmp.eq.s32.totalorder %s5432_s22, 1  ;;  %p5069_p3 = scmp.lt.s32.totalorder %s5367_s21, 2 }
  0x6d   : > { %s5582_s10 = scalar_select %p28_p6, %s5363_s20, %s30_s30  }
  0x6e   : > { %p5576_p10 = por %p7256_p8, %p37_p13  ;;  %p39_p5 = por %p38_p4, %p37_p13 }
  0x6f   : > { %s225_s11 = sand.u32 1, %s5363_s20   ;;  %s3854_s7 = sshll.u32 %s5367_s21, 12 }
  0x70   : > { %s3837_s12 = sshll.u32 %s225_s11, 8  ;;  %s5589_s16 = scalar_lea.hbm %s7178_s0, %s3854_s7 }
  0x71   : > { %s229_s8 = scalar_lea.vmem [#allocation3], %s3837_s12  ;;  %p5593_p11 = pnand %p5069_p3, %p39_p5 }
  0x72   : > { %s236_s6 = sshll.u32 %s229_s8, 4  ;;  %s5597_s17 = scalar_lea.sflag [#allocation4], %s225_s11  ;;  %s5591_s6 = int_to_ptr.vmem [resolvable:$true] %s236_s6 }
  0x73   : > { %s5263_s30 = scalar_lea.hbm %s5589_s16, 4096  ;;  %p5265_p9 = pneg %p5593_p11 }
  0x74   : > { %p5264_p7 = scmp.ne.s32.totalorder %s5589_s16, %s5263_s30  ;;  %s5268_s7 = scalar_lea.hbm %s7178_s0, 8192 }
  0x75   : > { %p5269_p1 = scmp.lt.u32.totalorder %s5589_s16, %s7178_s0  ;;  %p5270_p2 = scmp.lt.u32.totalorder %s5268_s7, %s5263_s30 }
  0x76   : > { %p5266_p12 = pnand %p5265_p9, %p5264_p7  ;;  %p5272_p6 = scmp.lt.u32.totalorder %s5263_s30, %s5589_s16 }
  0x77   : > { %p5271_p13 = por %p5270_p2, %p5269_p1 }
  0x78   : > { %p5267_p0 = pneg %p5266_p12 }
  0x79   : > { %p5273_p4 = por %p5272_p6, %p5271_p13 }
  0x7b   : > { %p5274_p8 = pnand %p5273_p4, %p5267_p0 }
  0x7d   : > { %5277 = shalt.err (!%p5274_p8)
}
  0x7e   : > { %s5278_s11 = scalar_lea.vmem %s5591_s6, 4096  ;;  %s5375_s8 = smov [#allocation3]  }
  0x7f   : > { %p5279_p3 = scmp.ne.s32.totalorder %s5591_s6, %s5278_s11  ;;  %s5283_s29 = sshll.u32 %s5375_s8, 4  ;;  %s5284_s29 = int_to_ptr.vmem [resolvable:$false] %s5283_s29 }
  0x80   : > { %s5285_s12 = scalar_lea.vmem %s5284_s29, 8192  ;;  %p5286_p12 = scmp.lt.s32.totalorder %s5591_s6, %s5284_s29 }
  0x81   : > { %p5281_p5 = pnand %p5279_p3, %p5265_p9  ;;  %p5287_p1 = scmp.lt.s32.totalorder %s5285_s12, %s5278_s11 }
  0x83   : > { %p5282_p7 = pneg %p5281_p5  ;;  %p5288_p2 = por %p5287_p1, %p5286_p12 }
  0x85   : > { %p5289_p13 = pnand %p5288_p2, %p5282_p7 }
  0x87   : > { %5292 = shalt.err (!%p5289_p13)
}
  0x88   : > { %5060 = dma.hbm_to_vmem [thread:$0]  (!%p5593_p11), %s5589_s16, 4096, %s5591_s6, %s5597_s17, %s5372_s23, %s5372_s23, %s5373_s27  }
  0x89   : > { %p7259_p9 = scmp.ne.s32.totalorder %s7253_s26, 0 }
  0x8b   : > { %248 = sbr.rel (%p7259_p9) target bundleno = 1584 (0x630), region = 40 }
  0x92   : > { %s5631_s30 = sand.u32 1, %s5359_s19   ;;  %p7260_p0 = scmp.ne.s32.totalorder %s7251_s24, 0 }
  0x93   : > { %s3841_s7 = sshll.u32 %s5631_s30, 8  ;;  %s251_s13 = scalar_lea.sflag [#allocation4], %s5631_s30 }
  0x94   : > { %s5637_s28 = scalar_lea.vmem [#allocation3], %s3841_s7 }
  0x95   : > { %5338 = dma.done.wait (%p7260_p0), %s251_s13, 4096  }
  0x96   : > { %5340 = vsyncadd (%p7260_p0), %s251_s13, 4294963200  ;;  %p7261_p11 = scmp.eq.s32.totalorder %s5432_s22, 0 }
  0x98   : > { %5342 = dma.done.wait (%p7261_p11), [#allocation7], 18448   ;;  %p7262_p6 = pmov %p7261_p11 }
  0x9a   : > { %5344 = vsyncadd (%p7262_p6), [#allocation7], 4294948848  ;;  %p7263_p4 = pmov %p7262_p6 }
  0x9c   : > { %5346 = dma.done.wait (%p7263_p4), [#allocation10], 18448   ;;  %p7264_p8 = pmov %p7263_p4 }
  0x9d   : > { %v7211_v0 = vmov 0.0|0.0   ;;  %v5377_v1 = vmov 0.0   ;;  %v705_v2 = vld [vmem:[#allocation6] sm:$0xff]  ;;  %v706_v3 = vld [vmem:[#allocation6 + $0x8] sm:$0xff]  ;;  %v707_v4 = vld [vmem:[#allocation6 + $0x10] sm:$0xff]  ;;  %s7010_s24 = scalar_lea.vmem [#allocation12], %s3841_s7 }
  0x9e   : > { %5348 = vsyncadd (%p7264_p8), [#allocation10], 4294948848  ;;  %4112 = vmatprep.subr.bf16.mxu0 %v7211_v0  ;;  %297 = vst [vmem:[#allocation2] sm:$0xff] %v5377_v1  ;;  %v4113_v5 = vpack.c.bf16 %v706_v3, %v705_v2  ;;  %v708_v6 = vld [vmem:[#allocation6 + $0x18] sm:$0xff]  ;;  %v709_v8 = vld [vmem:[#allocation6 + $0x20] sm:$0xff]  ;;  %s3855_s26 = sshll.u32 %s5432_s22, 12 }
  0x9f   : > { %298 = vst [vmem:[#allocation2 + $0x8] sm:$0xff] %v5377_v1  ;;  %299 = vst [vmem:[#allocation2 + $0x10] sm:$0x3] %v5377_v1  ;;  %v4116_v7 = vpack.c.bf16 %v708_v6, %v707_v4  ;;  %v710_v9 = vld [vmem:[#allocation6 + $0x28] sm:$0xff]  ;;  %v711_v11 = vld [vmem:[#allocation6 + $0x30] sm:$0xff]  ;;  %s3719_s23 = sshll.u32 %s7010_s24, 4  ;;  %s7130_s6 = scalar_lea.hbm %s7183_s5, %s3855_s26  ;;  %s7132_s23 = int_to_ptr.vmem [resolvable:$true] %s3719_s23 }
  0xa0   : > { %300 = vst [vmem:[#allocation2 + $0x18] sm:$0xff] %v5377_v1  ;;  %301 = vst [vmem:[#allocation2 + $0x20] sm:$0xff] %v5377_v1  ;;  %4114 = vmatpush1.bf16.msra.mxu0 %v4113_v5  ;;  %v4119_v10 = vpack.c.bf16 %v710_v9, %v709_v8  ;;  %v712_v12 = vld [vmem:[#allocation6 + $0x38] sm:$0xff]  ;;  %v713_v15 = vld [vmem:[#allocation6 + $0x40] sm:$0xff]  ;;  %s3706_s22 = scalar_lea.sflag [#allocation5], %s5631_s30  ;;  %s5293_s17 = scalar_lea.vmem %s7132_s23, 4096 }
  0xa1   : > { %302 = vst [vmem:[#allocation2 + $0x28] sm:$0x3] %v5377_v1  ;;  %303 = vst [vmem:[#allocation2 + $0x30] sm:$0xff] %v5377_v1  ;;  %4115 = vmatprep.subr.bf16.mxu0 %v7211_v0  ;;  %v4122_v14 = vpack.c.bf16 %v712_v12, %v711_v11  ;;  %v714_v16 = vld [vmem:[#allocation6 + $0x48] sm:$0xff]  ;;  %v5710_v17 = vld [vmem:[%s5637_s28] sm:$0xff]  ;;  %p5294_p3 = scmp.ne.s32.totalorder %s7132_s23, %s5293_s17  ;;  %s5378_s15 = smov [#allocation12]  }
  0xa2   : > { %304 = vst [vmem:[#allocation2 + $0x38] sm:$0xff] %v5377_v1  ;;  %305 = vst [vmem:[#allocation2 + $0x40] sm:$0x3] %v5377_v1  ;;  %v5714_v18 = vld [vmem:[%s5637_s28 + $0x8] sm:$0xff]  ;;  %v5717_v19 = vld [vmem:[%s5637_s28 + $0x10] sm:$0xff]  ;;  %v4125_v22 = vpack.c.bf16 %v714_v16, %v713_v15  ;;  %s5297_s11 = sshll.u32 %s5378_s15, 4  ;;  %s5298_s11 = int_to_ptr.vmem [resolvable:$false] %s5297_s11 }
  0xa3   : > { %306 = vst [vmem:[#allocation2 + $0x48] sm:$0xff] %v5377_v1  ;;  %307 = vst [vmem:[#allocation2 + $0x50] sm:$0xff] %v5377_v1  ;;  %v5722_v20 = vld [vmem:[%s5637_s28 + $0x18] sm:$0xff]  ;;  %v5725_v21 = vld [vmem:[%s5637_s28 + $0x20] sm:$0xff]  ;;  %p5295_p5 = pnand %p5294_p3, %p5576_p10  ;;  %s5299_s8 = scalar_lea.vmem %s5298_s11, 8192 }
  0xa4   : > { %308 = vst [vmem:[#allocation2 + $0x58] sm:$0x3] %v5377_v1  ;;  %309 = vst [vmem:[#allocation2 + $0x60] sm:$0xff] %v5377_v1  ;;  %4117 = vmatpush1.bf16.msra.mxu0 %v4116_v7  ;;  %v5730_v23 = vld [vmem:[%s5637_s28 + $0x28] sm:$0xff]  ;;  %v715_v24 = vld [vmem:[#allocation6 + $0x50] sm:$0xff]  ;;  %p5300_p12 = scmp.lt.s32.totalorder %s7132_s23, %s5298_s11  ;;  %p5301_p1 = scmp.lt.s32.totalorder %s5299_s8, %s5293_s17 }
  0xa5   : > { %310 = vst [vmem:[#allocation2 + $0x68] sm:$0xff] %v5377_v1  ;;  %311 = vst [vmem:[#allocation2 + $0x70] sm:$0x3] %v5377_v1  ;;  %4118 = vmatprep.subr.bf16.mxu0 %v7211_v0  ;;  %v716_v25 = vld [vmem:[#allocation6 + $0x58] sm:$0xff]  ;;  %v5735_v26 = vld [vmem:[%s5637_s28 + $0x30] sm:$0xff]  ;;  %p5296_p7 = pneg %p5295_p5 }
  0xa6   : > { %312 = vst [vmem:[#allocation2 + $0x78] sm:$0xff] %v5377_v1  ;;  %313 = vst [vmem:[#allocation2 + $0x80] sm:$0xff] %v5377_v1  ;;  %v448_v13 = vld [vmem:[#allocation2 + $0x1] sm:$0xff]  ;;  %v5742_v28 = vld [vmem:[%s5637_s28 + $0x40] sm:$0xff]  ;;  %v4128_v31 = vpack.c.bf16 %v716_v25, %v715_v24  ;;  %p5302_p2 = por %p5301_p1, %p5300_p12 }
  0xa7   : > { %314 = vst [vmem:[#allocation2 + $0x88] sm:$0x3] %v5377_v1  ;;  %315 = vst [vmem:[#allocation2 + $0x90] sm:$0xff] %v5377_v1  ;;  %920 = vmatprep.mubr.f32.mxu0 %v448_v13  ;;  %v5739_v27 = vld [vmem:[%s5637_s28 + $0x38] sm:$0xff]  ;;  %v5747_v29 = vld [vmem:[%s5637_s28 + $0x48] sm:$0xff] }
  0xa8   : > { %316 = vst [vmem:[#allocation2 + $0x98] sm:$0xff] %v5377_v1  ;;  %317 = vst [vmem:[#allocation2 + $0xa0] sm:$0x3] %v5377_v1  ;;  %4120 = vmatpush1.bf16.msra.mxu0 %v4119_v10  ;;  %v5750_v30 = vld [vmem:[%s5637_s28 + $0x50] sm:$0xff]  ;;  %v5755_v32 = vld [vmem:[%s5637_s28 + $0x58] sm:$0xff]  ;;  %p5303_p13 = pnand %p5302_p2, %p5296_p7 }
  0xa9   : > { %318 = vst [vmem:[#allocation2 + $0xa8] sm:$0xff] %v5377_v1  ;;  %319 = vst [vmem:[#allocation2 + $0xb0] sm:$0xff] %v5377_v1  ;;  %4121 = vmatprep.subr.bf16.mxu0 %v7211_v0  ;;  %v717_v33 = vld [vmem:[#allocation6 + $0x60] sm:$0xff]  ;;  %v718_v34 = vld [vmem:[#allocation6 + $0x68] sm:$0xff] }
  0xaa   : > { %320 = vst [vmem:[#allocation2 + $0xb8] sm:$0x3] %v5377_v1  ;;  %321 = vst [vmem:[#allocation2 + $0xc0] sm:$0xff] %v5377_v1  ;;  %v5760_v35 = vld [vmem:[%s5637_s28 + $0x60] sm:$0xff]  ;;  %v5764_v36 = vld [vmem:[%s5637_s28 + $0x68] sm:$0xff]  ;;  %v4131_v37 = vpack.c.bf16 %v718_v34, %v717_v33 }
  0xab   : > { %322 = vst [vmem:[#allocation2 + $0xc8] sm:$0xff] %v5377_v1  ;;  %323 = vst [vmem:[#allocation2 + $0xd0] sm:$0x3] %v5377_v1  ;;  %v5768_v38 = vld [vmem:[%s5637_s28 + $0x70] sm:$0xff]  ;;  %v720_v40 = vld [vmem:[#allocation6 + $0x78] sm:$0xff] }
  0xac   : > { %324 = vst [vmem:[#allocation2 + $0xd8] sm:$0xff] %v5377_v1  ;;  %325 = vst [vmem:[#allocation2 + $0xe0] sm:$0xff] %v5377_v1  ;;  %4123 = vmatpush1.bf16.msra.mxu0 %v4122_v14  ;;  %v719_v39 = vld [vmem:[#allocation6 + $0x70] sm:$0xff]  ;;  %v5773_v41 = vld [vmem:[%s5637_s28 + $0x78] sm:$0xff] }
  0xad   : > { %326 = vst [vmem:[#allocation2 + $0xe8] sm:$0x3] %v5377_v1  ;;  %327 = vst [vmem:[#allocation2 + $0xf0] sm:$0xff] %v5377_v1  ;;  %4124 = vmatprep.subr.bf16.mxu0 %v7211_v0  ;;  %v5777_v42 = vld [vmem:[%s5637_s28 + $0x80] sm:$0xff]  ;;  %v4134_v43 = vpack.c.bf16 %v720_v40, %v719_v39  ;;  %v5781_v44 = vld [vmem:[%s5637_s28 + $0x88] sm:$0xff] }
  0xae   : > { %328 = vst [vmem:[#allocation2 + $0xf8] sm:$0xff] %v5377_v1  ;;  %329 = vst [vmem:[#allocation2 + $0x100] sm:$0x3] %v5377_v1  ;;  %v721_v45 = vld [vmem:[#allocation6 + $0x80] sm:$0xff]  ;;  %v722_v46 = vld [vmem:[#allocation6 + $0x88] sm:$0xff] }
  0xaf   : > { %330 = vst [vmem:[#allocation2 + $0x108] sm:$0xff] %v5377_v1  ;;  %331 = vst [vmem:[#allocation2 + $0x110] sm:$0xff] %v5377_v1  ;;  %v5786_v47 = vld [vmem:[%s5637_s28 + $0x90] sm:$0xff]  ;;  %v5790_v48 = vld [vmem:[%s5637_s28 + $0x98] sm:$0xff]  ;;  %v4137_v50 = vpack.c.bf16 %v722_v46, %v721_v45 }
  0xb0   : > { %332 = vst [vmem:[#allocation2 + $0x118] sm:$0x3] %v5377_v1  ;;  %333 = vst [vmem:[#allocation2 + $0x120] sm:$0xff] %v5377_v1  ;;  %4126 = vmatpush1.bf16.msra.mxu0 %v4125_v22  ;;  %v5793_v49 = vld [vmem:[%s5637_s28 + $0xa0] sm:$0xff]  ;;  %v5798_v51 = vld [vmem:[%s5637_s28 + $0xa8] sm:$0xff] }
  0xb1   : > { %334 = vst [vmem:[#allocation2 + $0x128] sm:$0xff] %v5377_v1  ;;  %335 = vst [vmem:[#allocation2 + $0x130] sm:$0x3] %v5377_v1  ;;  %4127 = vmatprep.subr.bf16.mxu0 %v7211_v0  ;;  %v5801_v52 = vld [vmem:[%s5637_s28 + $0xb0] sm:$0xff]  ;;  %v724_v54 = vld [vmem:[#allocation6 + $0x98] sm:$0xff] }
  0xb2   : > { %336 = vst [vmem:[#allocation2 + $0x138] sm:$0xff] %v5377_v1  ;;  %337 = vst [vmem:[#allocation2 + $0x140] sm:$0xff] %v5377_v1  ;;  %v723_v53 = vld [vmem:[#allocation6 + $0x90] sm:$0xff]  ;;  %v5807_v55 = vld [vmem:[%s5637_s28 + $0xb8] sm:$0xff] }
  0xb3   : > { %338 = vst [vmem:[#allocation2 + $0x148] sm:$0x3] %v5377_v1  ;;  %339 = vst [vmem:[#allocation2 + $0x150] sm:$0xff] %v5377_v1  ;;  %v5811_v56 = vld [vmem:[%s5637_s28 + $0xc0] sm:$0xff]  ;;  %v4140_v57 = vpack.c.bf16 %v724_v54, %v723_v53  ;;  %v726_v59 = vld [vmem:[#allocation6 + $0xa8] sm:$0xff] }
  0xb4   : > { %340 = vst [vmem:[#allocation2 + $0x158] sm:$0xff] %v5377_v1  ;;  %341 = vst [vmem:[#allocation2 + $0x160] sm:$0x3] %v5377_v1  ;;  %4129 = vmatpush1.bf16.msra.mxu0 %v4128_v31  ;;  %v725_v58 = vld [vmem:[#allocation6 + $0xa0] sm:$0xff]  ;;  %v5816_v60 = vld [vmem:[%s5637_s28 + $0xc8] sm:$0xff] }
  0xb5   : > { %342 = vst [vmem:[#allocation2 + $0x168] sm:$0xff] %v5377_v1  ;;  %343 = vst [vmem:[#allocation2 + $0x170] sm:$0xff] %v5377_v1  ;;  %4130 = vmatprep.subr.bf16.mxu0 %v7211_v0  ;;  %v4143_v61 = vpack.c.bf16 %v726_v59, %v725_v58  ;;  %v727_v62 = vld [vmem:[#allocation6 + $0xb0] sm:$0xff]  ;;  %v728_v63 = vld [vmem:[#allocation6 + $0xb8] sm:$0xff] }
  0xb6   : > { %344 = vst [vmem:[#allocation2 + $0x178] sm:$0x3] %v5377_v1  ;;  %345 = vst [vmem:[#allocation2 + $0x180] sm:$0xff] %v5377_v1  ;;  %v5821_v2 = vld [vmem:[%s5637_s28 + $0xd0] sm:$0xff]  ;;  %v4146_v3 = vpack.c.bf16 %v728_v63, %v727_v62  ;;  %v729_v4 = vld [vmem:[#allocation6 + $0xc0] sm:$0xff] }
  0xb7   : > { %346 = vst [vmem:[#allocation2 + $0x188] sm:$0xff] %v5377_v1  ;;  %347 = vst [vmem:[#allocation2 + $0x190] sm:$0x3] %v5377_v1  ;;  %v730_v5 = vld [vmem:[#allocation6 + $0xc8] sm:$0xff]  ;;  %v5826_v6 = vld [vmem:[%s5637_s28 + $0xd8] sm:$0xff] }
  0xb8   : > { %348 = vst [vmem:[#allocation2 + $0x198] sm:$0xff] %v5377_v1  ;;  %349 = vst [vmem:[#allocation2 + $0x1a0] sm:$0xff] %v5377_v1  ;;  %4132 = vmatpush1.bf16.msra.mxu0 %v4131_v37  ;;  %v4149_v7 = vpack.c.bf16 %v730_v5, %v729_v4  ;;  %v731_v8 = vld [vmem:[#allocation6 + $0xd0] sm:$0xff]  ;;  %v732_v9 = vld [vmem:[#allocation6 + $0xd8] sm:$0xff] }
  0xb9   : > { %350 = vst [vmem:[#allocation2 + $0x1a8] sm:$0x3] %v5377_v1  ;;  %384 = vst [vmem:[#allocation2 + $0x19] sm:$0xff] %v5710_v17  ;;  %4133 = vmatprep.subr.bf16.mxu0 %v7211_v0  ;;  %v5831_v10 = vld [vmem:[%s5637_s28 + $0xe0] sm:$0xff]  ;;  %v4152_v11 = vpack.c.bf16 %v732_v9, %v731_v8  ;;  %v734_v13 = vld [vmem:[#allocation6 + $0xe8] sm:$0xff] }
  0xba   : > { %385 = vst [vmem:[#allocation2 + $0x21] sm:$0xff] %v5714_v18  ;;  %386 = vst [vmem:[#allocation2 + $0x31] sm:$0xff] %v5717_v19  ;;  %v733_v12 = vld [vmem:[#allocation6 + $0xe0] sm:$0xff]  ;;  %v5836_v14 = vld [vmem:[%s5637_s28 + $0xe8] sm:$0xff] }
  0xbb   : > { %387 = vst [vmem:[#allocation2 + $0x39] sm:$0xff] %v5722_v20  ;;  %388 = vst [vmem:[#allocation2 + $0x49] sm:$0xff] %v5725_v21  ;;  %v4155_v15 = vpack.c.bf16 %v734_v13, %v733_v12  ;;  %v735_v16 = vld [vmem:[#allocation6 + $0xf0] sm:$0xff]  ;;  %v736_v22 = vld [vmem:[#allocation6 + $0xf8] sm:$0xff] }
  0xbc   : > { %389 = vst [vmem:[#allocation2 + $0x51] sm:$0xff] %v5730_v23  ;;  %390 = vst [vmem:[#allocation2 + $0x61] sm:$0xff] %v5735_v26  ;;  %4135 = vmatpush1.bf16.msra.mxu0 %v4134_v43  ;;  %v4158_v24 = vpack.c.bf16 %v736_v22, %v735_v16  ;;  %v737_v25 = vld [vmem:[#allocation6 + $0x100] sm:$0xff]  ;;  %v738_v31 = vld [vmem:[#allocation6 + $0x108] sm:$0xff] }
  0xbd   : > { %391 = vst [vmem:[#allocation2 + $0x69] sm:$0xff] %v5739_v27  ;;  %392 = vst [vmem:[#allocation2 + $0x79] sm:$0xff] %v5742_v28  ;;  %4136 = vmatprep.subr.bf16.mxu0 %v7211_v0  ;;  %v4161_v33 = vpack.c.bf16 %v738_v31, %v737_v25  ;;  %v449_v34 = vld [vmem:[#allocation2 + $0x9] sm:$0xff]  ;;  %v739_v37 = vld [vmem:[#allocation6 + $0x110] sm:$0xff] }
  0xbe   : > { %393 = vst [vmem:[#allocation2 + $0x81] sm:$0xff] %v5747_v29  ;;  %394 = vst [vmem:[#allocation2 + $0x91] sm:$0xff] %v5750_v30  ;;  %v740_v39 = vld [vmem:[#allocation6 + $0x118] sm:$0xff]  ;;  %v741_v43 = vld [vmem:[#allocation6 + $0x120] sm:$0xff] }
  0xbf   : > { %395 = vst [vmem:[#allocation2 + $0x99] sm:$0xff] %v5755_v32  ;;  %396 = vst [vmem:[#allocation2 + $0xa9] sm:$0xff] %v5760_v35  ;;  %v4164_v40 = vpack.c.bf16 %v740_v39, %v739_v37  ;;  %v742_v45 = vld [vmem:[#allocation6 + $0x128] sm:$0xff]  ;;  %v743_v53 = vld [vmem:[#allocation6 + $0x130] sm:$0xff] }
  0xc0   : > { %397 = vst [vmem:[#allocation2 + $0xb1] sm:$0xff] %v5764_v36  ;;  %398 = vst [vmem:[#allocation2 + $0xc1] sm:$0xff] %v5768_v38  ;;  %4138 = vmatpush1.bf16.msra.mxu0 %v4137_v50  ;;  %v5846_v46 = vld [vmem:[#allocation2 + $0x18] sm:$0xff]  ;;  %v4167_v50 = vpack.c.bf16 %v742_v45, %v741_v43  ;;  %v744_v54 = vld [vmem:[#allocation6 + $0x138] sm:$0xff] }
  0xc1   : > { %399 = vst [vmem:[#allocation2 + $0xc9] sm:$0xff] %v5773_v41  ;;  %400 = vst [vmem:[#allocation2 + $0xd9] sm:$0xff] %v5777_v42  ;;  %4139 = vmatprep.subr.bf16.mxu0 %v7211_v0  ;;  %v4170_v58 = vpack.c.bf16 %v744_v54, %v743_v53  ;;  %v5856_v59 = vld [vmem:[#allocation2 + $0x30] sm:$0xff]  ;;  %v748_v63 = vld [vmem:[#allocation6 + $0x158] sm:$0xff] }
  0xc2   : > { %401 = vst [vmem:[#allocation2 + $0xe1] sm:$0xff] %v5781_v44  ;;  %402 = vst [vmem:[#allocation2 + $0xf1] sm:$0xff] %v5786_v47  ;;  %v5858_v62 = vld [vmem:[#allocation2 + $0x32] sm:$0xff]  ;;  %v751_v9 = vld [vmem:[#allocation6 + $0x170] sm:$0xff] }
  0xc3   : > { %403 = vst [vmem:[#allocation2 + $0xf9] sm:$0xff] %v5790_v48  ;;  %404 = vst [vmem:[#allocation2 + $0x109] sm:$0xff] %v5793_v49  ;;  %3984 = vmatprep.mubr.f32.mxu1 %v5858_v62  ;;  %v749_v4 = vld [vmem:[#allocation6 + $0x160] sm:$0xff]  ;;  %v750_v5 = vld [vmem:[#allocation6 + $0x168] sm:$0xff] }
  0xc4   : > { %405 = vst [vmem:[#allocation2 + $0x111] sm:$0xff] %v5798_v51  ;;  %406 = vst [vmem:[#allocation2 + $0x121] sm:$0xff] %v5801_v52  ;;  %4141 = vmatpush1.bf16.msra.mxu0 %v4140_v57  ;;  %v5851_v57 = vld [vmem:[#allocation2 + $0x20] sm:$0xff]  ;;  %v4179_v8 = vpack.c.bf16 %v750_v5, %v749_v4  ;;  %v753_v13 = vld [vmem:[#allocation6 + $0x180] sm:$0xff] }
  0xc5   : > { %407 = vst [vmem:[#allocation2 + $0x129] sm:$0xff] %v5807_v55  ;;  %408 = vst [vmem:[#allocation2 + $0x139] sm:$0xff] %v5811_v56  ;;  %4142 = vmatprep.subr.bf16.mxu0 %v7211_v0  ;;  %v755_v22 = vld [vmem:[#allocation6 + $0x190] sm:$0xff]  ;;  %v757_v31 = vld [vmem:[#allocation6 + $0x1a0] sm:$0xff] }
  0xc6   : > { %409 = vst [vmem:[#allocation2 + $0x141] sm:$0xff] %v5816_v60  ;;  %410 = vst [vmem:[#allocation2 + $0x151] sm:$0xff] %v5821_v2  ;;  %v759_v37 = vld [vmem:[#allocation6 + $0x1b0] sm:$0xff]  ;;  %v761_v43 = vld [vmem:[#allocation6 + $0x1c0] sm:$0xff] }
  0xc7   : > { %411 = vst [vmem:[#allocation2 + $0x159] sm:$0xff] %v5826_v6  ;;  %412 = vst [vmem:[#allocation2 + $0x169] sm:$0xff] %v5831_v10  ;;  %v5894_v39 = vld [vmem:[#allocation2 + $0x80] sm:$0xff]  ;;  %v5899_v45 = vld [vmem:[#allocation2 + $0x90] sm:$0xff] }
  0xc8   : > { %4144 = vmatpush1.bf16.msra.mxu0 %v4143_v61  ;;  %413 = vst [vmem:[#allocation2 + $0x171] sm:$0xff] %v5836_v14  ;;  %v763_v53 = vld [vmem:[#allocation6 + $0x1d0] sm:$0xff]  ;;  %v5904_v54 = vld [vmem:[#allocation2 + $0x98] sm:$0xff] }
  0xc9   : > { %4145 = vmatprep.subr.bf16.mxu0 %v7211_v0  ;;  %v5928_v4 = vld [vmem:[#allocation2 + $0xd8] sm:$0xff]  ;;  %v5936_v5 = vld [vmem:[#allocation2 + $0xf0] sm:$0xff] }
  0xcc   : > { %4147 = vmatpush1.bf16.msra.mxu0 %v4146_v3  ;;  %v5864_v3 = vld [vmem:[#allocation2 + $0x38] sm:$0xff] }
  0xcd   : > { %4148 = vmatprep.subr.bf16.mxu0 %v7211_v0 }
  0xd0   : > { %4150 = vmatpush1.bf16.msra.mxu0 %v4149_v7  ;;  %v5869_v7 = vld [vmem:[#allocation2 + $0x48] sm:$0xff] }
  0xd1   : > { %4151 = vmatprep.subr.bf16.mxu0 %v7211_v0 }
  0xd4   : > { %4153 = vmatpush1.bf16.msra.mxu0 %v4152_v11  ;;  %v5874_v11 = vld [vmem:[#allocation2 + $0x50] sm:$0xff] }
  0xd5   : > { %4154 = vmatprep.subr.bf16.mxu0 %v7211_v0 }
  0xd8   : > { %4156 = vmatpush1.bf16.msra.mxu0 %v4155_v15  ;;  %v5879_v15 = vld [vmem:[#allocation2 + $0x60] sm:$0xff] }
  0xd9   : > { %4157 = vmatprep.subr.bf16.mxu0 %v7211_v0 }
  0xdc   : > { %4159 = vmatpush1.bf16.msra.mxu0 %v4158_v24  ;;  %v5884_v24 = vld [vmem:[#allocation2 + $0x68] sm:$0xff] }
  0xdd   : > { %4160 = vmatprep.subr.bf16.mxu0 %v7211_v0 }
  0xdf   : > { %921 = vmatmul.mubr.f32.vlgmr.msra.gmra.mrb[0].mxu0 %v5377_v1 }
  0xe0   : > { %4162 = vmatpush1.bf16.msra.mxu0 %v4161_v33  ;;  %925 = vmatprep.mubr.f32.mxu0 %v449_v34  ;;  %v5889_v33 = vld [vmem:[#allocation2 + $0x78] sm:$0xff] }
  0xe1   : > { %4163 = vmatprep.subr.bf16.mxu0 %v7211_v0 }
  0xe3   : > { %926 = vmatmul.mubr.f32.gmra.mrb[2].mxu0 %v5377_v1  ;;  %v745_v1 = vld [vmem:[#allocation6 + $0x140] sm:$0xff] }
  0xe4   : > { %930 = vmatprep.mubr.f32.mxu0 %v5710_v17  ;;  %4165 = vmatpush1.bf16.msra.mxu0 %v4164_v40  ;;  %v746_v17 = vld [vmem:[#allocation6 + $0x148] sm:$0xff] }
  0xe5   : > { %4166 = vmatprep.subr.bf16.mxu0 %v7211_v0  ;;  %v4173_v61 = vpack.c.bf16 %v746_v17, %v745_v1  ;;  %v765_v1 = vld [vmem:[#allocation6 + $0x1e0] sm:$0xff]  ;;  %v5909_v17 = vld [vmem:[#allocation2 + $0xa8] sm:$0xff] }
  0xe7   : > { %931 = vmatmul.mubr.f32.gmra.mrb[4].mxu0 %v5846_v46 }
  0xe8   : > { %935 = vmatprep.mubr.f32.mxu0 %v5714_v18  ;;  %4168 = vmatpush1.bf16.msra.mxu0 %v4167_v50  ;;  %v747_v18 = vld [vmem:[#allocation6 + $0x150] sm:$0xff] }
  0xe9   : > { %4169 = vmatprep.subr.bf16.mxu0 %v7211_v0 }
  0xeb   : > { %936 = vmatmul.mubr.f32.gmra.mrb[6].mxu0 %v5851_v57 }
  0xec   : > { %940 = vmatprep.mubr.f32.mxu0 %v5717_v19  ;;  %4171 = vmatpush1.bf16.msra.mxu0 %v4170_v58  ;;  %v4176_v19 = vpack.c.bf16 %v748_v63, %v747_v18  ;;  %v767_v18 = vld [vmem:[#allocation6 + $0x1f0] sm:$0xff]  ;;  %v5914_v63 = vld [vmem:[#allocation2 + $0xb0] sm:$0xff] }
  0xed   : > { %4172 = vmatprep.subr.bf16.mxu0 %v7211_v0 }
  0xef   : > { %941 = vmatmul.mubr.f32.gmra.mrb[8].mxu0 %v5856_v59 }
  0xf0   : > { %945 = vmatprep.mubr.f32.mxu0 %v5722_v20  ;;  %4174 = vmatpush1.bf16.msra.mxu0 %v4173_v61  ;;  %v752_v20 = vld [vmem:[#allocation6 + $0x178] sm:$0xff] }
  0xf1   : > { %4175 = vmatprep.subr.bf16.mxu0 %v7211_v0  ;;  %v4182_v12 = vpack.c.bf16 %v752_v20, %v751_v9  ;;  %v769_v9 = vld [vmem:[#allocation6 + $0x200] sm:$0xff]  ;;  %v480_v20 = vld [vmem:[#allocation2 + $0x2] sm:$0xff] }
  0xf3   : > { %946 = vmatmul.mubr.f32.gmra.mrb[10].mxu0 %v5864_v3 }
  0xf4   : > { %950 = vmatprep.mubr.f32.mxu0 %v5725_v21  ;;  %4177 = vmatpush1.bf16.msra.mxu0 %v4176_v19  ;;  %v754_v21 = vld [vmem:[#allocation6 + $0x188] sm:$0xff] }
  0xf5   : > { %4178 = vmatprep.subr.bf16.mxu0 %v7211_v0  ;;  %v4185_v16 = vpack.c.bf16 %v754_v21, %v753_v13  ;;  %v771_v13 = vld [vmem:[#allocation6 + $0x210] sm:$0xff]  ;;  %v772_v21 = vld [vmem:[#allocation6 + $0x218] sm:$0xff] }
  0xf7   : > { %951 = vmatmul.mubr.f32.gmra.mrb[12].mxu0 %v5869_v7 }
  0xf8   : > { %955 = vmatprep.mubr.f32.mxu0 %v5730_v23  ;;  %4180 = vmatpush1.bf16.msra.mxu0 %v4179_v8  ;;  %v756_v23 = vld [vmem:[#allocation6 + $0x198] sm:$0xff] }
  0xf9   : > { %4181 = vmatprep.subr.bf16.mxu0 %v7211_v0  ;;  %v4188_v25 = vpack.c.bf16 %v756_v23, %v755_v22  ;;  %v5979_v8 = vld [vmem:[%s5637_s28 + $0xf8] sm:$0xff]  ;;  %v774_v22 = vld [vmem:[#allocation6 + $0x228] sm:$0xff] }
  0xfa   : > { %415 = vst [vmem:[#allocation2 + $0x189] sm:$0xff] %v5979_v8  ;;  %v5995_v23 = vld [vmem:[#allocation2 + $0x1a] sm:$0xff] }
  0xfb   : > { %956 = vmatmul.mubr.f32.gmra.mrb[14].mxu0 %v5874_v11 }
  0xfc   : > { %960 = vmatprep.mubr.f32.mxu0 %v5735_v26  ;;  %4183 = vmatpush1.bf16.msra.mxu0 %v4182_v12  ;;  %v758_v26 = vld [vmem:[#allocation6 + $0x1a8] sm:$0xff] }
  0xfd   : > { %4184 = vmatprep.subr.bf16.mxu0 %v7211_v0  ;;  %v4191_v34 = vpack.c.bf16 %v758_v26, %v757_v31  ;;  %v776_v31 = vld [vmem:[#allocation6 + $0x238] sm:$0xff] }
  0xff   : > { %961 = vmatmul.mubr.f32.gmra.mrb[16].mxu0 %v5879_v15 }
 0x100   : > { %965 = vmatprep.mubr.f32.mxu0 %v5739_v27  ;;  %4186 = vmatpush1.bf16.msra.mxu0 %v4185_v16  ;;  %v760_v27 = vld [vmem:[#allocation6 + $0x1b8] sm:$0xff]  ;;  %v4212_v16 = vpack.c.bf16 %v772_v21, %v771_v13  ;;  %v791_v13 = vld [vmem:[#allocation6 + $0x2b0] sm:$0xff] }
 0x101   : > { %4187 = vmatprep.subr.bf16.mxu0 %v7211_v0  ;;  %v4194_v40 = vpack.c.bf16 %v760_v27, %v759_v37  ;;  %v779_v27 = vld [vmem:[#allocation6 + $0x250] sm:$0xff] }
 0x102   : > { %v6038_v21 = vld [vmem:[#allocation2 + $0x82] sm:$0xff] }
 0x103   : > { %966 = vmatmul.mubr.f32.gmra.mrb[18].mxu0 %v5884_v24 }
 0x104   : > { %970 = vmatprep.mubr.f32.mxu0 %v5742_v28  ;;  %4189 = vmatpush1.bf16.msra.mxu0 %v4188_v25  ;;  %v762_v28 = vld [vmem:[#allocation6 + $0x1c8] sm:$0xff]  ;;  %v775_v25 = vld [vmem:[#allocation6 + $0x230] sm:$0xff] }
 0x105   : > { %4190 = vmatprep.subr.bf16.mxu0 %v7211_v0  ;;  %v4197_v50 = vpack.c.bf16 %v762_v28, %v761_v43  ;;  %v4218_v26 = vpack.c.bf16 %v776_v31, %v775_v25  ;;  %v781_v28 = vld [vmem:[#allocation6 + $0x260] sm:$0xff]  ;;  %v6048_v25 = vld [vmem:[#allocation2 + $0x9a] sm:$0xff] }
 0x107   : > { %971 = vmatmul.mubr.f32.gmra.mrb[20].mxu0 %v5889_v33 }
 0x108   : > { %975 = vmatprep.mubr.f32.mxu0 %v5747_v29  ;;  %4192 = vmatpush1.bf16.msra.mxu0 %v4191_v34  ;;  %v764_v29 = vld [vmem:[#allocation6 + $0x1d8] sm:$0xff]  ;;  %v777_v34 = vld [vmem:[#allocation6 + $0x240] sm:$0xff] }
 0x109   : > { %4193 = vmatprep.subr.bf16.mxu0 %v7211_v0  ;;  %v4200_v58 = vpack.c.bf16 %v764_v29, %v763_v53  ;;  %v783_v29 = vld [vmem:[#allocation6 + $0x270] sm:$0xff] }
 0x10b   : > { %976 = vmatmul.mubr.f32.gmra.mrb[22].mxu0 %v5894_v39 }
 0x10c   : > { %980 = vmatprep.mubr.f32.mxu0 %v5750_v30  ;;  %4195 = vmatpush1.bf16.msra.mxu0 %v4194_v40  ;;  %v766_v30 = vld [vmem:[#allocation6 + $0x1e8] sm:$0xff]  ;;  %v780_v40 = vld [vmem:[#allocation6 + $0x258] sm:$0xff] }
 0x10d   : > { %4196 = vmatprep.subr.bf16.mxu0 %v7211_v0  ;;  %v4203_v61 = vpack.c.bf16 %v766_v30, %v765_v1  ;;  %v4224_v43 = vpack.c.bf16 %v780_v40, %v779_v27  ;;  %v785_v30 = vld [vmem:[#allocation6 + $0x280] sm:$0xff] }
 0x10e   : > { %v6058_v27 = vld [vmem:[#allocation2 + $0xb2] sm:$0xff] }
 0x10f   : > { %981 = vmatmul.mubr.f32.gmra.mrb[24].mxu0 %v5899_v45 }
 0x110   : > { %985 = vmatprep.mubr.f32.mxu0 %v5755_v32  ;;  %4198 = vmatpush1.bf16.msra.mxu0 %v4197_v50  ;;  %v768_v32 = vld [vmem:[#allocation6 + $0x1f8] sm:$0xff]  ;;  %v782_v50 = vld [vmem:[#allocation6 + $0x268] sm:$0xff] }
 0x111   : > { %4199 = vmatprep.subr.bf16.mxu0 %v7211_v0  ;;  %v4206_v19 = vpack.c.bf16 %v768_v32, %v767_v18  ;;  %v4227_v53 = vpack.c.bf16 %v782_v50, %v781_v28  ;;  %v787_v32 = vld [vmem:[#allocation6 + $0x290] sm:$0xff]  ;;  %v6080_v28 = vld [vmem:[#allocation2 + $0xf2] sm:$0xff] }
 0x112   : > { %v834_v50 = vld [vmem:[#allocation6 + $0x408] sm:$0xff] }
 0x113   : > { %986 = vmatmul.mubr.f32.gmra.mrb[26].mxu0 %v5904_v54 }
 0x114   : > { %990 = vmatprep.mubr.f32.mxu0 %v5760_v35  ;;  %4201 = vmatpush1.bf16.msra.mxu0 %v4200_v58  ;;  %v5919_v35 = vld [vmem:[#allocation2 + $0xc0] sm:$0xff]  ;;  %v6018_v58 = vld [vmem:[#allocation2 + $0x52] sm:$0xff] }
 0x115   : > { %4202 = vmatprep.subr.bf16.mxu0 %v7211_v0 }
 0x117   : > { %991 = vmatmul.mubr.f32.gmra.mrb[28].mxu0 %v5909_v17 }
 0x118   : > { %995 = vmatprep.mubr.f32.mxu0 %v5764_v36  ;;  %4204 = vmatpush1.bf16.msra.mxu0 %v4203_v61  ;;  %v5924_v36 = vld [vmem:[#allocation2 + $0xc8] sm:$0xff] }
 0x119   : > { %4205 = vmatprep.subr.bf16.mxu0 %v7211_v0  ;;  %v6023_v61 = vld [vmem:[#allocation2 + $0x62] sm:$0xff] }
 0x11b   : > { %996 = vmatmul.mubr.f32.gmra.mrb[30].mxu0 %v5914_v63 }
 0x11c   : > { %1000 = vmatprep.mubr.f32.mxu0 %v5768_v38  ;;  %4207 = vmatpush1.bf16.msra.mxu0 %v4206_v19  ;;  %v5932_v38 = vld [vmem:[#allocation2 + $0xe0] sm:$0xff]  ;;  %v6028_v19 = vld [vmem:[#allocation2 + $0x6a] sm:$0xff] }
 0x11d   : > { %4208 = vmatprep.subr.bf16.mxu0 %v7211_v0 }
 0x11f   : > { %1001 = vmatmul.mubr.f32.gmra.mrb[32].mxu0 %v5919_v35 }
 0x120   : > { %1005 = vmatprep.mubr.f32.mxu0 %v5773_v41  ;;  %v5940_v41 = vld [vmem:[#allocation2 + $0xf8] sm:$0xff] }
 0x123   : > { %1006 = vmatmul.mubr.f32.gmra.mrb[34].mxu0 %v5924_v36 }
 0x124   : > { %1010 = vmatprep.mubr.f32.mxu0 %v5777_v42  ;;  %v5944_v42 = vld [vmem:[#allocation2 + $0x108] sm:$0xff] }
 0x127   : > { %1011 = vmatmul.mubr.f32.gmra.mrb[36].mxu0 %v5928_v4 }
 0x128   : > { %1015 = vmatprep.mubr.f32.mxu0 %v5781_v44  ;;  %v5948_v44 = vld [vmem:[#allocation2 + $0x110] sm:$0xff] }
 0x12b   : > { %1016 = vmatmul.mubr.f32.gmra.mrb[38].mxu0 %v5932_v38 }
 0x12c   : > { %1020 = vmatprep.mubr.f32.mxu0 %v5786_v47  ;;  %v5952_v47 = vld [vmem:[#allocation2 + $0x120] sm:$0xff] }
 0x12f   : > { %1021 = vmatmul.mubr.f32.gmra.mrb[40].mxu0 %v5936_v5 }
 0x130   : > { %1025 = vmatprep.mubr.f32.mxu0 %v5790_v48  ;;  %v5956_v48 = vld [vmem:[#allocation2 + $0x128] sm:$0xff] }
 0x133   : > { %1026 = vmatmul.mubr.f32.gmra.mrb[42].mxu0 %v5940_v41 }
 0x134   : > { %1030 = vmatprep.mubr.f32.mxu0 %v5793_v49  ;;  %v5960_v49 = vld [vmem:[#allocation2 + $0x138] sm:$0xff] }
 0x137   : > { %1031 = vmatmul.mubr.f32.gmra.mrb[44].mxu0 %v5944_v42 }
 0x138   : > { %1035 = vmatprep.mubr.f32.mxu0 %v5798_v51  ;;  %v5964_v51 = vld [vmem:[#allocation2 + $0x140] sm:$0xff] }
 0x13b   : > { %1036 = vmatmul.mubr.f32.gmra.mrb[46].mxu0 %v5948_v44 }
 0x13c   : > { %1040 = vmatprep.mubr.f32.mxu0 %v5801_v52  ;;  %v5968_v52 = vld [vmem:[#allocation2 + $0x150] sm:$0xff] }
 0x13f   : > { %1041 = vmatmul.mubr.f32.gmra.mrb[48].mxu0 %v5952_v47 }
 0x140   : > { %1045 = vmatprep.mubr.f32.mxu0 %v5807_v55  ;;  %v5971_v55 = vld [vmem:[%s5637_s28 + $0xf0] sm:$0xff] }
 0x141   : > { %414 = vst [vmem:[#allocation2 + $0x181] sm:$0xff] %v5971_v55 }
 0x143   : > { %1046 = vmatmul.mubr.f32.gmra.mrb[50].mxu0 %v5956_v48 }
 0x144   : > { %1050 = vmatprep.mubr.f32.mxu0 %v5811_v56  ;;  %v5976_v56 = vld [vmem:[#allocation2 + $0x158] sm:$0xff] }
 0x147   : > { %1051 = vmatmul.mubr.f32.gmra.mrb[52].mxu0 %v5960_v49 }
 0x148   : > { %1055 = vmatprep.mubr.f32.mxu0 %v5816_v60  ;;  %v5984_v60 = vld [vmem:[#allocation2 + $0x168] sm:$0xff] }
 0x14b   : > { %1056 = vmatmul.mubr.f32.gmra.mrb[54].mxu0 %v5964_v51 }
 0x14c   : > { %1060 = vmatprep.mubr.f32.mxu0 %v5821_v2  ;;  %v5988_v2 = vld [vmem:[#allocation2 + $0x170] sm:$0xff] }
 0x14f   : > { %1061 = vmatmul.mubr.f32.gmra.mrb[56].mxu0 %v5968_v52 }
 0x150   : > { %1065 = vmatprep.mubr.f32.mxu0 %v5826_v6  ;;  %v770_v6 = vld [vmem:[#allocation6 + $0x208] sm:$0xff] }
 0x151   : > { %v4209_v12 = vpack.c.bf16 %v770_v6, %v769_v9  ;;  %v789_v6 = vld [vmem:[#allocation6 + $0x2a0] sm:$0xff] }
 0x153   : > { %1066 = vmatmul.mubr.f32.gmra.mrb[58].mxu0 %v5976_v56 }
 0x154   : > { %1070 = vmatprep.mubr.f32.mxu0 %v5831_v10  ;;  %v481_v10 = vld [vmem:[#allocation2 + $0xa] sm:$0xff] }
 0x157   : > { %1071 = vmatmul.mubr.f32.gmra.mrb[60].mxu0 %v5984_v60 }
 0x158   : > { %1075 = vmatprep.mubr.f32.mxu0 %v5836_v14  ;;  %v773_v14 = vld [vmem:[#allocation6 + $0x220] sm:$0xff] }
 0x15b   : > { %1076 = vmatmul.mubr.f32.gmra.mrb[62].mxu0 %v5988_v2 }
 0x15c   : > { %1145 = vmatprep.mubr.f32.mxu0 %v5846_v46  ;;  %v4215_v46 = vpack.c.bf16 %v774_v22, %v773_v14  ;;  %v6043_v14 = vld [vmem:[#allocation2 + $0x92] sm:$0xff] }
 0x15f   : > { %1146 = vmatmul.mubr.f32.vlgmr.msra.gmra.mrb[0].mxu0 %v480_v20  ;;  %v6033_v20 = vld [vmem:[#allocation2 + $0x7a] sm:$0xff] }
 0x160   : > { %4210 = vmatpush1.bf16.msra.mxu0 %v4209_v12  ;;  %1150 = vmatprep.mubr.f32.mxu0 %v5851_v57  ;;  %v6000_v57 = vld [vmem:[#allocation2 + $0x22] sm:$0xff] }
 0x161   : > { %4211 = vmatprep.subr.bf16.mxu0 %v7211_v0 }
 0x163   : > { %1151 = vmatmul.mubr.f32.gmra.mrb[2].mxu0 %v481_v10 }
 0x164   : > { %1155 = vmatprep.mubr.f32.mxu0 %v5856_v59  ;;  %4213 = vmatpush1.bf16.msra.mxu0 %v4212_v16  ;;  %v778_v59 = vld [vmem:[#allocation6 + $0x248] sm:$0xff]  ;;  %v793_v16 = vld [vmem:[#allocation6 + $0x2c0] sm:$0xff] }
 0x165   : > { %4214 = vmatprep.subr.bf16.mxu0 %v7211_v0  ;;  %v4221_v37 = vpack.c.bf16 %v778_v59, %v777_v34  ;;  %v6053_v34 = vld [vmem:[#allocation2 + $0xaa] sm:$0xff] }
 0x167   : > { %1156 = vmatmul.mubr.f32.gmra.mrb[4].mxu0 %v5995_v23 }
 0x168   : > { %1160 = vmatprep.mubr.f32.mxu0 %v5864_v3  ;;  %4216 = vmatpush1.bf16.msra.mxu0 %v4215_v46  ;;  %v6008_v3 = vld [vmem:[#allocation2 + $0x3a] sm:$0xff] }
 0x169   : > { %4217 = vmatprep.subr.bf16.mxu0 %v7211_v0  ;;  %v795_v46 = vld [vmem:[#allocation6 + $0x2d0] sm:$0xff] }
 0x16b   : > { %1161 = vmatmul.mubr.f32.gmra.mrb[6].mxu0 %v6000_v57 }
 0x16c   : > { %1165 = vmatprep.mubr.f32.mxu0 %v5869_v7  ;;  %4219 = vmatpush1.bf16.msra.mxu0 %v4218_v26  ;;  %v6013_v7 = vld [vmem:[#allocation2 + $0x4a] sm:$0xff] }
 0x16d   : > { %4220 = vmatprep.subr.bf16.mxu0 %v7211_v0  ;;  %v797_v26 = vld [vmem:[#allocation6 + $0x2e0] sm:$0xff] }
 0x16f   : > { %1166 = vmatmul.mubr.f32.gmra.mrb[8].mxu0 %v5858_v62 }
 0x170   : > { %1170 = vmatprep.mubr.f32.mxu0 %v5874_v11  ;;  %4222 = vmatpush1.bf16.msra.mxu0 %v4221_v37  ;;  %v784_v11 = vld [vmem:[#allocation6 + $0x278] sm:$0xff]  ;;  %v799_v37 = vld [vmem:[#allocation6 + $0x2f0] sm:$0xff] }
 0x171   : > { %4223 = vmatprep.subr.bf16.mxu0 %v7211_v0  ;;  %v4230_v1 = vpack.c.bf16 %v784_v11, %v783_v29  ;;  %v836_v29 = vld [vmem:[#allocation6 + $0x418] sm:$0xff] }
 0x173   : > { %1171 = vmatmul.mubr.f32.gmra.mrb[10].mxu0 %v6008_v3 }
 0x174   : > { %1175 = vmatprep.mubr.f32.mxu0 %v5879_v15  ;;  %4225 = vmatpush1.bf16.msra.mxu0 %v4224_v43  ;;  %v786_v15 = vld [vmem:[#allocation6 + $0x288] sm:$0xff] }
 0x175   : > { %4226 = vmatprep.subr.bf16.mxu0 %v7211_v0  ;;  %v4233_v18 = vpack.c.bf16 %v786_v15, %v785_v30  ;;  %v6072_v43 = vld [vmem:[#allocation2 + $0xda] sm:$0xff] }
 0x176   : > { %v838_v30 = vld [vmem:[#allocation6 + $0x428] sm:$0xff] }
 0x177   : > { %1176 = vmatmul.mubr.f32.gmra.mrb[12].mxu0 %v6013_v7 }
 0x178   : > { %1180 = vmatprep.mubr.f32.mxu0 %v5884_v24  ;;  %4228 = vmatpush1.bf16.msra.mxu0 %v4227_v53  ;;  %v788_v24 = vld [vmem:[#allocation6 + $0x298] sm:$0xff] }
 0x179   : > { %4229 = vmatprep.subr.bf16.mxu0 %v7211_v0  ;;  %v4236_v9 = vpack.c.bf16 %v788_v24, %v787_v32  ;;  %v840_v32 = vld [vmem:[#allocation6 + $0x438] sm:$0xff] }
 0x17b   : > { %1181 = vmatmul.mubr.f32.gmra.mrb[14].mxu0 %v6018_v58 }
 0x17c   : > { %1185 = vmatprep.mubr.f32.mxu0 %v5889_v33  ;;  %4231 = vmatpush1.bf16.msra.mxu0 %v4230_v1  ;;  %v790_v33 = vld [vmem:[#allocation6 + $0x2a8] sm:$0xff]  ;;  %v837_v1 = vld [vmem:[#allocation6 + $0x420] sm:$0xff] }
 0x17d   : > { %4232 = vmatprep.subr.bf16.mxu0 %v7211_v0  ;;  %v4239_v12 = vpack.c.bf16 %v790_v33, %v789_v6  ;;  %v4312_v15 = vpack.c.bf16 %v838_v30, %v837_v1  ;;  %v842_v6 = vld [vmem:[#allocation6 + $0x448] sm:$0xff] }
 0x17e   : > { %v6147_v1 = vld [vmem:[#allocation2 + $0x31] sm:$0xff] }
 0x17f   : > { %1186 = vmatmul.mubr.f32.gmra.mrb[16].mxu0 %v6023_v61  ;;  %7267 = vst [vmem:[#allocation19_spill] sm:$0xff] %v6147_v1 }
 0x180   : > { %1190 = vmatprep.mubr.f32.mxu0 %v5894_v39  ;;  %4234 = vmatpush1.bf16.msra.mxu0 %v4233_v18  ;;  %v792_v39 = vld [vmem:[#allocation6 + $0x2b8] sm:$0xff]  ;;  %v839_v18 = vld [vmem:[#allocation6 + $0x430] sm:$0xff] }
 0x181   : > { %4235 = vmatprep.subr.bf16.mxu0 %v7211_v0  ;;  %v4242_v10 = vpack.c.bf16 %v792_v39, %v791_v13  ;;  %v4316_v24 = vpack.c.bf16 %v840_v32, %v839_v18  ;;  %v844_v13 = vld [vmem:[#allocation6 + $0x458] sm:$0xff]  ;;  %v6118_v39 = vld [vmem:[#allocation2 + $0x180] sm:$0xff] }
 0x182   : > { %v6154_v18 = vld [vmem:[#allocation2 + $0x39] sm:$0xff] }
 0x183   : > { %1191 = vmatmul.mubr.f32.gmra.mrb[18].mxu0 %v6028_v19  ;;  %7268 = vst [vmem:[#allocation20_spill] sm:$0xff] %v6154_v18 }
 0x184   : > { %1195 = vmatprep.mubr.f32.mxu0 %v5899_v45  ;;  %4237 = vmatpush1.bf16.msra.mxu0 %v4236_v9  ;;  %v794_v45 = vld [vmem:[#allocation6 + $0x2c8] sm:$0xff]  ;;  %v841_v9 = vld [vmem:[#allocation6 + $0x440] sm:$0xff] }
 0x185   : > { %4238 = vmatprep.subr.bf16.mxu0 %v7211_v0  ;;  %v4245_v22 = vpack.c.bf16 %v794_v45, %v793_v16  ;;  %v4320_v33 = vpack.c.bf16 %v842_v6, %v841_v9  ;;  %v845_v16 = vld [vmem:[#allocation6 + $0x460] sm:$0xff]  ;;  %v846_v45 = vld [vmem:[#allocation6 + $0x468] sm:$0xff] }
 0x186   : > { %v6161_v9 = vld [vmem:[#allocation2 + $0x49] sm:$0xff] }
 0x187   : > { %1196 = vmatmul.mubr.f32.gmra.mrb[20].mxu0 %v6033_v20  ;;  %7269 = vst [vmem:[#allocation21_spill] sm:$0xff] %v6161_v9 }
 0x188   : > { %1200 = vmatprep.mubr.f32.mxu0 %v5904_v54  ;;  %4240 = vmatpush1.bf16.msra.mxu0 %v4239_v12  ;;  %v796_v54 = vld [vmem:[#allocation6 + $0x2d8] sm:$0xff]  ;;  %v843_v12 = vld [vmem:[#allocation6 + $0x450] sm:$0xff] }
 0x189   : > { %4241 = vmatprep.subr.bf16.mxu0 %v7211_v0  ;;  %v4248_v31 = vpack.c.bf16 %v796_v54, %v795_v46  ;;  %v6128_v46 = vld [vmem:[#allocation2 + $0x172] sm:$0xff]  ;;  %v847_v54 = vld [vmem:[#allocation6 + $0x470] sm:$0xff] }
 0x18b   : > { %1201 = vmatmul.mubr.f32.gmra.mrb[22].mxu0 %v6038_v21 }
 0x18c   : > { %1205 = vmatprep.mubr.f32.mxu0 %v5909_v17  ;;  %4243 = vmatpush1.bf16.msra.mxu0 %v4242_v10  ;;  %v798_v17 = vld [vmem:[#allocation6 + $0x2e8] sm:$0xff]  ;;  %v4324_v10 = vpack.c.bf16 %v844_v13, %v843_v12 }
 0x18d   : > { %4244 = vmatprep.subr.bf16.mxu0 %v7211_v0  ;;  %v4251_v59 = vpack.c.bf16 %v798_v17, %v797_v26  ;;  %v801_v26 = vld [vmem:[#allocation6 + $0x300] sm:$0xff]  ;;  %v802_v17 = vld [vmem:[#allocation6 + $0x308] sm:$0xff] }
 0x18e   : > { %v6168_v12 = vld [vmem:[#allocation2 + $0x51] sm:$0xff] }
 0x18f   : > { %1206 = vmatmul.mubr.f32.gmra.mrb[24].mxu0 %v6043_v14  ;;  %7270 = vst [vmem:[#allocation22_spill] sm:$0xff] %v6168_v12 }
 0x190   : > { %1210 = vmatprep.mubr.f32.mxu0 %v5914_v63  ;;  %4246 = vmatpush1.bf16.msra.mxu0 %v4245_v22  ;;  %v800_v63 = vld [vmem:[#allocation6 + $0x2f8] sm:$0xff] }
 0x191   : > { %4247 = vmatprep.subr.bf16.mxu0 %v7211_v0  ;;  %v4254_v40 = vpack.c.bf16 %v800_v63, %v799_v37  ;;  %v6124_v22 = vld [vmem:[#allocation2 + $0x188] sm:$0xff]  ;;  %v4257_v37 = vpack.c.bf16 %v802_v17, %v801_v26  ;;  %v803_v63 = vld [vmem:[#allocation6 + $0x310] sm:$0xff] }
 0x192   : > { %v820_v26 = vld [vmem:[#allocation6 + $0x398] sm:$0xff]  ;;  %v6189_v17 = vld [vmem:[#allocation2 + $0x79] sm:$0xff] }
 0x193   : > { %1211 = vmatmul.mubr.f32.gmra.mrb[26].mxu0 %v6048_v25  ;;  %7273 = vst [vmem:[#allocation25_spill] sm:$0xff] %v6189_v17 }
 0x194   : > { %1215 = vmatprep.mubr.f32.mxu0 %v5919_v35  ;;  %4249 = vmatpush1.bf16.msra.mxu0 %v4248_v31  ;;  %v6063_v35 = vld [vmem:[#allocation2 + $0xc2] sm:$0xff] }
 0x195   : > { %4250 = vmatprep.subr.bf16.mxu0 %v7211_v0  ;;  %v848_v31 = vld [vmem:[#allocation6 + $0x478] sm:$0xff] }
 0x197   : > { %1216 = vmatmul.mubr.f32.gmra.mrb[28].mxu0 %v6053_v34 }
 0x198   : > { %1220 = vmatprep.mubr.f32.mxu0 %v5924_v36  ;;  %4252 = vmatpush1.bf16.msra.mxu0 %v4251_v59  ;;  %v6068_v36 = vld [vmem:[#allocation2 + $0xca] sm:$0xff]  ;;  %v4332_v59 = vpack.c.bf16 %v848_v31, %v847_v54 }
 0x199   : > { %4253 = vmatprep.subr.bf16.mxu0 %v7211_v0  ;;  %v6182_v54 = vld [vmem:[#allocation2 + $0x69] sm:$0xff] }
 0x19a   : > { %7272 = vst [vmem:[#allocation24_spill] sm:$0xff] %v6182_v54 }
 0x19b   : > { %1221 = vmatmul.mubr.f32.gmra.mrb[30].mxu0 %v6058_v27 }
 0x19c   : > { %1225 = vmatprep.mubr.f32.mxu0 %v5928_v4  ;;  %4255 = vmatpush1.bf16.msra.mxu0 %v4254_v40  ;;  %v6076_v4 = vld [vmem:[#allocation2 + $0xe2] sm:$0xff] }
 0x19d   : > { %4256 = vmatprep.subr.bf16.mxu0 %v7211_v0  ;;  %v804_v40 = vld [vmem:[#allocation6 + $0x318] sm:$0xff] }
 0x19f   : > { %1226 = vmatmul.mubr.f32.gmra.mrb[32].mxu0 %v6063_v35 }
 0x1a0   : > { %1230 = vmatprep.mubr.f32.mxu0 %v5932_v38  ;;  %v6084_v38 = vld [vmem:[#allocation2 + $0xfa] sm:$0xff] }
 0x1a3   : > { %1231 = vmatmul.mubr.f32.gmra.mrb[34].mxu0 %v6068_v36 }
 0x1a4   : > { %1235 = vmatprep.mubr.f32.mxu0 %v5936_v5  ;;  %v6088_v5 = vld [vmem:[#allocation2 + $0x10a] sm:$0xff] }
 0x1a7   : > { %1236 = vmatmul.mubr.f32.gmra.mrb[36].mxu0 %v6072_v43 }
 0x1a8   : > { %1240 = vmatprep.mubr.f32.mxu0 %v5940_v41  ;;  %v6092_v41 = vld [vmem:[#allocation2 + $0x112] sm:$0xff] }
 0x1ab   : > { %1241 = vmatmul.mubr.f32.gmra.mrb[38].mxu0 %v6076_v4 }
 0x1ac   : > { %1245 = vmatprep.mubr.f32.mxu0 %v5944_v42  ;;  %v6096_v42 = vld [vmem:[#allocation2 + $0x122] sm:$0xff] }
 0x1af   : > { %1246 = vmatmul.mubr.f32.gmra.mrb[40].mxu0 %v6080_v28 }
 0x1b0   : > { %1250 = vmatprep.mubr.f32.mxu0 %v5948_v44  ;;  %v833_v44 = vld [vmem:[#allocation6 + $0x400] sm:$0xff] }
 0x1b1   : > { %v4304_v53 = vpack.c.bf16 %v834_v50, %v833_v44  ;;  %v6133_v44 = vld [vmem:[#allocation2 + $0x19] sm:$0xff]  ;;  %v4260_v50 = vpack.c.bf16 %v804_v40, %v803_v63  ;;  %v6196_v63 = vld [vmem:[#allocation2 + $0x81] sm:$0xff] }
 0x1b2   : > { %7265 = vst [vmem:[#allocation17_spill] sm:$0xff] %v6133_v44  ;;  %7274 = vst [vmem:[#allocation26_spill] sm:$0xff] %v6196_v63 }
 0x1b3   : > { %1251 = vmatmul.mubr.f32.gmra.mrb[42].mxu0 %v6084_v38  ;;  %4305 = vmatprep.subr.bf16.mxu1 %v4304_v53 }
 0x1b4   : > { %1255 = vmatprep.mubr.f32.mxu0 %v5952_v47  ;;  %v6100_v47 = vld [vmem:[#allocation2 + $0x12a] sm:$0xff]  ;;  %4307 = vmatpush3.bf16.msra.mxu1 %v4304_v53 }
 0x1b5   : > { %v805_v53 = vld [vmem:[#allocation6 + $0x320] sm:$0xff] }
 0x1b7   : > { %1256 = vmatmul.mubr.f32.gmra.mrb[44].mxu0 %v6088_v5 }
 0x1b8   : > { %1260 = vmatprep.mubr.f32.mxu0 %v5956_v48  ;;  %v835_v48 = vld [vmem:[#allocation6 + $0x410] sm:$0xff] }
 0x1b9   : > { %v4308_v11 = vpack.c.bf16 %v836_v29, %v835_v48  ;;  %v6140_v48 = vld [vmem:[#allocation2 + $0x21] sm:$0xff] }
 0x1ba   : > { %7266 = vst [vmem:[#allocation18_spill] sm:$0xff] %v6140_v48 }
 0x1bb   : > { %1261 = vmatmul.mubr.f32.gmra.mrb[46].mxu0 %v6092_v41  ;;  %4309 = vmatprep.subr.bf16.mxu1 %v4308_v11 }
 0x1bc   : > { %1265 = vmatprep.mubr.f32.mxu0 %v5960_v49  ;;  %v6104_v49 = vld [vmem:[#allocation2 + $0x13a] sm:$0xff]  ;;  %4311 = vmatpush3.bf16.msra.mxu1 %v4308_v11  ;;  %v808_v11 = vld [vmem:[#allocation6 + $0x338] sm:$0xff] }
 0x1bd   : > { %4313 = vmatprep.subr.bf16.mxu1 %v4312_v15 }
 0x1bf   : > { %1266 = vmatmul.mubr.f32.gmra.mrb[48].mxu0 %v6096_v42 }
 0x1c0   : > { %1270 = vmatprep.mubr.f32.mxu0 %v5964_v51  ;;  %v6108_v51 = vld [vmem:[#allocation2 + $0x142] sm:$0xff]  ;;  %4315 = vmatpush3.bf16.msra.mxu1 %v4312_v15  ;;  %v810_v15 = vld [vmem:[#allocation6 + $0x348] sm:$0xff] }
 0x1c1   : > { %4317 = vmatprep.subr.bf16.mxu1 %v4316_v24 }
 0x1c3   : > { %1271 = vmatmul.mubr.f32.gmra.mrb[50].mxu0 %v6100_v47 }
 0x1c4   : > { %1275 = vmatprep.mubr.f32.mxu0 %v5968_v52  ;;  %v6112_v52 = vld [vmem:[#allocation2 + $0x152] sm:$0xff]  ;;  %4319 = vmatpush3.bf16.msra.mxu1 %v4316_v24  ;;  %v812_v24 = vld [vmem:[#allocation6 + $0x358] sm:$0xff] }
 0x1c5   : > { %4321 = vmatprep.subr.bf16.mxu1 %v4320_v33 }
 0x1c7   : > { %1276 = vmatmul.mubr.f32.gmra.mrb[52].mxu0 %v6104_v49 }
 0x1c8   : > { %1280 = vmatprep.mubr.f32.mxu0 %v5976_v56  ;;  %v6116_v56 = vld [vmem:[#allocation2 + $0x15a] sm:$0xff]  ;;  %4323 = vmatpush3.bf16.msra.mxu1 %v4320_v33 }
 0x1c9   : > { %4325 = vmatprep.subr.bf16.mxu1 %v4324_v10  ;;  %v814_v33 = vld [vmem:[#allocation6 + $0x368] sm:$0xff] }
 0x1cb   : > { %1281 = vmatmul.mubr.f32.gmra.mrb[54].mxu0 %v6108_v51 }
 0x1cc   : > { %1285 = vmatprep.mubr.f32.mxu0 %v5984_v60  ;;  %v6122_v60 = vld [vmem:[#allocation2 + $0x16a] sm:$0xff]  ;;  %4327 = vmatpush3.bf16.msra.mxu1 %v4324_v10 }
 0x1cd   : > { %v816_v10 = vld [vmem:[#allocation6 + $0x378] sm:$0xff] }
 0x1cf   : > { %1286 = vmatmul.mubr.f32.gmra.mrb[56].mxu0 %v6112_v52 }
 0x1d0   : > { %1290 = vmatprep.mubr.f32.mxu0 %v5988_v2  ;;  %v4328_v2 = vpack.c.bf16 %v846_v45, %v845_v16  ;;  %v6175_v16 = vld [vmem:[#allocation2 + $0x61] sm:$0xff] }
 0x1d1   : > { %7271 = vst [vmem:[#allocation23_spill] sm:$0xff] %v6175_v16 }
 0x1d2   : > { %4329 = vmatprep.subr.bf16.mxu1 %v4328_v2 }
 0x1d3   : > { %1291 = vmatmul.mubr.f32.gmra.mrb[58].mxu0 %v6116_v56  ;;  %4331 = vmatpush3.bf16.msra.mxu1 %v4328_v2  ;;  %v818_v2 = vld [vmem:[#allocation6 + $0x388] sm:$0xff] }
 0x1d4   : > { %1295 = vmatprep.mubr.f32.mxu0 %v6118_v39  ;;  %4333 = vmatprep.subr.bf16.mxu1 %v4332_v59 }
 0x1d7   : > { %1296 = vmatmul.mubr.f32.gmra.mrb[60].mxu0 %v6122_v60  ;;  %4335 = vmatpush3.bf16.msra.mxu1 %v4332_v59 }
 0x1d8   : > { %1300 = vmatprep.mubr.f32.mxu0 %v6124_v22  ;;  %4336 = vmatprep.subr.bf16.mxu1 %v7211_v0 }
 0x1da   : > { %3985 = vmatmul.mubr.f32.vlgmr.msra.gmra.mrb[0].mxu1 %v6008_v3 }
 0x1db   : > { %1301 = vmatmul.mubr.f32.gmra.mrb[62].mxu0 %v6128_v46  ;;  %3987 = vmatprep.mubr.f32.mxu1 %v6013_v7 }
 0x1dc   : > { %1370 = vmatprep.mubr.f32.mxu0 %v5995_v23  ;;  %v806_v23 = vld [vmem:[#allocation6 + $0x328] sm:$0xff] }
 0x1dd   : > { %v4263_v29 = vpack.c.bf16 %v806_v23, %v805_v53  ;;  %v6203_v53 = vld [vmem:[#allocation2 + $0x91] sm:$0xff] }
 0x1de   : > { %3988 = vmatmul.mubr.f32.gmra.mrb[2].mxu1 %v6018_v58  ;;  %7275 = vst [vmem:[#allocation27_spill] sm:$0xff] %v6203_v53 }
 0x1df   : > { %1371 = vmatmul.mubr.f32.vlgmr.msra.gmra.mrb[0].mxu0 %v6133_v44  ;;  %3990 = vmatprep.mubr.f32.mxu1 %v6023_v61 }
 0x1e0   : > { %4258 = vmatpush1.bf16.msra.mxu0 %v4257_v37  ;;  %1375 = vmatprep.mubr.f32.mxu0 %v6000_v57  ;;  %v807_v57 = vld [vmem:[#allocation6 + $0x330] sm:$0xff]  ;;  %v822_v37 = vld [vmem:[#allocation6 + $0x3a8] sm:$0xff] }
 0x1e1   : > { %4259 = vmatprep.subr.bf16.mxu0 %v7211_v0  ;;  %v4266_v30 = vpack.c.bf16 %v808_v11, %v807_v57  ;;  %v6210_v57 = vld [vmem:[#allocation2 + $0x99] sm:$0xff] }
 0x1e2   : > { %3991 = vmatmul.mubr.f32.gmra.mrb[4].mxu1 %v6028_v19  ;;  %7276 = vst [vmem:[#allocation28_spill] sm:$0xff] %v6210_v57 }
 0x1e3   : > { %1376 = vmatmul.mubr.f32.gmra.mrb[2].mxu0 %v6140_v48  ;;  %3993 = vmatprep.mubr.f32.mxu1 %v6033_v20 }
 0x1e4   : > { %1380 = vmatprep.mubr.f32.mxu0 %v5858_v62  ;;  %4261 = vmatpush1.bf16.msra.mxu0 %v4260_v50  ;;  %v809_v62 = vld [vmem:[#allocation6 + $0x340] sm:$0xff]  ;;  %v824_v50 = vld [vmem:[#allocation6 + $0x3b8] sm:$0xff] }
 0x1e5   : > { %4262 = vmatprep.subr.bf16.mxu0 %v7211_v0  ;;  %v4269_v32 = vpack.c.bf16 %v810_v15, %v809_v62  ;;  %v6217_v62 = vld [vmem:[#allocation2 + $0xa9] sm:$0xff] }
 0x1e6   : > { %3994 = vmatmul.mubr.f32.gmra.mrb[6].mxu1 %v6038_v21  ;;  %7277 = vst [vmem:[#allocation29_spill] sm:$0xff] %v6217_v62 }
 0x1e7   : > { %1381 = vmatmul.mubr.f32.gmra.mrb[4].mxu0 %v6147_v1  ;;  %3996 = vmatprep.mubr.f32.mxu1 %v6043_v14 }
 0x1e8   : > { %1385 = vmatprep.mubr.f32.mxu0 %v6008_v3  ;;  %4264 = vmatpush1.bf16.msra.mxu0 %v4263_v29  ;;  %v811_v3 = vld [vmem:[#allocation6 + $0x350] sm:$0xff]  ;;  %v826_v29 = vld [vmem:[#allocation6 + $0x3c8] sm:$0xff] }
 0x1e9   : > { %4265 = vmatprep.subr.bf16.mxu0 %v7211_v0  ;;  %v4272_v6 = vpack.c.bf16 %v812_v24, %v811_v3  ;;  %v6224_v3 = vld [vmem:[#allocation2 + $0xb1] sm:$0xff] }
 0x1ea   : > { %3997 = vmatmul.mubr.f32.gmra.mrb[8].mxu1 %v6048_v25  ;;  %7278 = vst [vmem:[#allocation30_spill] sm:$0xff] %v6224_v3 }
 0x1eb   : > { %1386 = vmatmul.mubr.f32.gmra.mrb[6].mxu0 %v6154_v18  ;;  %3999 = vmatprep.mubr.f32.mxu1 %v6053_v34 }
 0x1ec   : > { %1390 = vmatprep.mubr.f32.mxu0 %v6013_v7  ;;  %4267 = vmatpush1.bf16.msra.mxu0 %v4266_v30  ;;  %v813_v7 = vld [vmem:[#allocation6 + $0x360] sm:$0xff]  ;;  %v828_v30 = vld [vmem:[#allocation6 + $0x3d8] sm:$0xff] }
 0x1ed   : > { %4268 = vmatprep.subr.bf16.mxu0 %v7211_v0  ;;  %v4275_v13 = vpack.c.bf16 %v814_v33, %v813_v7  ;;  %v832_v7 = vld [vmem:[#allocation6 + $0x3f8] sm:$0xff] }
 0x1ee   : > { %4000 = vmatmul.mubr.f32.gmra.mrb[10].mxu1 %v6058_v27  ;;  %v607_v33 = vld [vmem:[#allocation2 + $0x18a] sm:$0xff] }
 0x1ef   : > { %1391 = vmatmul.mubr.f32.gmra.mrb[8].mxu0 %v6161_v9  ;;  %4002 = vmatprep.mubr.f32.mxu1 %v6063_v35 }
 0x1f0   : > { %1395 = vmatprep.mubr.f32.mxu0 %v6018_v58  ;;  %4270 = vmatpush1.bf16.msra.mxu0 %v4269_v32  ;;  %v815_v58 = vld [vmem:[#allocation6 + $0x370] sm:$0xff]  ;;  %v830_v32 = vld [vmem:[#allocation6 + $0x3e8] sm:$0xff] }
 0x1f1   : > { %4271 = vmatprep.subr.bf16.mxu0 %v7211_v0  ;;  %v4278_v45 = vpack.c.bf16 %v816_v10, %v815_v58  ;;  %v6239_v10 = vld [vmem:[#allocation2 + $0xd9] sm:$0xff] }
 0x1f2   : > { %4003 = vmatmul.mubr.f32.gmra.mrb[12].mxu1 %v6068_v36  ;;  %7281 = vst [vmem:[#allocation33_spill] sm:$0xff] %v6239_v10 }
 0x1f3   : > { %1396 = vmatmul.mubr.f32.gmra.mrb[10].mxu0 %v6168_v12  ;;  %4005 = vmatprep.mubr.f32.mxu1 %v6072_v43 }
 0x1f4   : > { %1400 = vmatprep.mubr.f32.mxu0 %v6023_v61  ;;  %4273 = vmatpush1.bf16.msra.mxu0 %v4272_v6  ;;  %v817_v61 = vld [vmem:[#allocation6 + $0x380] sm:$0xff]  ;;  %v606_v6 = vld [vmem:[#allocation2 + $0x182] sm:$0xff] }
 0x1f5   : > { %4274 = vmatprep.subr.bf16.mxu0 %v7211_v0  ;;  %v4281_v31 = vpack.c.bf16 %v818_v2, %v817_v61  ;;  %v6255_v61 = vld [vmem:[#allocation2 + $0x109] sm:$0xff]  ;;  %v641_v2 = vld [vmem:[#allocation2 + $0x31] sm:$0xff] }
 0x1f6   : > { %4006 = vmatmul.mubr.f32.gmra.mrb[14].mxu1 %v6076_v4  ;;  %7285 = vst [vmem:[#allocation37_spill] sm:$0xff] %v6255_v61 }
 0x1f7   : > { %1401 = vmatmul.mubr.f32.gmra.mrb[12].mxu0 %v6175_v16  ;;  %4008 = vmatprep.mubr.f32.mxu1 %v6080_v28 }
 0x1f8   : > { %1405 = vmatprep.mubr.f32.mxu0 %v6028_v19  ;;  %4276 = vmatpush1.bf16.msra.mxu0 %v4275_v13  ;;  %v819_v19 = vld [vmem:[#allocation6 + $0x390] sm:$0xff] }
 0x1f9   : > { %4277 = vmatprep.subr.bf16.mxu0 %v7211_v0  ;;  %v4284_v59 = vpack.c.bf16 %v820_v26, %v819_v19  ;;  %v6230_v13 = vld [vmem:[#allocation2 + $0xc1] sm:$0xff] }
 0x1fa   : > { %4009 = vmatmul.mubr.f32.gmra.mrb[16].mxu1 %v6084_v38  ;;  %7279 = vst [vmem:[#allocation31_spill] sm:$0xff] %v6230_v13  ;;  %v2335_v19 = vld [vmem:[#allocation9 + $0x10] sm:$0xff] }
 0x1fb   : > { %1406 = vmatmul.mubr.f32.gmra.mrb[14].mxu0 %v6182_v54  ;;  %4011 = vmatprep.mubr.f32.mxu1 %v6088_v5 }
 0x1fc   : > { %1410 = vmatprep.mubr.f32.mxu0 %v6033_v20  ;;  %4279 = vmatpush1.bf16.msra.mxu0 %v4278_v45  ;;  %v821_v20 = vld [vmem:[#allocation6 + $0x3a0] sm:$0xff]  ;;  %v6243_v45 = vld [vmem:[#allocation2 + $0xe1] sm:$0xff] }
 0x1fd   : > { %4280 = vmatprep.subr.bf16.mxu0 %v7211_v0  ;;  %v4287_v40 = vpack.c.bf16 %v822_v37, %v821_v20  ;;  %7282 = vst [vmem:[#allocation34_spill] sm:$0xff] %v6243_v45  ;;  %v642_v20 = vld [vmem:[#allocation2 + $0x39] sm:$0xff] }
 0x1fe   : > { %4012 = vmatmul.mubr.f32.gmra.mrb[18].mxu1 %v6092_v41 }
 0x1ff   : > { %1411 = vmatmul.mubr.f32.gmra.mrb[16].mxu0 %v6189_v17  ;;  %4014 = vmatprep.mubr.f32.mxu1 %v6096_v42 }
 0x200   : > { %1415 = vmatprep.mubr.f32.mxu0 %v6038_v21  ;;  %4282 = vmatpush1.bf16.msra.mxu0 %v4281_v31  ;;  %v823_v21 = vld [vmem:[#allocation6 + $0x3b0] sm:$0xff] }
 0x201   : > { %4283 = vmatprep.subr.bf16.mxu0 %v7211_v0  ;;  %v4290_v23 = vpack.c.bf16 %v824_v50, %v823_v21  ;;  %v2334_v31 = vld [vmem:[#allocation9 + $0x8] sm:$0xff]  ;;  %v643_v50 = vld [vmem:[#allocation2 + $0x49] sm:$0xff] }
 0x202   : > { %4015 = vmatmul.mubr.f32.gmra.mrb[20].mxu1 %v6100_v47  ;;  %v610_v21 = vld [vmem:[#allocation2 + $0x38] sm:$0xff] }
 0x203   : > { %1416 = vmatmul.mubr.f32.gmra.mrb[18].mxu0 %v6196_v63  ;;  %4017 = vmatprep.mubr.f32.mxu1 %v6104_v49 }
 0x204   : > { %1420 = vmatprep.mubr.f32.mxu0 %v6043_v14  ;;  %4285 = vmatpush1.bf16.msra.mxu0 %v4284_v59  ;;  %v825_v14 = vld [vmem:[#allocation6 + $0x3c0] sm:$0xff] }
 0x205   : > { %4286 = vmatprep.subr.bf16.mxu0 %v7211_v0  ;;  %v4293_v11 = vpack.c.bf16 %v826_v29, %v825_v14  ;;  %v2336_v59 = vld [vmem:[#allocation9 + $0x18] sm:$0xff]  ;;  %v2461_v29 = vld [vmem:[#allocation9 + $0x400] sm:$0xff] }
 0x206   : > { %4018 = vmatmul.mubr.f32.gmra.mrb[22].mxu1 %v6108_v51  ;;  %v4340_v37 = vpack.c.bf16 %v2336_v59, %v2335_v19  ;;  %v2340_v14 = vld [vmem:[#allocation9 + $0x38] sm:$0xff]  ;;  %v2347_v59 = vld [vmem:[#allocation9 + $0x70] sm:$0xff] }
 0x207   : > { %1421 = vmatmul.mubr.f32.gmra.mrb[20].mxu0 %v6203_v53  ;;  %4020 = vmatprep.mubr.f32.mxu1 %v6112_v52  ;;  %v614_v19 = vld [vmem:[#allocation2 + $0x68] sm:$0xff] }
 0x208   : > { %1425 = vmatprep.mubr.f32.mxu0 %v6048_v25  ;;  %4288 = vmatpush1.bf16.msra.mxu0 %v4287_v40  ;;  %v827_v25 = vld [vmem:[#allocation6 + $0x3d0] sm:$0xff] }
 0x209   : > { %4289 = vmatprep.subr.bf16.mxu0 %v7211_v0  ;;  %v4296_v15 = vpack.c.bf16 %v828_v30, %v827_v25  ;;  %v2338_v40 = vld [vmem:[#allocation9 + $0x28] sm:$0xff]  ;;  %v644_v30 = vld [vmem:[#allocation2 + $0x51] sm:$0xff] }
 0x20a   : > { %4021 = vmatmul.mubr.f32.gmra.mrb[24].mxu1 %v6116_v56  ;;  %v2462_v25 = vld [vmem:[#allocation9 + $0x408] sm:$0xff] }
 0x20b   : > { %1426 = vmatmul.mubr.f32.gmra.mrb[22].mxu0 %v6210_v57  ;;  %4023 = vmatprep.mubr.f32.mxu1 %v6122_v60 }
 0x20c   : > { %1430 = vmatprep.mubr.f32.mxu0 %v6053_v34  ;;  %4291 = vmatpush1.bf16.msra.mxu0 %v4290_v23  ;;  %v829_v34 = vld [vmem:[#allocation6 + $0x3e0] sm:$0xff]  ;;  %v2339_v23 = vld [vmem:[#allocation9 + $0x30] sm:$0xff] }
 0x20d   : > { %4292 = vmatprep.subr.bf16.mxu0 %v7211_v0  ;;  %v4299_v24 = vpack.c.bf16 %v830_v32, %v829_v34  ;;  %v4346_v34 = vpack.c.bf16 %v2340_v14, %v2339_v23  ;;  %v2341_v32 = vld [vmem:[#allocation9 + $0x40] sm:$0xff] }
 0x20e   : > { %4024 = vmatmul.mubr.f32.gmra.mrb[26].mxu1 %v6128_v46  ;;  %v649_v23 = vld [vmem:[#allocation2 + $0x91] sm:$0xff] }
 0x20f   : > { %1431 = vmatmul.mubr.f32.gmra.mrb[24].mxu0 %v6217_v62  ;;  %4026 = vmatprep.mubr.f32.mxu1 %v606_v6 }
 0x210   : > { %1435 = vmatprep.mubr.f32.mxu0 %v6058_v27  ;;  %4294 = vmatpush1.bf16.msra.mxu0 %v4293_v11  ;;  %v831_v27 = vld [vmem:[#allocation6 + $0x3f0] sm:$0xff]  ;;  %v611_v11 = vld [vmem:[#allocation2 + $0x48] sm:$0xff] }
 0x211   : > { %4295 = vmatprep.subr.bf16.mxu0 %v7211_v0  ;;  %v4302_v58 = vpack.c.bf16 %v832_v7, %v831_v27  ;;  %v645_v27 = vld [vmem:[#allocation2 + $0x61] sm:$0xff] }
 0x212   : > { %4027 = vmatmul.mubr.f32.gmra.mrb[28].mxu1 %v607_v33 }
 0x213   : > { %1436 = vmatmul.mubr.f32.gmra.mrb[26].mxu0 %v6224_v3 }
 0x214   : > { %1440 = vmatprep.mubr.f32.mxu0 %v6063_v35  ;;  %4297 = vmatpush1.bf16.msra.mxu0 %v4296_v15  ;;  %v6235_v35 = vld [vmem:[#allocation2 + $0xc9] sm:$0xff]  ;;  %v6298_v15 = vpack.c.bf16 %v2462_v25, %v2461_v29 }
 0x215   : > { %4298 = vmatprep.subr.bf16.mxu0 %v7211_v0  ;;  %7280 = vst [vmem:[#allocation32_spill] sm:$0xff] %v6235_v35  ;;  %v2351_v29 = vld [vmem:[#allocation9 + $0x90] sm:$0xff]  ;;  %v617_v25 = vld [vmem:[#allocation2 + $0x90] sm:$0xff] }
 0x216   : > { %7295 = vst [vmem:[#allocation47_spill] sm:$0xff] %v6298_v15 }
 0x217   : > { %1441 = vmatmul.mubr.f32.gmra.mrb[28].mxu0 %v6230_v13 }
 0x218   : > { %1445 = vmatprep.mubr.f32.mxu0 %v6068_v36  ;;  %4300 = vmatpush1.bf16.msra.mxu0 %v4299_v24  ;;  %v6247_v36 = vld [vmem:[#allocation2 + $0xf1] sm:$0xff]  ;;  %v2342_v24 = vld [vmem:[#allocation9 + $0x48] sm:$0xff] }
 0x219   : > { %4301 = vmatprep.subr.bf16.mxu0 %v7211_v0  ;;  %7283 = vst [vmem:[#allocation35_spill] sm:$0xff] %v6247_v36  ;;  %v4349_v7 = vpack.c.bf16 %v2342_v24, %v2341_v32  ;;  %v2353_v32 = vld [vmem:[#allocation9 + $0xa0] sm:$0xff]  ;;  %v2354_v24 = vld [vmem:[#allocation9 + $0xa8] sm:$0xff] }
 0x21b   : > { %1446 = vmatmul.mubr.f32.gmra.mrb[30].mxu0 %v6235_v35  ;;  %v2394_v35 = vld [vmem:[#allocation9 + $0x1e8] sm:$0xff] }
 0x21c   : > { %1450 = vmatprep.mubr.f32.mxu0 %v6072_v43  ;;  %4303 = vmatpush1.bf16.msra.mxu0 %v4302_v58  ;;  %v6251_v43 = vld [vmem:[#allocation2 + $0xf9] sm:$0xff]  ;;  %v2344_v58 = vld [vmem:[#allocation9 + $0x58] sm:$0xff] }
 0x21d   : > { %7284 = vst [vmem:[#allocation36_spill] sm:$0xff] %v6251_v43  ;;  %4529 = vmatprep.subr.bf16.mxu0 %v6298_v15 }
 0x21f   : > { %1451 = vmatmul.mubr.f32.gmra.mrb[32].mxu0 %v6239_v10  ;;  %v2393_v10 = vld [vmem:[#allocation9 + $0x1e0] sm:$0xff] }
 0x220   : > { %1455 = vmatprep.mubr.f32.mxu0 %v6076_v4  ;;  %v6259_v4 = vld [vmem:[#allocation2 + $0x111] sm:$0xff] }
 0x221   : > { %7286 = vst [vmem:[#allocation38_spill] sm:$0xff] %v6259_v4 }
 0x223   : > { %1456 = vmatmul.mubr.f32.gmra.mrb[34].mxu0 %v6243_v45  ;;  %v2392_v45 = vld [vmem:[#allocation9 + $0x1d8] sm:$0xff] }
 0x224   : > { %1460 = vmatprep.mubr.f32.mxu0 %v6080_v28  ;;  %v6263_v28 = vld [vmem:[#allocation2 + $0x121] sm:$0xff] }
 0x225   : > { %7287 = vst [vmem:[#allocation39_spill] sm:$0xff] %v6263_v28 }
 0x227   : > { %1461 = vmatmul.mubr.f32.gmra.mrb[36].mxu0 %v6247_v36  ;;  %v2391_v36 = vld [vmem:[#allocation9 + $0x1d0] sm:$0xff] }
 0x228   : > { %1465 = vmatprep.mubr.f32.mxu0 %v6084_v38  ;;  %v6267_v38 = vld [vmem:[#allocation2 + $0x129] sm:$0xff] }
 0x229   : > { %7288 = vst [vmem:[#allocation40_spill] sm:$0xff] %v6267_v38 }
 0x22b   : > { %1466 = vmatmul.mubr.f32.gmra.mrb[38].mxu0 %v6251_v43  ;;  %v2390_v43 = vld [vmem:[#allocation9 + $0x1c8] sm:$0xff] }
 0x22c   : > { %1470 = vmatprep.mubr.f32.mxu0 %v6088_v5  ;;  %v6271_v5 = vld [vmem:[#allocation2 + $0x139] sm:$0xff] }
 0x22d   : > { %7289 = vst [vmem:[#allocation41_spill] sm:$0xff] %v6271_v5 }
 0x22f   : > { %1471 = vmatmul.mubr.f32.gmra.mrb[40].mxu0 %v6255_v61  ;;  %v2389_v61 = vld [vmem:[#allocation9 + $0x1c0] sm:$0xff] }
 0x230   : > { %1475 = vmatprep.mubr.f32.mxu0 %v6092_v41  ;;  %v6275_v41 = vld [vmem:[#allocation2 + $0x141] sm:$0xff] }
 0x231   : > { %7290 = vst [vmem:[#allocation42_spill] sm:$0xff] %v6275_v41 }
 0x233   : > { %1476 = vmatmul.mubr.f32.gmra.mrb[42].mxu0 %v6259_v4  ;;  %v2388_v4 = vld [vmem:[#allocation9 + $0x1b8] sm:$0xff] }
 0x234   : > { %1480 = vmatprep.mubr.f32.mxu0 %v6096_v42  ;;  %v6279_v42 = vld [vmem:[#allocation2 + $0x151] sm:$0xff] }
 0x235   : > { %7291 = vst [vmem:[#allocation43_spill] sm:$0xff] %v6279_v42 }
 0x237   : > { %1481 = vmatmul.mubr.f32.gmra.mrb[44].mxu0 %v6263_v28  ;;  %v2387_v28 = vld [vmem:[#allocation9 + $0x1b0] sm:$0xff] }
 0x238   : > { %1485 = vmatprep.mubr.f32.mxu0 %v6100_v47  ;;  %v6283_v47 = vld [vmem:[#allocation2 + $0x159] sm:$0xff] }
 0x239   : > { %7292 = vst [vmem:[#allocation44_spill] sm:$0xff] %v6283_v47 }
 0x23b   : > { %1486 = vmatmul.mubr.f32.gmra.mrb[46].mxu0 %v6267_v38  ;;  %v2386_v38 = vld [vmem:[#allocation9 + $0x1a8] sm:$0xff] }
 0x23c   : > { %1490 = vmatprep.mubr.f32.mxu0 %v6104_v49  ;;  %v6287_v49 = vld [vmem:[#allocation2 + $0x169] sm:$0xff] }
 0x23d   : > { %7293 = vst [vmem:[#allocation45_spill] sm:$0xff] %v6287_v49 }
 0x23f   : > { %1491 = vmatmul.mubr.f32.gmra.mrb[48].mxu0 %v6271_v5  ;;  %v2384_v5 = vld [vmem:[#allocation9 + $0x198] sm:$0xff] }
 0x240   : > { %1495 = vmatprep.mubr.f32.mxu0 %v6108_v51  ;;  %v6291_v51 = vld [vmem:[#allocation2 + $0x171] sm:$0xff] }
 0x241   : > { %7294 = vst [vmem:[#allocation46_spill] sm:$0xff] %v6291_v51 }
 0x243   : > { %1496 = vmatmul.mubr.f32.gmra.mrb[50].mxu0 %v6275_v41  ;;  %v2385_v41 = vld [vmem:[#allocation9 + $0x1a0] sm:$0xff] }
 0x244   : > { %1500 = vmatprep.mubr.f32.mxu0 %v6112_v52  ;;  %v703_v52 = vld [vmem:[#allocation2 + $0x19a] sm:$0xff] }
 0x245   : > { %4029 = vmatprep.mubr.f32.mxu1 %v703_v52  ;;  %v613_v52 = vld [vmem:[#allocation2 + $0x60] sm:$0xff] }
 0x247   : > { %1501 = vmatmul.mubr.f32.gmra.mrb[52].mxu0 %v6279_v42  ;;  %v2382_v42 = vld [vmem:[#allocation9 + $0x188] sm:$0xff] }
 0x248   : > { %1505 = vmatprep.mubr.f32.mxu0 %v6116_v56  ;;  %v704_v56 = vld [vmem:[#allocation2 + $0x1a2] sm:$0xff] }
 0x249   : > { %4030 = vmatmul.mubr.f32.gmra.mrb[30].mxu1 %v704_v56  ;;  %v646_v56 = vld [vmem:[#allocation2 + $0x69] sm:$0xff] }
 0x24b   : > { %1506 = vmatmul.mubr.f32.gmra.mrb[54].mxu0 %v6283_v47  ;;  %v2383_v47 = vld [vmem:[#allocation9 + $0x190] sm:$0xff] }
 0x24c   : > { %1510 = vmatprep.mubr.f32.mxu0 %v6122_v60  ;;  %v2333_v60 = vld [vmem:[#allocation9] sm:$0xff] }
 0x24d   : > { %v4337_v26 = vpack.c.bf16 %v2334_v31, %v2333_v60  ;;  %v2345_v60 = vld [vmem:[#allocation9 + $0x60] sm:$0xff]  ;;  %v2346_v31 = vld [vmem:[#allocation9 + $0x68] sm:$0xff] }
 0x24f   : > { %1511 = vmatmul.mubr.f32.gmra.mrb[56].mxu0 %v6287_v49  ;;  %4338 = vmatpush1.bf16.msra.mxu1 %v4337_v26  ;;  %v4355_v26 = vpack.c.bf16 %v2346_v31, %v2345_v60  ;;  %v2357_v60 = vld [vmem:[#allocation9 + $0xc0] sm:$0xff]  ;;  %v2358_v31 = vld [vmem:[#allocation9 + $0xc8] sm:$0xff]  ;;  %v2380_v49 = vld [vmem:[#allocation9 + $0x178] sm:$0xff] }
 0x250   : > { %1515 = vmatprep.mubr.f32.mxu0 %v6128_v46  ;;  %v609_v46 = vld [vmem:[#allocation2 + $0x30] sm:$0xff]  ;;  %4339 = vmatprep.subr.bf16.mxu1 %v7211_v0 }
 0x253   : > { %1516 = vmatmul.mubr.f32.gmra.mrb[58].mxu0 %v6291_v51  ;;  %4341 = vmatpush1.bf16.msra.mxu1 %v4340_v37  ;;  %v615_v37 = vld [vmem:[#allocation2 + $0x78] sm:$0xff] }
 0x254   : > { %1520 = vmatprep.mubr.f32.mxu0 %v606_v6  ;;  %4342 = vmatprep.subr.bf16.mxu1 %v7211_v0  ;;  %v612_v6 = vld [vmem:[#allocation2 + $0x50] sm:$0xff] }
 0x255   : > { %v2381_v51 = vld [vmem:[#allocation9 + $0x180] sm:$0xff] }
 0x257   : > { %1521 = vmatmul.mubr.f32.gmra.mrb[60].mxu0 %v5971_v55  ;;  %v2337_v55 = vld [vmem:[#allocation9 + $0x20] sm:$0xff] }
 0x258   : > { %1525 = vmatprep.mubr.f32.mxu0 %v607_v33  ;;  %v2343_v33 = vld [vmem:[#allocation9 + $0x50] sm:$0xff] }
 0x25b   : > { %1526 = vmatmul.mubr.f32.gmra.mrb[62].mxu0 %v5979_v8  ;;  %v4343_v8 = vpack.c.bf16 %v2338_v40, %v2337_v55  ;;  %v648_v55 = vld [vmem:[#allocation2 + $0x81] sm:$0xff] }
 0x25c   : > { %1595 = vmatprep.mubr.f32.mxu0 %v641_v2  ;;  %v4352_v2 = vpack.c.bf16 %v2344_v58, %v2343_v33  ;;  %v2355_v33 = vld [vmem:[#allocation9 + $0xb0] sm:$0xff]  ;;  %v2356_v58 = vld [vmem:[#allocation9 + $0xb8] sm:$0xff] }
 0x25d   : > { %4344 = vmatpush1.bf16.msra.mxu1 %v4343_v8  ;;  %v616_v8 = vld [vmem:[#allocation2 + $0x80] sm:$0xff] }
 0x25e   : > { %4345 = vmatprep.subr.bf16.mxu1 %v7211_v0 }
 0x25f   : > { %1596 = vmatmul.mubr.f32.vlgmr.msra.gmra.mrb[0].mxu0 %v609_v46  ;;  %v647_v46 = vld [vmem:[#allocation2 + $0x79] sm:$0xff] }
 0x260   : > { %1600 = vmatprep.mubr.f32.mxu0 %v642_v20  ;;  %4531 = vmatpush3.bf16.msra.mxu0 %v6298_v15  ;;  %v2348_v20 = vld [vmem:[#allocation9 + $0x78] sm:$0xff] }
 0x261   : > { %4347 = vmatpush1.bf16.msra.mxu1 %v4346_v34  ;;  %v4358_v40 = vpack.c.bf16 %v2348_v20, %v2347_v59  ;;  %v2359_v59 = vld [vmem:[#allocation9 + $0xd0] sm:$0xff]  ;;  %v2360_v20 = vld [vmem:[#allocation9 + $0xd8] sm:$0xff] }
 0x262   : > { %4348 = vmatprep.subr.bf16.mxu1 %v7211_v0 }
 0x263   : > { %1601 = vmatmul.mubr.f32.gmra.mrb[2].mxu0 %v610_v21  ;;  %v2349_v21 = vld [vmem:[#allocation9 + $0x80] sm:$0xff] }
 0x264   : > { %1605 = vmatprep.mubr.f32.mxu0 %v643_v50  ;;  %v2350_v50 = vld [vmem:[#allocation9 + $0x88] sm:$0xff] }
 0x265   : > { %4350 = vmatpush1.bf16.msra.mxu1 %v4349_v7  ;;  %v4361_v14 = vpack.c.bf16 %v2350_v50, %v2349_v21  ;;  %v4367_v7 = vpack.c.bf16 %v2354_v24, %v2353_v32  ;;  %v622_v21 = vld [vmem:[#allocation2 + $0xc8] sm:$0xff]  ;;  %v655_v50 = vld [vmem:[#allocation2 + $0xd9] sm:$0xff]  ;;  %v660_v24 = vld [vmem:[#allocation2 + $0x111] sm:$0xff] }
 0x266   : > { %4351 = vmatprep.subr.bf16.mxu1 %v7211_v0  ;;  %v627_v32 = vld [vmem:[#allocation2 + $0x108] sm:$0xff] }
 0x267   : > { %1606 = vmatmul.mubr.f32.gmra.mrb[4].mxu0 %v611_v11  ;;  %v2352_v11 = vld [vmem:[#allocation9 + $0x98] sm:$0xff] }
 0x268   : > { %1610 = vmatprep.mubr.f32.mxu0 %v644_v30  ;;  %v650_v30 = vld [vmem:[#allocation2 + $0x99] sm:$0xff]  ;;  %v4364_v34 = vpack.c.bf16 %v2352_v11, %v2351_v29  ;;  %v657_v29 = vld [vmem:[#allocation2 + $0xf1] sm:$0xff] }
 0x269   : > { %4353 = vmatpush1.bf16.msra.mxu1 %v4352_v2  ;;  %v4370_v2 = vpack.c.bf16 %v2356_v58, %v2355_v33  ;;  %v625_v11 = vld [vmem:[#allocation2 + $0xf0] sm:$0xff]  ;;  %v2362_v33 = vld [vmem:[#allocation9 + $0xe8] sm:$0xff] }
 0x26a   : > { %4354 = vmatprep.subr.bf16.mxu1 %v7211_v0 }
 0x26b   : > { %1611 = vmatmul.mubr.f32.gmra.mrb[6].mxu0 %v612_v6  ;;  %v618_v6 = vld [vmem:[#allocation2 + $0x98] sm:$0xff] }
 0x26c   : > { %1615 = vmatprep.mubr.f32.mxu0 %v645_v27  ;;  %v651_v27 = vld [vmem:[#allocation2 + $0xa9] sm:$0xff] }
 0x26d   : > { %4356 = vmatpush1.bf16.msra.mxu1 %v4355_v26  ;;  %v4373_v26 = vpack.c.bf16 %v2358_v31, %v2357_v60  ;;  %v2364_v60 = vld [vmem:[#allocation9 + $0xf8] sm:$0xff]  ;;  %v2463_v31 = vld [vmem:[#allocation9 + $0x410] sm:$0xff] }
 0x26e   : > { %4357 = vmatprep.subr.bf16.mxu1 %v7211_v0 }
 0x26f   : > { %1616 = vmatmul.mubr.f32.gmra.mrb[8].mxu0 %v613_v52  ;;  %v619_v52 = vld [vmem:[#allocation2 + $0xa8] sm:$0xff] }
 0x270   : > { %1620 = vmatprep.mubr.f32.mxu0 %v646_v56  ;;  %v652_v56 = vld [vmem:[#allocation2 + $0xb1] sm:$0xff] }
 0x271   : > { %4359 = vmatpush1.bf16.msra.mxu1 %v4358_v40  ;;  %v4376_v40 = vpack.c.bf16 %v2360_v20, %v2359_v59  ;;  %v663_v20 = vld [vmem:[#allocation2 + $0x139] sm:$0xff] }
 0x272   : > { %4360 = vmatprep.subr.bf16.mxu1 %v7211_v0 }
 0x273   : > { %1621 = vmatmul.mubr.f32.gmra.mrb[10].mxu0 %v614_v19  ;;  %v620_v19 = vld [vmem:[#allocation2 + $0xb0] sm:$0xff] }
 0x274   : > { %1625 = vmatprep.mubr.f32.mxu0 %v647_v46  ;;  %v653_v46 = vld [vmem:[#allocation2 + $0xc1] sm:$0xff] }
 0x275   : > { %4362 = vmatpush1.bf16.msra.mxu1 %v4361_v14  ;;  %v624_v14 = vld [vmem:[#allocation2 + $0xe0] sm:$0xff] }
 0x276   : > { %4363 = vmatprep.subr.bf16.mxu1 %v7211_v0 }
 0x277   : > { %1626 = vmatmul.mubr.f32.gmra.mrb[12].mxu0 %v615_v37  ;;  %v621_v37 = vld [vmem:[#allocation2 + $0xc0] sm:$0xff] }
 0x278   : > { %1630 = vmatprep.mubr.f32.mxu0 %v648_v55  ;;  %v654_v55 = vld [vmem:[#allocation2 + $0xc9] sm:$0xff] }
 0x279   : > { %4365 = vmatpush1.bf16.msra.mxu1 %v4364_v34  ;;  %v659_v34 = vld [vmem:[#allocation2 + $0x109] sm:$0xff] }
 0x27a   : > { %4366 = vmatprep.subr.bf16.mxu1 %v7211_v0 }
 0x27b   : > { %1631 = vmatmul.mubr.f32.gmra.mrb[14].mxu0 %v616_v8  ;;  %v623_v8 = vld [vmem:[#allocation2 + $0xd8] sm:$0xff] }
 0x27c   : > { %1635 = vmatprep.mubr.f32.mxu0 %v649_v23  ;;  %v656_v23 = vld [vmem:[#allocation2 + $0xe1] sm:$0xff] }
 0x27d   : > { %4368 = vmatpush1.bf16.msra.mxu1 %v4367_v7  ;;  %v2361_v7 = vld [vmem:[#allocation9 + $0xe0] sm:$0xff] }
 0x27e   : > { %4369 = vmatprep.subr.bf16.mxu1 %v7211_v0  ;;  %v4379_v58 = vpack.c.bf16 %v2362_v33, %v2361_v7  ;;  %v2469_v7 = vld [vmem:[#allocation9 + $0x440] sm:$0xff]  ;;  %v2470_v33 = vld [vmem:[#allocation9 + $0x448] sm:$0xff] }
 0x27f   : > { %1636 = vmatmul.mubr.f32.gmra.mrb[16].mxu0 %v617_v25  ;;  %v658_v25 = vld [vmem:[#allocation2 + $0xf9] sm:$0xff] }
 0x280   : > { %1640 = vmatprep.mubr.f32.mxu0 %v650_v30  ;;  %v626_v30 = vld [vmem:[#allocation2 + $0xf8] sm:$0xff] }
 0x281   : > { %4371 = vmatpush1.bf16.msra.mxu1 %v4370_v2  ;;  %v2363_v2 = vld [vmem:[#allocation9 + $0xf0] sm:$0xff] }
 0x282   : > { %4372 = vmatprep.subr.bf16.mxu1 %v7211_v0 }
 0x283   : > { %1641 = vmatmul.mubr.f32.gmra.mrb[18].mxu0 %v618_v6  ;;  %v628_v6 = vld [vmem:[#allocation2 + $0x110] sm:$0xff] }
 0x284   : > { %1645 = vmatprep.mubr.f32.mxu0 %v651_v27  ;;  %v661_v27 = vld [vmem:[#allocation2 + $0x121] sm:$0xff] }
 0x285   : > { %4374 = vmatpush1.bf16.msra.mxu1 %v4373_v26  ;;  %v630_v26 = vld [vmem:[#allocation2 + $0x128] sm:$0xff] }
 0x286   : > { %4375 = vmatprep.subr.bf16.mxu1 %v7211_v0 }
 0x287   : > { %1646 = vmatmul.mubr.f32.gmra.mrb[20].mxu0 %v619_v52  ;;  %v629_v52 = vld [vmem:[#allocation2 + $0x120] sm:$0xff] }
 0x288   : > { %1650 = vmatprep.mubr.f32.mxu0 %v652_v56  ;;  %v662_v56 = vld [vmem:[#allocation2 + $0x129] sm:$0xff] }
 0x289   : > { %4377 = vmatpush1.bf16.msra.mxu1 %v4376_v40 }
 0x28a   : > { %4378 = vmatprep.subr.bf16.mxu1 %v7211_v0 }
 0x28b   : > { %1651 = vmatmul.mubr.f32.gmra.mrb[22].mxu0 %v620_v19  ;;  %v2464_v19 = vld [vmem:[#allocation9 + $0x418] sm:$0xff] }
 0x28c   : > { %1655 = vmatprep.mubr.f32.mxu0 %v653_v46  ;;  %v4382_v46 = vpack.c.bf16 %v2364_v60, %v2363_v2  ;;  %v6315_v59 = vpack.c.bf16 %v2464_v19, %v2463_v31  ;;  %v2365_v2 = vld [vmem:[#allocation9 + $0x100] sm:$0xff]  ;;  %v2366_v60 = vld [vmem:[#allocation9 + $0x108] sm:$0xff]  ;;  %v2471_v19 = vld [vmem:[#allocation9 + $0x450] sm:$0xff] }
 0x28d   : > { %4380 = vmatpush1.bf16.msra.mxu1 %v4379_v58  ;;  %v633_v58 = vld [vmem:[#allocation2 + $0x150] sm:$0xff]  ;;  %v4385_v31 = vpack.c.bf16 %v2366_v60, %v2365_v2 }
 0x28e   : > { %4381 = vmatprep.subr.bf16.mxu1 %v7211_v0  ;;  %7296 = vst [vmem:[#allocation48_spill] sm:$0xff] %v6315_v59  ;;  %4533 = vmatprep.subr.bf16.mxu0 %v6315_v59 }
 0x28f   : > { %1656 = vmatmul.mubr.f32.gmra.mrb[24].mxu0 %v621_v37 }
 0x290   : > { %1660 = vmatprep.mubr.f32.mxu0 %v654_v55  ;;  %v2077_v55 = vld [vmem:[#allocation2 + $0x1] sm:$0xff]  ;;  %4535 = vmatpush3.bf16.msra.mxu0 %v6315_v59 }
 0x291   : > { %4383 = vmatpush1.bf16.msra.mxu1 %v4382_v46  ;;  %2548 = vmatprep.mubr.f32.mxu1 %v2077_v55  ;;  %v2472_v46 = vld [vmem:[#allocation9 + $0x458] sm:$0xff] }
 0x292   : > { %4384 = vmatprep.subr.bf16.mxu1 %v7211_v0  ;;  %v667_v55 = vld [vmem:[#allocation2 + $0x169] sm:$0xff] }
 0x293   : > { %1661 = vmatmul.mubr.f32.gmra.mrb[26].mxu0 %v622_v21  ;;  %v2465_v21 = vld [vmem:[#allocation9 + $0x420] sm:$0xff] }
 0x294   : > { %1665 = vmatprep.mubr.f32.mxu0 %v655_v50  ;;  %v2466_v50 = vld [vmem:[#allocation9 + $0x428] sm:$0xff] }
 0x297   : > { %1666 = vmatmul.mubr.f32.gmra.mrb[28].mxu0 %v623_v8  ;;  %v631_v8 = vld [vmem:[#allocation2 + $0x138] sm:$0xff] }
 0x298   : > { %1670 = vmatprep.mubr.f32.mxu0 %v656_v23  ;;  %v6324_v23 = vpack.c.bf16 %v2466_v50, %v2465_v21 }
 0x29a   : > { %7297 = vst [vmem:[#allocation49_spill] sm:$0xff] %v6324_v23  ;;  %4537 = vmatprep.subr.bf16.mxu0 %v6324_v23 }
 0x29b   : > { %1671 = vmatmul.mubr.f32.gmra.mrb[30].mxu0 %v624_v14  ;;  %v664_v14 = vld [vmem:[#allocation2 + $0x141] sm:$0xff] }
 0x29c   : > { %1675 = vmatprep.mubr.f32.mxu0 %v657_v29  ;;  %v6326_v29 = vld [vmem:[#allocation2] sm:$0xff]  ;;  %4539 = vmatpush3.bf16.msra.mxu0 %v6324_v23 }
 0x29d   : > { %2549 = vmatmul.mubr.f32.vlgmr.msra.gmra.mrb[32].mxu1 %v6326_v29 }
 0x29e   : > { %4386 = vmatpush1.bf16.msra.mxu1 %v4385_v31 }
 0x29f   : > { %1676 = vmatmul.mubr.f32.gmra.mrb[32].mxu0 %v625_v11  ;;  %v2078_v11 = vld [vmem:[#allocation2 + $0x9] sm:$0xff]  ;;  %4387 = vmatprep.subr.bf16.mxu1 %v7211_v0 }
 0x2a0   : > { %1680 = vmatprep.mubr.f32.mxu0 %v658_v25  ;;  %v2467_v25 = vld [vmem:[#allocation9 + $0x430] sm:$0xff]  ;;  %2553 = vmatprep.mubr.f32.mxu1 %v2078_v11 }
 0x2a1   : > { %2554 = vmatmul.mubr.f32.gmra.mrb[34].mxu1 %v6326_v29  ;;  %v635_v11 = vld [vmem:[#allocation2 + $0x168] sm:$0xff] }
 0x2a3   : > { %1681 = vmatmul.mubr.f32.gmra.mrb[34].mxu0 %v626_v30  ;;  %v2468_v30 = vld [vmem:[#allocation9 + $0x438] sm:$0xff] }
 0x2a4   : > { %1685 = vmatprep.mubr.f32.mxu0 %v659_v34  ;;  %v632_v34 = vld [vmem:[#allocation2 + $0x140] sm:$0xff] }
 0x2a7   : > { %1686 = vmatmul.mubr.f32.gmra.mrb[36].mxu0 %v627_v32  ;;  %v6331_v32 = vpack.c.bf16 %v2468_v30, %v2467_v25  ;;  %v668_v30 = vld [vmem:[#allocation2 + $0x171] sm:$0xff] }
 0x2a8   : > { %1690 = vmatprep.mubr.f32.mxu0 %v660_v24  ;;  %v665_v24 = vld [vmem:[#allocation2 + $0x151] sm:$0xff] }
 0x2a9   : > { %7298 = vst [vmem:[#allocation50_spill] sm:$0xff] %v6331_v32  ;;  %4541 = vmatprep.subr.bf16.mxu0 %v6331_v32 }
 0x2aa   : > { %4543 = vmatpush3.bf16.msra.mxu0 %v6331_v32 }
 0x2ab   : > { %1691 = vmatmul.mubr.f32.gmra.mrb[38].mxu0 %v628_v6 }
 0x2ac   : > { %1695 = vmatprep.mubr.f32.mxu0 %v661_v27 }
 0x2ad   : > { %v6318_v37 = vpop.f32.mrb[0].mxu1 }
 0x2ae   : > { %v6321_v40 = vpop.f32.mrb[1].mxu1 }
 0x2af   : > { %1696 = vmatmul.mubr.f32.gmra.mrb[40].mxu0 %v629_v52  ;;  %v6340_v52 = vpack.c.bf16 %v2470_v33, %v2469_v7  ;;  %v2475_v33 = vld [vmem:[#allocation9 + $0x470] sm:$0xff] }
 0x2b0   : > { %1700 = vmatprep.mubr.f32.mxu0 %v662_v56  ;;  %v666_v56 = vld [vmem:[#allocation2 + $0x159] sm:$0xff] }
 0x2b1   : > { %v6335_v6 = vpop.f32.mrb[2].mxu1  ;;  %7299 = vst [vmem:[#allocation51_spill] sm:$0xff] %v6340_v52  ;;  %4545 = vmatprep.subr.bf16.mxu0 %v6340_v52 }
 0x2b2   : > { %v6337_v27 = vpop.f32.mrb[3].mxu1  ;;  %4547 = vmatpush3.bf16.msra.mxu0 %v6340_v52 }
 0x2b3   : > { %1701 = vmatmul.mubr.f32.gmra.mrb[42].mxu0 %v630_v26  ;;  %v634_v26 = vld [vmem:[#allocation2 + $0x158] sm:$0xff] }
 0x2b4   : > { %1705 = vmatprep.mubr.f32.mxu0 %v663_v20  ;;  %v6343_v20 = vpack.c.bf16 %v2472_v46, %v2471_v19  ;;  %v6365_v19 = vld [vmem:[#allocation2 + $0x181] sm:$0xff]  ;;  %v2369_v46 = vld [vmem:[#allocation9 + $0x120] sm:$0xff] }
 0x2b5   : > { %v6348_v21 = vpop.f32.mrb[4].mxu1  ;;  %7303 = vst [vmem:[#allocation55_spill] sm:$0xff] %v6365_v19 }
 0x2b6   : > { %7300 = vst [vmem:[#allocation52_spill] sm:$0xff] %v6343_v20  ;;  %4549 = vmatprep.subr.bf16.mxu0 %v6343_v20  ;;  %v6350_v50 = vpop.f32.mrb[5].mxu1 }
 0x2b7   : > { %1706 = vmatmul.mubr.f32.gmra.mrb[44].mxu0 %v631_v8  ;;  %v2473_v8 = vld [vmem:[#allocation9 + $0x460] sm:$0xff] }
 0x2b8   : > { %1710 = vmatprep.mubr.f32.mxu0 %v664_v14  ;;  %v2474_v14 = vld [vmem:[#allocation9 + $0x468] sm:$0xff]  ;;  %4551 = vmatpush3.bf16.msra.mxu0 %v6343_v20 }
 0x2b9   : > { %v6352_v25 = vpack.c.bf16 %v2474_v14, %v2473_v8  ;;  %v6361_v60 = vpop.f32.mrb[6].mxu1  ;;  %v6370_v8 = vld [vmem:[#allocation2 + $0x189] sm:$0xff]  ;;  %v671_v14 = vld [vmem:[#allocation2 + $0x199] sm:$0xff] }
 0x2ba   : > { %v6363_v31 = vpop.f32.mrb[7].mxu1  ;;  %7304 = vst [vmem:[#allocation56_spill] sm:$0xff] %v6370_v8 }
 0x2bb   : > { %1711 = vmatmul.mubr.f32.gmra.mrb[46].mxu0 %v632_v34  ;;  %7301 = vst [vmem:[#allocation53_spill] sm:$0xff] %v6352_v25  ;;  %v2367_v34 = vld [vmem:[#allocation9 + $0x110] sm:$0xff]  ;;  %4553 = vmatprep.subr.bf16.mxu0 %v6352_v25 }
 0x2bc   : > { %1715 = vmatprep.mubr.f32.mxu0 %v665_v24  ;;  %v2368_v24 = vld [vmem:[#allocation9 + $0x118] sm:$0xff]  ;;  %4555 = vmatpush3.bf16.msra.mxu0 %v6352_v25 }
 0x2bd   : > { %v4388_v7 = vpack.c.bf16 %v2368_v24, %v2367_v34  ;;  %v672_v34 = vld [vmem:[#allocation2 + $0x1a1] sm:$0xff] }
 0x2be   : > { %v2371_v24 = vld [vmem:[#allocation9 + $0x130] sm:$0xff] }
 0x2bf   : > { %1716 = vmatmul.mubr.f32.gmra.mrb[48].mxu0 %v633_v58  ;;  %v2476_v58 = vld [vmem:[#allocation9 + $0x478] sm:$0xff]  ;;  %4389 = vmatpush1.bf16.msra.mxu1 %v4388_v7 }
 0x2c0   : > { %1720 = vmatprep.mubr.f32.mxu0 %v666_v56  ;;  %v636_v56 = vld [vmem:[#allocation2 + $0x170] sm:$0xff]  ;;  %v6356_v2 = vpack.c.bf16 %v2476_v58, %v2475_v33  ;;  %4390 = vmatprep.subr.bf16.mxu1 %v7211_v0 }
 0x2c1   : > { %v2372_v7 = vld [vmem:[#allocation9 + $0x138] sm:$0xff] }
 0x2c2   : > { %7302 = vst [vmem:[#allocation54_spill] sm:$0xff] %v6356_v2  ;;  %4557 = vmatprep.subr.bf16.mxu0 %v6356_v2  ;;  %v4394_v33 = vpack.c.bf16 %v2372_v7, %v2371_v24 }
 0x2c3   : > { %1721 = vmatmul.mubr.f32.gmra.mrb[50].mxu0 %v634_v26  ;;  %v2370_v26 = vld [vmem:[#allocation9 + $0x128] sm:$0xff] }
 0x2c4   : > { %1725 = vmatprep.mubr.f32.mxu0 %v667_v55  ;;  %4559 = vmatpush3.bf16.msra.mxu0 %v6356_v2  ;;  %v4391_v55 = vpack.c.bf16 %v2370_v26, %v2369_v46 }
 0x2c6   : > { %4392 = vmatpush1.bf16.msra.mxu1 %v4391_v55 }
 0x2c7   : > { %1726 = vmatmul.mubr.f32.gmra.mrb[52].mxu0 %v635_v11  ;;  %4393 = vmatprep.subr.bf16.mxu1 %v7211_v0  ;;  %v6374_v11 = vpop.f32.mrb[8].mxu1 }
 0x2c8   : > { %1730 = vmatprep.mubr.f32.mxu0 %v668_v30  ;;  %v6377_v30 = vpop.f32.mrb[9].mxu1 }
 0x2ca   : > { %4395 = vmatpush1.bf16.msra.mxu1 %v4394_v33  ;;  %v2377_v33 = vld [vmem:[#allocation9 + $0x160] sm:$0xff] }
 0x2cb   : > { %1731 = vmatmul.mubr.f32.gmra.mrb[54].mxu0 %v636_v56  ;;  %4396 = vmatprep.subr.bf16.mxu1 %v7211_v0  ;;  %v2374_v56 = vld [vmem:[#allocation9 + $0x148] sm:$0xff] }
 0x2cc   : > { %1735 = vmatprep.mubr.f32.mxu0 %v6365_v19  ;;  %v2378_v19 = vld [vmem:[#allocation9 + $0x168] sm:$0xff] }
 0x2cf   : > { %1736 = vmatmul.mubr.f32.gmra.mrb[56].mxu0 %v6118_v39  ;;  %v6381_v39 = vpop.f32.mrb[10].mxu1 }
 0x2d0   : > { %1740 = vmatprep.mubr.f32.mxu0 %v6370_v8  ;;  %v6384_v58 = vpop.f32.mrb[11].mxu1  ;;  %v2379_v8 = vld [vmem:[#allocation9 + $0x170] sm:$0xff] }
 0x2d1   : > { %v6387_v26 = vpop.f32.mrb[12].mxu1 }
 0x2d2   : > { %v6389_v55 = vpop.f32.mrb[13].mxu1 }
 0x2d3   : > { %1741 = vmatmul.mubr.f32.gmra.mrb[58].mxu0 %v6124_v22  ;;  %v2373_v22 = vld [vmem:[#allocation9 + $0x140] sm:$0xff]  ;;  %v6392_v7 = vpop.f32.mrb[14].mxu1 }
 0x2d4   : > { %1745 = vmatprep.mubr.f32.mxu0 %v671_v14  ;;  %v4397_v46 = vpack.c.bf16 %v2374_v56, %v2373_v22  ;;  %v2375_v14 = vld [vmem:[#allocation9 + $0x150] sm:$0xff]  ;;  %v4403_v22 = vpack.c.bf16 %v2378_v19, %v2377_v33  ;;  %v4409_v19 = vpack.c.bf16 %v2382_v42, %v2381_v51  ;;  %v4415_v42 = vpack.c.bf16 %v2386_v38, %v2385_v41 }
 0x2d5   : > { %v4421_v38 = vpack.c.bf16 %v2390_v43, %v2389_v61  ;;  %v4427_v43 = vpack.c.bf16 %v2394_v35, %v2393_v10  ;;  %v6436_v61 = vld [vmem:[#allocation8] ss:$0 sm:$0xff] }
 0x2d6   : > { %4398 = vmatpush1.bf16.msra.mxu1 %v4397_v46 }
 0x2d7   : > { %1746 = vmatmul.mubr.f32.gmra.mrb[60].mxu0 %v6326_v29  ;;  %4399 = vmatprep.subr.bf16.mxu1 %v7211_v0 }
 0x2d8   : > { %1750 = vmatprep.mubr.f32.mxu0 %v672_v34  ;;  %v2376_v34 = vld [vmem:[#allocation9 + $0x158] sm:$0xff] }
 0x2d9   : > { %v4400_v24 = vpack.c.bf16 %v2376_v34, %v2375_v14  ;;  %v4406_v14 = vpack.c.bf16 %v2380_v49, %v2379_v8  ;;  %v4412_v49 = vpack.c.bf16 %v2384_v5, %v2383_v47  ;;  %v4418_v5 = vpack.c.bf16 %v2388_v4, %v2387_v28 }
 0x2da   : > { %v4424_v4 = vpack.c.bf16 %v2392_v45, %v2391_v36  ;;  %v2395_v45 = vld [vmem:[#allocation9 + $0x1f0] sm:$0xff]  ;;  %v2396_v36 = vld [vmem:[#allocation9 + $0x1f8] sm:$0xff] }
 0x2db   : > { %1751 = vmatmul.mubr.f32.gmra.mrb[62].mxu0 %v6326_v29  ;;  %4401 = vmatpush1.bf16.msra.mxu1 %v4400_v24  ;;  %v6394_v29 = vpop.f32.mrb[15].mxu1 }
 0x2dc   : > { %4402 = vmatprep.subr.bf16.mxu1 %v7211_v0  ;;  %v6397_v56 = vpop.f32.mrb[16].mxu1 }
 0x2dd   : > { %v6399_v46 = vpop.f32.mrb[17].mxu1 }
 0x2de   : > { %v6402_v34 = vpop.f32.mrb[18].mxu1 }
 0x2df   : > { %4404 = vmatpush1.bf16.msra.mxu1 %v4403_v22  ;;  %v6404_v24 = vpop.f32.mrb[19].mxu1 }
 0x2e0   : > { %4405 = vmatprep.subr.bf16.mxu1 %v7211_v0  ;;  %v6407_v33 = vpop.f32.mrb[20].mxu1 }
 0x2e1   : > { %v6409_v22 = vpop.f32.mrb[21].mxu1 }
 0x2e2   : > { %v6412_v8 = vpop.f32.mrb[22].mxu1 }
 0x2e3   : > { %4407 = vmatpush1.bf16.msra.mxu1 %v4406_v14  ;;  %v6414_v14 = vpop.f32.mrb[23].mxu1 }
 0x2e4   : > { %4408 = vmatprep.subr.bf16.mxu1 %v7211_v0  ;;  %v6417_v51 = vpop.f32.mrb[24].mxu1 }
 0x2e7   : > { %4410 = vmatpush1.bf16.msra.mxu1 %v4409_v19  ;;  %v6419_v19 = vpop.f32.mrb[25].mxu1 }
 0x2e8   : > { %4411 = vmatprep.subr.bf16.mxu1 %v7211_v0  ;;  %v6422_v47 = vpop.f32.mrb[26].mxu1 }
 0x2eb   : > { %4413 = vmatpush1.bf16.msra.mxu1 %v4412_v49  ;;  %v6424_v49 = vpop.f32.mrb[27].mxu1 }
 0x2ec   : > { %4414 = vmatprep.subr.bf16.mxu1 %v7211_v0  ;;  %v6427_v41 = vpop.f32.mrb[28].mxu1 }
 0x2ef   : > { %4416 = vmatpush1.bf16.msra.mxu1 %v4415_v42  ;;  %v6429_v42 = vpop.f32.mrb[29].mxu1 }
 0x2f0   : > { %4417 = vmatprep.subr.bf16.mxu1 %v7211_v0 }
 0x2f3   : > { %4419 = vmatpush1.bf16.msra.mxu1 %v4418_v5 }
 0x2f4   : > { %4420 = vmatprep.subr.bf16.mxu1 %v7211_v0 }
 0x2f7   : > { %4422 = vmatpush1.bf16.msra.mxu1 %v4421_v38 }
 0x2f8   : > { %4423 = vmatprep.subr.bf16.mxu1 %v7211_v0 }
 0x2fb   : > { %4425 = vmatpush1.bf16.msra.mxu1 %v4424_v4  ;;  %v4430_v4 = vpack.c.bf16 %v2396_v36, %v2395_v45 }
 0x2fc   : > { %4426 = vmatprep.subr.bf16.mxu1 %v7211_v0 }
 0x2ff   : > { %4428 = vmatpush1.bf16.msra.mxu1 %v4427_v43 }
 0x300   : > { %4429 = vmatprep.subr.bf16.mxu1 %v7211_v0 }
 0x303   : > { %4431 = vmatpush1.bf16.msra.mxu1 %v4430_v4 }
 0x304   : > { %4432 = vmatprep.subr.bf16.mxu1 %v7211_v0 }
 0x31c   : > { %v6432_v28 = vpop.f32.mrb[30].mxu1 }
 0x31d   : > { %v6434_v5 = vpop.f32.mrb[31].mxu1 }
 0x332   : > { %v1597_v38 = vpop.f32.mrb[0].mxu0 }
 0x333   : > { %v4576_v13 = vadd.f32 %v6436_v61, %v1597_v38  ;;  %v1599_v3 = vpop.f32.mrb[1].mxu0 }
 0x335   : > { %v1823_v62 = vadd.f32 %v4576_v13, %v6321_v40 }
 0x336   : > { %v1602_v57 = vpop.f32.mrb[2].mxu0 }
 0x337   : > { %v1981_v53 = vmax.f32 %v1823_v62, 0.0  ;;  %v4577_v63 = vadd.f32 %v6436_v61, %v1602_v57  ;;  %v1604_v35 = vpop.f32.mrb[3].mxu0 }
 0x339   : > { %2013 = vst [vmem:[#allocation2 + $0x19] sm:$0xff] %v1981_v53  ;;  %v1828_v10 = vadd.f32 %v4577_v63, %v6318_v37  ;;  %2558 = vmatprep.mubr.f32.mxu1 %v1981_v53 }
 0x33a   : > { %v1607_v43 = vpop.f32.mrb[4].mxu0 }
 0x33b   : > { %v1982_v38 = vmax.f32 %v1828_v10, 0.0  ;;  %v4578_v3 = vadd.f32 %v6436_v61, %v1607_v43  ;;  %v1609_v17 = vpop.f32.mrb[5].mxu0 }
 0x33d   : > { %2014 = vst [vmem:[#allocation2 + $0x21] sm:$0xff] %v1982_v38  ;;  %v1833_v13 = vadd.f32 %v4578_v3, %v6337_v27 }
 0x33e   : > { %v1612_v40 = vpop.f32.mrb[6].mxu0 }
 0x33f   : > { %v1983_v45 = vmax.f32 %v1833_v13, 0.0  ;;  %v4579_v62 = vadd.f32 %v6436_v61, %v1612_v40  ;;  %v1614_v57 = vpop.f32.mrb[7].mxu0 }
 0x340   : > { %v6447_v36 = vld [vmem:[#allocation2 + $0x18] sm:$0xff] }
 0x341   : > { %2015 = vst [vmem:[#allocation2 + $0x31] sm:$0xff] %v1983_v45  ;;  %v1838_v4 = vadd.f32 %v4579_v62, %v6335_v6  ;;  %2559 = vmatmul.mubr.f32.gmra.mrb[36].mxu1 %v6447_v36 }
 0x342   : > { %v1617_v63 = vpop.f32.mrb[8].mxu0  ;;  %2563 = vmatprep.mubr.f32.mxu1 %v1982_v38 }
 0x343   : > { %v1984_v53 = vmax.f32 %v1838_v4, 0.0  ;;  %v4580_v17 = vadd.f32 %v6436_v61, %v1617_v63  ;;  %v1619_v37 = vpop.f32.mrb[9].mxu0 }
 0x344   : > { %v6452_v35 = vld [vmem:[#allocation2 + $0x20] sm:$0xff] }
 0x345   : > { %2016 = vst [vmem:[#allocation2 + $0x39] sm:$0xff] %v1984_v53  ;;  %v1843_v27 = vadd.f32 %v4580_v17, %v6350_v50  ;;  %2564 = vmatmul.mubr.f32.gmra.mrb[38].mxu1 %v6452_v35 }
 0x346   : > { %v1622_v10 = vpop.f32.mrb[10].mxu0  ;;  %2568 = vmatprep.mubr.f32.mxu1 %v1983_v45 }
 0x347   : > { %v1985_v43 = vmax.f32 %v1843_v27, 0.0  ;;  %v4581_v6 = vadd.f32 %v6436_v61, %v1622_v10  ;;  %v1624_v3 = vpop.f32.mrb[11].mxu0 }
 0x348   : > { %v6457_v13 = vld [vmem:[#allocation2 + $0x30] sm:$0xff] }
 0x349   : > { %2017 = vst [vmem:[#allocation2 + $0x49] sm:$0xff] %v1985_v43  ;;  %v1848_v38 = vadd.f32 %v4581_v6, %v6348_v21  ;;  %2569 = vmatmul.mubr.f32.gmra.mrb[40].mxu1 %v6457_v13 }
 0x34a   : > { %v1627_v40 = vpop.f32.mrb[12].mxu0  ;;  %2573 = vmatprep.mubr.f32.mxu1 %v1984_v53 }
 0x34b   : > { %v1986_v62 = vmax.f32 %v1848_v38, 0.0  ;;  %v4582_v50 = vadd.f32 %v6436_v61, %v1627_v40  ;;  %v1629_v57 = vpop.f32.mrb[13].mxu0 }
 0x34c   : > { %v6462_v4 = vld [vmem:[#allocation2 + $0x32] sm:$0xff]  ;;  %v6466_v63 = vld [vmem:[#allocation2 + $0x3a] sm:$0xff] }
 0x34d   : > { %v6464_v45 = vld [vmem:[#allocation2 + $0x38] sm:$0xff]  ;;  %2018 = vst [vmem:[#allocation2 + $0x51] sm:$0xff] %v1986_v62  ;;  %v1853_v17 = vadd.f32 %v4582_v50, %v6363_v31  ;;  %4064 = vmatprep.mubr.f32.mxu0 %v6462_v4 }
 0x34e   : > { %2574 = vmatmul.mubr.f32.gmra.mrb[42].mxu1 %v6464_v45  ;;  %v1632_v21 = vpop.f32.mrb[14].mxu0  ;;  %4065 = vmatmul.mubr.f32.vlgmr.msra.gmra.mrb[64].mxu0 %v6466_v63 }
 0x34f   : > { %2578 = vmatprep.mubr.f32.mxu1 %v1985_v43  ;;  %v1987_v53 = vmax.f32 %v1853_v17, 0.0  ;;  %v4583_v37 = vadd.f32 %v6436_v61, %v1632_v21  ;;  %v1634_v27 = vpop.f32.mrb[15].mxu0 }
 0x350   : > { %v6473_v10 = vld [vmem:[#allocation2 + $0x48] sm:$0xff] }
 0x351   : > { %2019 = vst [vmem:[#allocation2 + $0x61] sm:$0xff] %v1987_v53  ;;  %v1858_v6 = vadd.f32 %v4583_v37, %v6361_v60 }
 0x352   : > { %2579 = vmatmul.mubr.f32.gmra.mrb[44].mxu1 %v6473_v10  ;;  %v1637_v31 = vpop.f32.mrb[16].mxu0 }
 0x353   : > { %2583 = vmatprep.mubr.f32.mxu1 %v1986_v62  ;;  %v1988_v3 = vmax.f32 %v1858_v6, 0.0  ;;  %v4584_v38 = vadd.f32 %v6436_v61, %v1637_v31  ;;  %v1639_v40 = vpop.f32.mrb[17].mxu0 }
 0x354   : > { %v6478_v50 = vld [vmem:[#allocation2 + $0x4a] sm:$0xff]  ;;  %v6482_v57 = vld [vmem:[#allocation2 + $0x52] sm:$0xff] }
 0x355   : > { %v6480_v43 = vld [vmem:[#allocation2 + $0x50] sm:$0xff]  ;;  %2020 = vst [vmem:[#allocation2 + $0x69] sm:$0xff] %v1988_v3  ;;  %v1863_v17 = vadd.f32 %v4584_v38, %v6377_v30  ;;  %4067 = vmatprep.mubr.f32.mxu0 %v6478_v50 }
 0x356   : > { %2584 = vmatmul.mubr.f32.gmra.mrb[46].mxu1 %v6480_v43  ;;  %v1642_v60 = vpop.f32.mrb[18].mxu0  ;;  %4068 = vmatmul.mubr.f32.gmra.mrb[66].mxu0 %v6482_v57 }
 0x357   : > { %2588 = vmatprep.mubr.f32.mxu1 %v1987_v53  ;;  %v1989_v62 = vmax.f32 %v1863_v17, 0.0  ;;  %v4585_v21 = vadd.f32 %v6436_v61, %v1642_v60  ;;  %v1644_v37 = vpop.f32.mrb[19].mxu0 }
 0x358   : > { %v6489_v27 = vld [vmem:[#allocation2 + $0x60] sm:$0xff] }
 0x359   : > { %2021 = vst [vmem:[#allocation2 + $0x79] sm:$0xff] %v1989_v62  ;;  %v1868_v6 = vadd.f32 %v4585_v21, %v6374_v11 }
 0x35a   : > { %2589 = vmatmul.mubr.f32.gmra.mrb[48].mxu1 %v6489_v27  ;;  %v1647_v30 = vpop.f32.mrb[20].mxu0 }
 0x35b   : > { %2593 = vmatprep.mubr.f32.mxu1 %v1988_v3  ;;  %v1990_v31 = vmax.f32 %v1868_v6, 0.0  ;;  %v4586_v38 = vadd.f32 %v6436_v61, %v1647_v30  ;;  %v1649_v40 = vpop.f32.mrb[21].mxu0 }
 0x35c   : > { %v6494_v0 = vld [vmem:[#allocation2 + $0x62] sm:$0xff]  ;;  %v6498_v17 = vld [vmem:[#allocation2 + $0x6a] sm:$0xff] }
 0x35d   : > { %v6496_v53 = vld [vmem:[#allocation2 + $0x68] sm:$0xff]  ;;  %2022 = vst [vmem:[#allocation2 + $0x81] sm:$0xff] %v1990_v31  ;;  %v1873_v60 = vadd.f32 %v4586_v38, %v6384_v58  ;;  %4070 = vmatprep.mubr.f32.mxu0 %v6494_v0 }
 0x35e   : > { %2594 = vmatmul.mubr.f32.gmra.mrb[50].mxu1 %v6496_v53  ;;  %v1652_v11 = vpop.f32.mrb[22].mxu0  ;;  %4071 = vmatmul.mubr.f32.gmra.mrb[68].mxu0 %v6498_v17 }
 0x35f   : > { %2598 = vmatprep.mubr.f32.mxu1 %v1989_v62  ;;  %v1991_v3 = vmax.f32 %v1873_v60, 0.0  ;;  %v4587_v21 = vadd.f32 %v6436_v61, %v1652_v11  ;;  %v1654_v37 = vpop.f32.mrb[23].mxu0 }
 0x360   : > { %v6505_v6 = vld [vmem:[#allocation2 + $0x78] sm:$0xff] }
 0x361   : > { %2023 = vst [vmem:[#allocation2 + $0x91] sm:$0xff] %v1991_v3  ;;  %v1878_v30 = vadd.f32 %v4587_v21, %v6381_v39 }
 0x362   : > { %2599 = vmatmul.mubr.f32.gmra.mrb[52].mxu1 %v6505_v6  ;;  %v1657_v58 = vpop.f32.mrb[24].mxu0 }
 0x363   : > { %2603 = vmatprep.mubr.f32.mxu1 %v1990_v31  ;;  %v1992_v38 = vmax.f32 %v1878_v30, 0.0  ;;  %v4588_v40 = vadd.f32 %v6436_v61, %v1657_v58  ;;  %v1659_v54 = vpop.f32.mrb[25].mxu0 }
 0x364   : > { %v6510_v16 = vld [vmem:[#allocation2 + $0x7a] sm:$0xff]  ;;  %v6514_v60 = vld [vmem:[#allocation2 + $0x82] sm:$0xff] }
 0x365   : > { %v6512_v62 = vld [vmem:[#allocation2 + $0x80] sm:$0xff]  ;;  %2024 = vst [vmem:[#allocation2 + $0x99] sm:$0xff] %v1992_v38  ;;  %v1883_v11 = vadd.f32 %v4588_v40, %v6389_v55  ;;  %4073 = vmatprep.mubr.f32.mxu0 %v6510_v16 }
 0x366   : > { %2604 = vmatmul.mubr.f32.gmra.mrb[54].mxu1 %v6512_v62  ;;  %v1662_v39 = vpop.f32.mrb[26].mxu0  ;;  %4074 = vmatmul.mubr.f32.gmra.mrb[70].mxu0 %v6514_v60 }
 0x367   : > { %2608 = vmatprep.mubr.f32.mxu1 %v1991_v3  ;;  %v1993_v31 = vmax.f32 %v1883_v11, 0.0  ;;  %v4589_v54 = vadd.f32 %v6436_v61, %v1662_v39  ;;  %v1664_v21 = vpop.f32.mrb[27].mxu0 }
 0x368   : > { %v6521_v37 = vld [vmem:[#allocation2 + $0x90] sm:$0xff] }
 0x369   : > { %2025 = vst [vmem:[#allocation2 + $0xa9] sm:$0xff] %v1993_v31  ;;  %v1888_v30 = vadd.f32 %v4589_v54, %v6387_v26 }
 0x36a   : > { %2609 = vmatmul.mubr.f32.gmra.mrb[56].mxu1 %v6521_v37  ;;  %v1667_v55 = vpop.f32.mrb[28].mxu0 }
 0x36b   : > { %2613 = vmatprep.mubr.f32.mxu1 %v1992_v38  ;;  %v1994_v58 = vmax.f32 %v1888_v30, 0.0  ;;  %v4590_v40 = vadd.f32 %v6436_v61, %v1667_v55  ;;  %v1669_v12 = vpop.f32.mrb[29].mxu0 }
 0x36c   : > { %v6526_v9 = vld [vmem:[#allocation2 + $0x92] sm:$0xff]  ;;  %v6530_v11 = vld [vmem:[#allocation2 + $0x9a] sm:$0xff] }
 0x36d   : > { %v6528_v3 = vld [vmem:[#allocation2 + $0x98] sm:$0xff]  ;;  %2026 = vst [vmem:[#allocation2 + $0xb1] sm:$0xff] %v1994_v58  ;;  %v1893_v39 = vadd.f32 %v4590_v40, %v6394_v29  ;;  %4076 = vmatprep.mubr.f32.mxu0 %v6526_v9 }
 0x36e   : > { %2614 = vmatmul.mubr.f32.gmra.mrb[58].mxu1 %v6528_v3  ;;  %v1672_v26 = vpop.f32.mrb[30].mxu0  ;;  %4077 = vmatmul.mubr.f32.gmra.mrb[72].mxu0 %v6530_v11 }
 0x36f   : > { %2618 = vmatprep.mubr.f32.mxu1 %v1993_v31  ;;  %v1995_v38 = vmax.f32 %v1893_v39, 0.0  ;;  %v4591_v12 = vadd.f32 %v6436_v61, %v1672_v26  ;;  %v1674_v54 = vpop.f32.mrb[31].mxu0 }
 0x370   : > { %v6537_v21 = vld [vmem:[#allocation2 + $0xa8] sm:$0xff] }
 0x371   : > { %2027 = vst [vmem:[#allocation2 + $0xc1] sm:$0xff] %v1995_v38  ;;  %v1898_v30 = vadd.f32 %v4591_v12, %v6392_v7 }
 0x372   : > { %2619 = vmatmul.mubr.f32.gmra.mrb[60].mxu1 %v6537_v21  ;;  %v1677_v29 = vpop.f32.mrb[32].mxu0 }
 0x373   : > { %2623 = vmatprep.mubr.f32.mxu1 %v1994_v58  ;;  %v1996_v55 = vmax.f32 %v1898_v30, 0.0  ;;  %v4592_v40 = vadd.f32 %v6436_v61, %v1677_v29  ;;  %v1679_v18 = vpop.f32.mrb[33].mxu0 }
 0x374   : > { %v6542_v1 = vld [vmem:[#allocation2 + $0xaa] sm:$0xff]  ;;  %v6546_v39 = vld [vmem:[#allocation2 + $0xb2] sm:$0xff] }
 0x375   : > { %v6544_v31 = vld [vmem:[#allocation2 + $0xb0] sm:$0xff]  ;;  %2028 = vst [vmem:[#allocation2 + $0xc9] sm:$0xff] %v1996_v55  ;;  %v1903_v26 = vadd.f32 %v4592_v40, %v6399_v46  ;;  %4079 = vmatprep.mubr.f32.mxu0 %v6542_v1 }
 0x376   : > { %2624 = vmatmul.mubr.f32.gmra.mrb[62].mxu1 %v6544_v31  ;;  %v1682_v7 = vpop.f32.mrb[34].mxu0  ;;  %4080 = vmatmul.mubr.f32.gmra.mrb[74].mxu0 %v6546_v39 }
 0x377   : > { %2628 = vmatprep.mubr.f32.mxu1 %v1995_v38  ;;  %v1997_v58 = vmax.f32 %v1903_v26, 0.0  ;;  %v4593_v18 = vadd.f32 %v6436_v61, %v1682_v7  ;;  %v1684_v12 = vpop.f32.mrb[35].mxu0 }
 0x378   : > { %v6553_v54 = vld [vmem:[#allocation2 + $0xc0] sm:$0xff] }
 0x379   : > { %2029 = vst [vmem:[#allocation2 + $0xd9] sm:$0xff] %v1997_v58  ;;  %v1908_v30 = vadd.f32 %v4593_v18, %v6397_v56 }
 0x37a   : > { %2629 = vmatmul.mubr.f32.gmra.mrb[64].mxu1 %v6553_v54  ;;  %v1687_v46 = vpop.f32.mrb[36].mxu0 }
 0x37b   : > { %2633 = vmatprep.mubr.f32.mxu1 %v1996_v55  ;;  %v1998_v29 = vmax.f32 %v1908_v30, 0.0  ;;  %v4594_v40 = vadd.f32 %v6436_v61, %v1687_v46  ;;  %v1689_v48 = vpop.f32.mrb[37].mxu0 }
 0x37c   : > { %v6558_v44 = vld [vmem:[#allocation2 + $0xc2] sm:$0xff]  ;;  %v6562_v26 = vld [vmem:[#allocation2 + $0xca] sm:$0xff] }
 0x37d   : > { %v6560_v38 = vld [vmem:[#allocation2 + $0xc8] sm:$0xff]  ;;  %2030 = vst [vmem:[#allocation2 + $0xe1] sm:$0xff] %v1998_v29  ;;  %v1913_v7 = vadd.f32 %v4594_v40, %v6404_v24  ;;  %4082 = vmatprep.mubr.f32.mxu0 %v6558_v44 }
 0x37e   : > { %2634 = vmatmul.mubr.f32.gmra.mrb[66].mxu1 %v6560_v38  ;;  %v1692_v56 = vpop.f32.mrb[38].mxu0  ;;  %4083 = vmatmul.mubr.f32.gmra.mrb[76].mxu0 %v6562_v26 }
 0x37f   : > { %2638 = vmatprep.mubr.f32.mxu1 %v1997_v58  ;;  %v1999_v55 = vmax.f32 %v1913_v7, 0.0  ;;  %v4595_v48 = vadd.f32 %v6436_v61, %v1692_v56  ;;  %v1694_v18 = vpop.f32.mrb[39].mxu0 }
 0x380   : > { %v6569_v12 = vld [vmem:[#allocation2 + $0xd8] sm:$0xff] }
 0x381   : > { %2031 = vst [vmem:[#allocation2 + $0xf1] sm:$0xff] %v1999_v55  ;;  %v1918_v30 = vadd.f32 %v4595_v48, %v6402_v34 }
 0x382   : > { %2639 = vmatmul.mubr.f32.gmra.mrb[68].mxu1 %v6569_v12  ;;  %v1697_v24 = vpop.f32.mrb[40].mxu0 }
 0x383   : > { %2643 = vmatprep.mubr.f32.mxu1 %v1998_v29  ;;  %v2000_v46 = vmax.f32 %v1918_v30, 0.0  ;;  %v4596_v40 = vadd.f32 %v6436_v61, %v1697_v24  ;;  %v1699_v2 = vpop.f32.mrb[41].mxu0 }
 0x384   : > { %v6574_v25 = vld [vmem:[#allocation2 + $0xda] sm:$0xff]  ;;  %v6578_v7 = vld [vmem:[#allocation2 + $0xe2] sm:$0xff] }
 0x385   : > { %v6576_v58 = vld [vmem:[#allocation2 + $0xe0] sm:$0xff]  ;;  %2032 = vst [vmem:[#allocation2 + $0xf9] sm:$0xff] %v2000_v46  ;;  %v1923_v56 = vadd.f32 %v4596_v40, %v6409_v22  ;;  %4085 = vmatprep.mubr.f32.mxu0 %v6574_v25 }
 0x386   : > { %2644 = vmatmul.mubr.f32.gmra.mrb[70].mxu1 %v6576_v58  ;;  %v1702_v34 = vpop.f32.mrb[42].mxu0  ;;  %4086 = vmatmul.mubr.f32.gmra.mrb[78].mxu0 %v6578_v7 }
 0x387   : > { %2648 = vmatprep.mubr.f32.mxu1 %v1999_v55  ;;  %v2001_v29 = vmax.f32 %v1923_v56, 0.0  ;;  %v4597_v2 = vadd.f32 %v6436_v61, %v1702_v34  ;;  %v1704_v48 = vpop.f32.mrb[43].mxu0 }
 0x388   : > { %v6585_v18 = vld [vmem:[#allocation2 + $0xf0] sm:$0xff] }
 0x389   : > { %2033 = vst [vmem:[#allocation2 + $0x109] sm:$0xff] %v2001_v29  ;;  %v1928_v30 = vadd.f32 %v4597_v2, %v6407_v33 }
 0x38a   : > { %2649 = vmatmul.mubr.f32.gmra.mrb[72].mxu1 %v6585_v18  ;;  %v1707_v22 = vpop.f32.mrb[44].mxu0 }
 0x38b   : > { %2653 = vmatprep.mubr.f32.mxu1 %v2000_v46  ;;  %v2002_v24 = vmax.f32 %v1928_v30, 0.0  ;;  %v4598_v40 = vadd.f32 %v6436_v61, %v1707_v22  ;;  %v1709_v20 = vpop.f32.mrb[45].mxu0 }
 0x38c   : > { %v6590_v52 = vld [vmem:[#allocation2 + $0xf2] sm:$0xff]  ;;  %v6594_v56 = vld [vmem:[#allocation2 + $0xfa] sm:$0xff] }
 0x38d   : > { %v6592_v55 = vld [vmem:[#allocation2 + $0xf8] sm:$0xff]  ;;  %2034 = vst [vmem:[#allocation2 + $0x111] sm:$0xff] %v2002_v24  ;;  %v1933_v34 = vadd.f32 %v4598_v40, %v6414_v14  ;;  %4088 = vmatprep.mubr.f32.mxu0 %v6590_v52 }
 0x38e   : > { %2654 = vmatmul.mubr.f32.gmra.mrb[74].mxu1 %v6592_v55  ;;  %v1712_v33 = vpop.f32.mrb[46].mxu0  ;;  %4089 = vmatmul.mubr.f32.gmra.mrb[80].mxu0 %v6594_v56 }
 0x38f   : > { %2658 = vmatprep.mubr.f32.mxu1 %v2001_v29  ;;  %v2003_v46 = vmax.f32 %v1933_v34, 0.0  ;;  %v4599_v20 = vadd.f32 %v6436_v61, %v1712_v33  ;;  %v1714_v2 = vpop.f32.mrb[47].mxu0 }
 0x390   : > { %v6601_v48 = vld [vmem:[#allocation2 + $0x108] sm:$0xff] }
 0x391   : > { %2035 = vst [vmem:[#allocation2 + $0x121] sm:$0xff] %v2003_v46  ;;  %v1938_v30 = vadd.f32 %v4599_v20, %v6412_v8 }
 0x392   : > { %2659 = vmatmul.mubr.f32.gmra.mrb[76].mxu1 %v6601_v48  ;;  %v1717_v14 = vpop.f32.mrb[48].mxu0 }
 0x393   : > { %2663 = vmatprep.mubr.f32.mxu1 %v2002_v24  ;;  %v2004_v22 = vmax.f32 %v1938_v30, 0.0  ;;  %v4600_v40 = vadd.f32 %v6436_v61, %v1717_v14  ;;  %v1719_v32 = vpop.f32.mrb[49].mxu0 }
 0x394   : > { %v6606_v23 = vld [vmem:[#allocation2 + $0x10a] sm:$0xff]  ;;  %v6610_v34 = vld [vmem:[#allocation2 + $0x112] sm:$0xff] }
 0x395   : > { %v6608_v29 = vld [vmem:[#allocation2 + $0x110] sm:$0xff]  ;;  %2036 = vst [vmem:[#allocation2 + $0x129] sm:$0xff] %v2004_v22  ;;  %v1943_v33 = vadd.f32 %v4600_v40, %v6419_v19  ;;  %4091 = vmatprep.mubr.f32.mxu0 %v6606_v23 }
 0x396   : > { %2664 = vmatmul.mubr.f32.gmra.mrb[78].mxu1 %v6608_v29  ;;  %v1722_v8 = vpop.f32.mrb[50].mxu0  ;;  %4092 = vmatmul.mubr.f32.gmra.mrb[82].mxu0 %v6610_v34 }
 0x397   : > { %2668 = vmatprep.mubr.f32.mxu1 %v2003_v46  ;;  %v6616_v24 = vmax.f32 %v1943_v33, 0.0  ;;  %v4601_v32 = vadd.f32 %v6436_v61, %v1722_v8  ;;  %v1724_v20 = vpop.f32.mrb[51].mxu0 }
 0x398   : > { %v6619_v2 = vld [vmem:[#allocation2 + $0x120] sm:$0xff] }
 0x399   : > { %7305 = vst [vmem:[#allocation57_spill] sm:$0xff] %v6616_v24  ;;  %2037 = vst [vmem:[#allocation2 + $0x139] sm:$0xff] %v6616_v24  ;;  %v1948_v30 = vadd.f32 %v4601_v32, %v6417_v51 }
 0x39a   : > { %2669 = vmatmul.mubr.f32.gmra.mrb[80].mxu1 %v6619_v2  ;;  %v1727_v19 = vpop.f32.mrb[52].mxu0 }
 0x39b   : > { %2673 = vmatprep.mubr.f32.mxu1 %v2004_v22  ;;  %v6624_v14 = vmax.f32 %v1948_v30, 0.0  ;;  %v4602_v40 = vadd.f32 %v6436_v61, %v1727_v19  ;;  %v1729_v46 = vpop.f32.mrb[53].mxu0 }
 0x39c   : > { %v6627_v33 = vld [vmem:[#allocation2 + $0x122] sm:$0xff]  ;;  %v6631_v8 = vld [vmem:[#allocation2 + $0x12a] sm:$0xff] }
 0x39d   : > { %7306 = vst [vmem:[#allocation58_spill] sm:$0xff] %v6624_v14  ;;  %v6629_v59 = vld [vmem:[#allocation2 + $0x128] sm:$0xff]  ;;  %2038 = vst [vmem:[#allocation2 + $0x141] sm:$0xff] %v6624_v14  ;;  %v1953_v20 = vadd.f32 %v4602_v40, %v6424_v49  ;;  %4094 = vmatprep.mubr.f32.mxu0 %v6627_v33 }
 0x39e   : > { %2674 = vmatmul.mubr.f32.gmra.mrb[82].mxu1 %v6629_v59  ;;  %v1732_v51 = vpop.f32.mrb[54].mxu0  ;;  %4095 = vmatmul.mubr.f32.gmra.mrb[84].mxu0 %v6631_v8 }
 0x39f   : > { %2678 = vmatprep.mubr.f32.mxu1 %v6616_v24  ;;  %v6639_v22 = vmax.f32 %v1953_v20, 0.0  ;;  %v4603_v32 = vadd.f32 %v6436_v61, %v1732_v51  ;;  %v1734_v30 = vpop.f32.mrb[55].mxu0 }
 0x3a0   : > { %v6642_v19 = vld [vmem:[#allocation2 + $0x138] sm:$0xff] }
 0x3a1   : > { %7307 = vst [vmem:[#allocation59_spill] sm:$0xff] %v6639_v22  ;;  %2039 = vst [vmem:[#allocation2 + $0x151] sm:$0xff] %v6639_v22  ;;  %v1958_v49 = vadd.f32 %v4603_v32, %v6422_v47 }
 0x3a2   : > { %2679 = vmatmul.mubr.f32.gmra.mrb[84].mxu1 %v6642_v19  ;;  %v1737_v40 = vpop.f32.mrb[56].mxu0 }
 0x3a3   : > { %2683 = vmatprep.mubr.f32.mxu1 %v6624_v14  ;;  %v6648_v46 = vmax.f32 %v1958_v49, 0.0  ;;  %v4604_v24 = vadd.f32 %v6436_v61, %v1737_v40  ;;  %v1739_v20 = vpop.f32.mrb[57].mxu0 }
 0x3a4   : > { %v6651_v15 = vld [vmem:[#allocation2 + $0x13a] sm:$0xff]  ;;  %v6655_v30 = vld [vmem:[#allocation2 + $0x142] sm:$0xff] }
 0x3a5   : > { %7308 = vst [vmem:[#allocation60_spill] sm:$0xff] %v6648_v46  ;;  %7309 = vst [vmem:[#allocation61_spill] sm:$0xff] %v6651_v15  ;;  %v6653_v51 = vld [vmem:[#allocation2 + $0x140] sm:$0xff]  ;;  %v1963_v47 = vadd.f32 %v4604_v24, %v6429_v42  ;;  %4097 = vmatprep.mubr.f32.mxu0 %v6651_v15 }
 0x3a6   : > { %7310 = vst [vmem:[#allocation62_spill] sm:$0xff] %v6655_v30  ;;  %2040 = vst [vmem:[#allocation2 + $0x159] sm:$0xff] %v6648_v46  ;;  %2684 = vmatmul.mubr.f32.gmra.mrb[86].mxu1 %v6653_v51  ;;  %v1742_v32 = vpop.f32.mrb[58].mxu0  ;;  %4098 = vmatmul.mubr.f32.gmra.mrb[86].mxu0 %v6655_v30 }
 0x3a7   : > { %2688 = vmatprep.mubr.f32.mxu1 %v6639_v22  ;;  %v6663_v49 = vmax.f32 %v1963_v47, 0.0  ;;  %v4605_v40 = vadd.f32 %v6436_v61, %v1742_v32  ;;  %v1744_v20 = vpop.f32.mrb[59].mxu0 }
 0x3a8   : > { %v6666_v14 = vld [vmem:[#allocation2 + $0x150] sm:$0xff] }
 0x3a9   : > { %7311 = vst [vmem:[#allocation63_spill] sm:$0xff] %v6663_v49  ;;  %2041 = vst [vmem:[#allocation2 + $0x169] sm:$0xff] %v6663_v49  ;;  %v1968_v42 = vadd.f32 %v4605_v40, %v6427_v41 }
 0x3aa   : > { %2689 = vmatmul.mubr.f32.gmra.mrb[88].mxu1 %v6666_v14  ;;  %v1747_v24 = vpop.f32.mrb[60].mxu0 }
 0x3ab   : > { %2693 = vmatprep.mubr.f32.mxu1 %v6648_v46  ;;  %v6672_v15 = vmax.f32 %v1968_v42, 0.0  ;;  %v4606_v22 = vadd.f32 %v6436_v61, %v1747_v24  ;;  %v1749_v47 = vpop.f32.mrb[61].mxu0 }
 0x3ac   : > { %v2398_v47 = vld [vmem:[#allocation9 + $0x208] sm:$0xff] }
 0x3ad   : > { %7312 = vst [vmem:[#allocation64_spill] sm:$0xff] %v6672_v15  ;;  %v6675_v30 = vld [vmem:[#allocation2 + $0x158] sm:$0xff]  ;;  %2042 = vst [vmem:[#allocation2 + $0x171] sm:$0xff] %v6672_v15  ;;  %v6679_v32 = vadd.f32 %v4606_v22, %v6434_v5 }
 0x3ae   : > { %2694 = vmatmul.mubr.f32.gmra.mrb[90].mxu1 %v6675_v30  ;;  %v1752_v41 = vpop.f32.mrb[62].mxu0  ;;  %v2397_v22 = vld [vmem:[#allocation9 + $0x200] sm:$0xff] }
 0x3af   : > { %7313 = vst [vmem:[#allocation65_spill] sm:$0xff] %v6679_v32  ;;  %2698 = vmatprep.mubr.f32.mxu1 %v6663_v49  ;;  %v7246_v40 = vmax.f32 %v6679_v32, 0.0  ;;  %v4607_v20 = vadd.f32 %v6436_v61, %v1752_v41  ;;  %v1754_v42 = vpop.f32.mrb[63].mxu0  ;;  %v2109_v61 = vld [vmem:[#allocation2 + $0x2] sm:$0xff]  ;;  %v7315_v32 = vmov 0.0|0.0  }
 0x3b0   : > { %v6685_v46 = vld [vmem:[#allocation2 + $0x168] sm:$0xff] }
 0x3b1   : > { %7314 = vst [vmem:[#allocation66_spill] sm:$0xff] %v6685_v46  ;;  %2043 = vst [vmem:[#allocation2 + $0x181] sm:$0xff] %v7246_v40  ;;  %v6690_v24 = vadd.f32 %v4607_v20, %v6432_v28  ;;  %v4433_v28 = vpack.c.bf16 %v2398_v47, %v2397_v22  ;;  %v2399_v41 = vld [vmem:[#allocation9 + $0x210] sm:$0xff]  ;;  %v2400_v20 = vld [vmem:[#allocation9 + $0x218] sm:$0xff] }
 0x3b2   : > { %2699 = vmatmul.mubr.f32.gmra.mrb[92].mxu1 %v6685_v46  ;;  %v2110_v42 = vld [vmem:[#allocation2 + $0xa] sm:$0xff]  ;;  %v4436_v40 = vpack.c.bf16 %v2400_v20, %v2399_v41  ;;  %v2402_v46 = vld [vmem:[#allocation9 + $0x228] sm:$0xff]  ;;  %v6710_v41 = vld [vmem:[#allocation2 + $0x22] sm:$0xff] }
 0x3b3   : > { %2703 = vmatprep.mubr.f32.mxu1 %v6672_v15  ;;  %v7250_v5 = vmax.f32 %v6690_v24, 0.0  ;;  %v2401_v15 = vld [vmem:[#allocation9 + $0x220] sm:$0xff]  ;;  %v2404_v22 = vld [vmem:[#allocation9 + $0x238] sm:$0xff]  ;;  %v6705_v47 = vld [vmem:[#allocation2 + $0x1a] sm:$0xff] }
 0x3b4   : > { %v6695_v49 = vld [vmem:[#allocation2 + $0x170] sm:$0xff]  ;;  %v2411_v20 = vld [vmem:[#allocation9 + $0x270] sm:$0xff] }
 0x3b5   : > { %2044 = vst [vmem:[#allocation2 + $0x189] sm:$0xff] %v7250_v5  ;;  %v4439_v5 = vpack.c.bf16 %v2402_v46, %v2401_v15  ;;  %v2408_v46 = vld [vmem:[#allocation9 + $0x258] sm:$0xff] }
 0x3b6   : > { %2704 = vmatmul.mubr.f32.gmra.mrb[94].mxu1 %v6695_v49 }
 0x3b7   : > { %2773 = vmatprep.mubr.f32.mxu1 %v6447_v36  ;;  %v2403_v36 = vld [vmem:[#allocation9 + $0x230] sm:$0xff] }
 0x3ba   : > { %2774 = vmatmul.mubr.f32.vlgmr.msra.gmra.mrb[32].mxu1 %v2109_v61  ;;  %v2405_v61 = vld [vmem:[#allocation9 + $0x240] sm:$0xff] }
 0x3bb   : > { %2778 = vmatprep.mubr.f32.mxu1 %v6452_v35  ;;  %4434 = vmatpush1.bf16.msra.mxu1 %v4433_v28  ;;  %v4442_v35 = vpack.c.bf16 %v2404_v22, %v2403_v36  ;;  %v2406_v28 = vld [vmem:[#allocation9 + $0x248] sm:$0xff]  ;;  %v2416_v22 = vld [vmem:[#allocation9 + $0x298] sm:$0xff] }
 0x3bc   : > { %4435 = vmatprep.subr.bf16.mxu1 %v7315_v32  ;;  %v4445_v15 = vpack.c.bf16 %v2406_v28, %v2405_v61  ;;  %v2414_v36 = vld [vmem:[#allocation9 + $0x288] sm:$0xff]  ;;  %v2420_v61 = vld [vmem:[#allocation9 + $0x2b8] sm:$0xff] }
 0x3bd   : > { %v2422_v28 = vld [vmem:[#allocation9 + $0x2c8] sm:$0xff] }
 0x3be   : > { %2779 = vmatmul.mubr.f32.gmra.mrb[34].mxu1 %v2110_v42  ;;  %v2412_v42 = vld [vmem:[#allocation9 + $0x278] sm:$0xff] }
 0x3bf   : > { %2783 = vmatprep.mubr.f32.mxu1 %v6457_v13  ;;  %4437 = vmatpush1.bf16.msra.mxu1 %v4436_v40  ;;  %v2407_v13 = vld [vmem:[#allocation9 + $0x250] sm:$0xff]  ;;  %v2409_v40 = vld [vmem:[#allocation9 + $0x260] sm:$0xff] }
 0x3c0   : > { %4438 = vmatprep.subr.bf16.mxu1 %v7315_v32 }
 0x3c2   : > { %2784 = vmatmul.mubr.f32.gmra.mrb[36].mxu1 %v6705_v47 }
 0x3c3   : > { %2788 = vmatprep.mubr.f32.mxu1 %v6464_v45  ;;  %4440 = vmatpush1.bf16.msra.mxu1 %v4439_v5  ;;  %v4448_v45 = vpack.c.bf16 %v2408_v46, %v2407_v13  ;;  %v2410_v5 = vld [vmem:[#allocation9 + $0x268] sm:$0xff]  ;;  %v2428_v46 = vld [vmem:[#allocation9 + $0x2f8] sm:$0xff] }
 0x3c4   : > { %4441 = vmatprep.subr.bf16.mxu1 %v7315_v32  ;;  %v2426_v13 = vld [vmem:[#allocation9 + $0x2e8] sm:$0xff] }
 0x3c6   : > { %2789 = vmatmul.mubr.f32.gmra.mrb[38].mxu1 %v6710_v41 }
 0x3c7   : > { %2793 = vmatprep.mubr.f32.mxu1 %v6473_v10  ;;  %4443 = vmatpush1.bf16.msra.mxu1 %v4442_v35  ;;  %v4451_v10 = vpack.c.bf16 %v2410_v5, %v2409_v40  ;;  %v2418_v35 = vld [vmem:[#allocation9 + $0x2a8] sm:$0xff] }
 0x3c8   : > { %4444 = vmatprep.subr.bf16.mxu1 %v7315_v32 }
 0x3ca   : > { %2794 = vmatmul.mubr.f32.gmra.mrb[40].mxu1 %v6462_v4  ;;  %v4454_v4 = vpack.c.bf16 %v2412_v42, %v2411_v20  ;;  %v2434_v20 = vld [vmem:[#allocation9 + $0x328] sm:$0xff] }
 0x3cb   : > { %2798 = vmatprep.mubr.f32.mxu1 %v6480_v43  ;;  %4446 = vmatpush1.bf16.msra.mxu1 %v4445_v15  ;;  %v2413_v43 = vld [vmem:[#allocation9 + $0x280] sm:$0xff]  ;;  %v2424_v15 = vld [vmem:[#allocation9 + $0x2d8] sm:$0xff]  ;;  %v2174_v42 = vld [vmem:[#allocation2 + $0x21] sm:$0xff] }
 0x3cc   : > { %4447 = vmatprep.subr.bf16.mxu1 %v7315_v32 }
 0x3ce   : > { %2799 = vmatmul.mubr.f32.gmra.mrb[42].mxu1 %v6466_v63  ;;  %v4457_v63 = vpack.c.bf16 %v2414_v36, %v2413_v43  ;;  %v2435_v43 = vld [vmem:[#allocation9 + $0x330] sm:$0xff]  ;;  %v2436_v36 = vld [vmem:[#allocation9 + $0x338] sm:$0xff] }
 0x3cf   : > { %2803 = vmatprep.mubr.f32.mxu1 %v6489_v27  ;;  %4449 = vmatpush1.bf16.msra.mxu1 %v4448_v45  ;;  %v2415_v27 = vld [vmem:[#allocation9 + $0x290] sm:$0xff] }
 0x3d0   : > { %4450 = vmatprep.subr.bf16.mxu1 %v7315_v32 }
 0x3d2   : > { %2804 = vmatmul.mubr.f32.gmra.mrb[44].mxu1 %v6478_v50  ;;  %v4460_v50 = vpack.c.bf16 %v2416_v22, %v2415_v27 }
 0x3d3   : > { %2808 = vmatprep.mubr.f32.mxu1 %v6496_v53  ;;  %4452 = vmatpush1.bf16.msra.mxu1 %v4451_v10  ;;  %v2417_v53 = vld [vmem:[#allocation9 + $0x2a0] sm:$0xff] }
 0x3d4   : > { %4453 = vmatprep.subr.bf16.mxu1 %v7315_v32  ;;  %v2433_v10 = vld [vmem:[#allocation9 + $0x320] sm:$0xff] }
 0x3d6   : > { %2809 = vmatmul.mubr.f32.gmra.mrb[46].mxu1 %v6482_v57  ;;  %v4463_v57 = vpack.c.bf16 %v2418_v35, %v2417_v53  ;;  %v2437_v53 = vld [vmem:[#allocation9 + $0x340] sm:$0xff]  ;;  %v2438_v35 = vld [vmem:[#allocation9 + $0x348] sm:$0xff] }
 0x3d7   : > { %2813 = vmatprep.mubr.f32.mxu1 %v6505_v6  ;;  %4455 = vmatpush1.bf16.msra.mxu1 %v4454_v4  ;;  %v2419_v6 = vld [vmem:[#allocation9 + $0x2b0] sm:$0xff]  ;;  %v4487_v4 = vpack.c.bf16 %v2434_v20, %v2433_v10  ;;  %v2213_v20 = vld [vmem:[#allocation2 + $0x7a] sm:$0xff] }
 0x3d8   : > { %4456 = vmatprep.subr.bf16.mxu1 %v7315_v32  ;;  %v6846_v10 = vld [vmem:[#allocation2 + $0x69] sm:$0xff] }
 0x3da   : > { %2814 = vmatmul.mubr.f32.gmra.mrb[48].mxu1 %v6494_v0  ;;  %v4466_v0 = vpack.c.bf16 %v2420_v61, %v2419_v6  ;;  %v2209_v6 = vld [vmem:[#allocation2 + $0x4a] sm:$0xff]  ;;  %v4493_v61 = vpack.c.bf16 %v2438_v35, %v2437_v53  ;;  %v2449_v35 = vld [vmem:[#allocation9 + $0x3a0] sm:$0xff] }
 0x3db   : > { %2818 = vmatprep.mubr.f32.mxu1 %v6512_v62  ;;  %4458 = vmatpush1.bf16.msra.mxu1 %v4457_v63  ;;  %v2421_v62 = vld [vmem:[#allocation9 + $0x2c0] sm:$0xff] }
 0x3dc   : > { %4459 = vmatprep.subr.bf16.mxu1 %v7315_v32  ;;  %v6814_v63 = vld [vmem:[#allocation2 + $0x31] sm:$0xff] }
 0x3de   : > { %2819 = vmatmul.mubr.f32.gmra.mrb[50].mxu1 %v6498_v17  ;;  %v4469_v17 = vpack.c.bf16 %v2422_v28, %v2421_v62  ;;  %v2440_v62 = vld [vmem:[#allocation9 + $0x358] sm:$0xff] }
 0x3df   : > { %2823 = vmatprep.mubr.f32.mxu1 %v6521_v37  ;;  %4461 = vmatpush1.bf16.msra.mxu1 %v4460_v50  ;;  %v2423_v37 = vld [vmem:[#allocation9 + $0x2d0] sm:$0xff]  ;;  %v4490_v50 = vpack.c.bf16 %v2436_v36, %v2435_v43  ;;  %v6850_v43 = vld [vmem:[#allocation2 + $0x79] sm:$0xff] }
 0x3e0   : > { %4462 = vmatprep.subr.bf16.mxu1 %v7315_v32  ;;  %v6826_v28 = vld [vmem:[#allocation2 + $0x49] sm:$0xff] }
 0x3e2   : > { %2824 = vmatmul.mubr.f32.gmra.mrb[52].mxu1 %v6510_v16  ;;  %v4472_v16 = vpack.c.bf16 %v2424_v15, %v2423_v37  ;;  %v2210_v37 = vld [vmem:[#allocation2 + $0x52] sm:$0xff] }
 0x3e3   : > { %2828 = vmatprep.mubr.f32.mxu1 %v6528_v3  ;;  %4464 = vmatpush1.bf16.msra.mxu1 %v4463_v57  ;;  %v2425_v3 = vld [vmem:[#allocation9 + $0x2e0] sm:$0xff] }
 0x3e4   : > { %4465 = vmatprep.subr.bf16.mxu1 %v7315_v32  ;;  %v6822_v57 = vld [vmem:[#allocation2 + $0x39] sm:$0xff] }
 0x3e6   : > { %2829 = vmatmul.mubr.f32.gmra.mrb[54].mxu1 %v6514_v60  ;;  %v4475_v60 = vpack.c.bf16 %v2426_v13, %v2425_v3  ;;  %v2441_v3 = vld [vmem:[#allocation9 + $0x360] sm:$0xff]  ;;  %v2442_v13 = vld [vmem:[#allocation9 + $0x368] sm:$0xff] }
 0x3e7   : > { %2833 = vmatprep.mubr.f32.mxu1 %v6537_v21  ;;  %4467 = vmatpush1.bf16.msra.mxu1 %v4466_v0  ;;  %v2427_v21 = vld [vmem:[#allocation9 + $0x2f0] sm:$0xff] }
 0x3e8   : > { %4468 = vmatprep.subr.bf16.mxu1 %v7315_v32  ;;  %v2439_v0 = vld [vmem:[#allocation9 + $0x350] sm:$0xff] }
 0x3ea   : > { %2834 = vmatmul.mubr.f32.gmra.mrb[56].mxu1 %v6526_v9  ;;  %v4478_v9 = vpack.c.bf16 %v2428_v46, %v2427_v21  ;;  %v2211_v21 = vld [vmem:[#allocation2 + $0x62] sm:$0xff]  ;;  %v4499_v46 = vpack.c.bf16 %v2442_v13, %v2441_v3  ;;  %v6862_v3 = vld [vmem:[#allocation2 + $0x91] sm:$0xff] }
 0x3eb   : > { %2838 = vmatprep.mubr.f32.mxu1 %v6544_v31  ;;  %4470 = vmatpush1.bf16.msra.mxu1 %v4469_v17  ;;  %v7318_v31 = vld [vmem:[#allocation66_spill] sm:$0xff] }
 0x3ec   : > { %4471 = vmatprep.subr.bf16.mxu1 %v7315_v32 }
 0x3ee   : > { %2839 = vmatmul.mubr.f32.gmra.mrb[58].mxu1 %v6530_v11 }
 0x3ef   : > { %2843 = vmatprep.mubr.f32.mxu1 %v6553_v54  ;;  %4473 = vmatpush1.bf16.msra.mxu1 %v4472_v16  ;;  %v4496_v16 = vpack.c.bf16 %v2440_v62, %v2439_v0  ;;  %v2215_v0 = vld [vmem:[#allocation2 + $0x92] sm:$0xff] }
 0x3f0   : > { %4474 = vmatprep.subr.bf16.mxu1 %v7315_v32 }
 0x3f2   : > { %2844 = vmatmul.mubr.f32.gmra.mrb[60].mxu1 %v6542_v1  ;;  %v7316_v1 = vld [vmem:[#allocation61_spill] sm:$0xff] }
 0x3f3   : > { %2848 = vmatprep.mubr.f32.mxu1 %v6560_v38  ;;  %4476 = vmatpush1.bf16.msra.mxu1 %v4475_v60  ;;  %v6834_v60 = vld [vmem:[#allocation2 + $0x51] sm:$0xff] }
 0x3f4   : > { %4477 = vmatprep.subr.bf16.mxu1 %v7315_v32 }
 0x3f6   : > { %2849 = vmatmul.mubr.f32.gmra.mrb[62].mxu1 %v6546_v39  ;;  %v6779_v39 = vld [vmem:[#allocation2 + $0x152] sm:$0xff] }
 0x3f7   : > { %2853 = vmatprep.mubr.f32.mxu1 %v6569_v12  ;;  %4479 = vmatpush1.bf16.msra.mxu1 %v4478_v9  ;;  %v6790_v12 = vld [vmem:[#allocation2 + $0x180] sm:$0xff] }
 0x3f8   : > { %4480 = vmatprep.subr.bf16.mxu1 %v7315_v32  ;;  %v2443_v9 = vld [vmem:[#allocation9 + $0x370] sm:$0xff] }
 0x3fa   : > { %2854 = vmatmul.mubr.f32.gmra.mrb[64].mxu1 %v6558_v44 }
 0x3fb   : > { %2858 = vmatprep.mubr.f32.mxu1 %v6576_v58  ;;  %v6793_v58 = vld [vmem:[#allocation2 + $0x16a] sm:$0xff] }
 0x3fe   : > { %2859 = vmatmul.mubr.f32.gmra.mrb[66].mxu1 %v6562_v26  ;;  %v6787_v26 = vld [vmem:[#allocation2 + $0x15a] sm:$0xff] }
 0x3ff   : > { %2863 = vmatprep.mubr.f32.mxu1 %v6585_v18 }
 0x402   : > { %2864 = vmatmul.mubr.f32.gmra.mrb[68].mxu1 %v6574_v25 }
 0x403   : > { %2868 = vmatprep.mubr.f32.mxu1 %v6592_v55  ;;  %v6798_v55 = vld [vmem:[#allocation2 + $0x188] sm:$0xff] }
 0x406   : > { %2869 = vmatmul.mubr.f32.gmra.mrb[70].mxu1 %v6578_v7 }
 0x407   : > { %2873 = vmatprep.mubr.f32.mxu1 %v6601_v48 }
 0x40a   : > { %2874 = vmatmul.mubr.f32.gmra.mrb[72].mxu1 %v6590_v52 }
 0x40b   : > { %2878 = vmatprep.mubr.f32.mxu1 %v6608_v29  ;;  %v2429_v29 = vld [vmem:[#allocation9 + $0x300] sm:$0xff] }
 0x40e   : > { %2879 = vmatmul.mubr.f32.gmra.mrb[74].mxu1 %v6594_v56 }
 0x40f   : > { %2883 = vmatprep.mubr.f32.mxu1 %v6619_v2  ;;  %v2430_v2 = vld [vmem:[#allocation9 + $0x308] sm:$0xff] }
 0x412   : > { %2884 = vmatmul.mubr.f32.gmra.mrb[76].mxu1 %v6606_v23 }
 0x413   : > { %2888 = vmatprep.mubr.f32.mxu1 %v6629_v59  ;;  %v7317_v59 = vld [vmem:[#allocation62_spill] sm:$0xff] }
 0x416   : > { %2889 = vmatmul.mubr.f32.gmra.mrb[78].mxu1 %v6610_v34 }
 0x417   : > { %2893 = vmatprep.mubr.f32.mxu1 %v6642_v19  ;;  %v4481_v19 = vpack.c.bf16 %v2430_v2, %v2429_v29  ;;  %v6838_v29 = vld [vmem:[#allocation2 + $0x61] sm:$0xff] }
 0x41a   : > { %2894 = vmatmul.mubr.f32.gmra.mrb[80].mxu1 %v6627_v33 }
 0x41b   : > { %2898 = vmatprep.mubr.f32.mxu1 %v6653_v51  ;;  %v2431_v51 = vld [vmem:[#allocation9 + $0x310] sm:$0xff] }
 0x41e   : > { %2899 = vmatmul.mubr.f32.gmra.mrb[82].mxu1 %v6631_v8 }
 0x41f   : > { %2903 = vmatprep.mubr.f32.mxu1 %v6666_v14  ;;  %v6803_v14 = vld [vmem:[#allocation2 + $0x172] sm:$0xff] }
 0x421   : > { %v6771_v44 = vpop.f32.mrb[64].mxu0 }
 0x422   : > { %2904 = vmatmul.mubr.f32.gmra.mrb[84].mxu1 %v7316_v1  ;;  %v6774_v11 = vpop.f32.mrb[65].mxu0 }
 0x423   : > { %2908 = vmatprep.mubr.f32.mxu1 %v6675_v30  ;;  %v2432_v30 = vld [vmem:[#allocation9 + $0x318] sm:$0xff] }
 0x424   : > { %v4484_v5 = vpack.c.bf16 %v2432_v30, %v2431_v51 }
 0x426   : > { %2909 = vmatmul.mubr.f32.gmra.mrb[86].mxu1 %v7317_v59 }
 0x427   : > { %2913 = vmatprep.mubr.f32.mxu1 %v7318_v31  ;;  %v2444_v31 = vld [vmem:[#allocation9 + $0x378] sm:$0xff] }
 0x428   : > { %v4502_v30 = vpack.c.bf16 %v2444_v31, %v2443_v9  ;;  %v2453_v31 = vld [vmem:[#allocation9 + $0x3c0] sm:$0xff] }
 0x429   : > { %v6781_v54 = vpop.f32.mrb[66].mxu0 }
 0x42a   : > { %2914 = vmatmul.mubr.f32.gmra.mrb[88].mxu1 %v6779_v39  ;;  %v6784_v38 = vpop.f32.mrb[67].mxu0 }
 0x42b   : > { %2918 = vmatprep.mubr.f32.mxu1 %v6695_v49  ;;  %v2173_v49 = vld [vmem:[#allocation2 + $0x19] sm:$0xff] }
 0x42e   : > { %2919 = vmatmul.mubr.f32.gmra.mrb[90].mxu1 %v6787_v26 }
 0x42f   : > { %2923 = vmatprep.mubr.f32.mxu1 %v6790_v12 }
 0x431   : > { %v6795_v18 = vpop.f32.mrb[68].mxu0 }
 0x432   : > { %2924 = vmatmul.mubr.f32.gmra.mrb[92].mxu1 %v6793_v58  ;;  %v6800_v48 = vpop.f32.mrb[69].mxu0 }
 0x433   : > { %2928 = vmatprep.mubr.f32.mxu1 %v6798_v55 }
 0x436   : > { %2929 = vmatmul.mubr.f32.gmra.mrb[94].mxu1 %v6803_v14 }
 0x437   : > { %2998 = vmatprep.mubr.f32.mxu1 %v6705_v47  ;;  %v2207_v47 = vld [vmem:[#allocation2 + $0x32] sm:$0xff] }
 0x439   : > { %v6807_v45 = vpop.f32.mrb[70].mxu0 }
 0x43a   : > { %2999 = vmatmul.mubr.f32.vlgmr.msra.gmra.mrb[32].mxu1 %v2173_v49  ;;  %v6809_v40 = vpop.f32.mrb[71].mxu0  ;;  %v2445_v49 = vld [vmem:[#allocation9 + $0x380] sm:$0xff] }
 0x43b   : > { %3003 = vmatprep.mubr.f32.mxu1 %v6710_v41  ;;  %4482 = vmatpush1.bf16.msra.mxu1 %v4481_v19  ;;  %v2208_v41 = vld [vmem:[#allocation2 + $0x3a] sm:$0xff]  ;;  %v2212_v19 = vld [vmem:[#allocation2 + $0x6a] sm:$0xff] }
 0x43c   : > { %4483 = vmatprep.subr.bf16.mxu1 %v7315_v32 }
 0x43e   : > { %3004 = vmatmul.mubr.f32.gmra.mrb[34].mxu1 %v2174_v42 }
 0x43f   : > { %3008 = vmatprep.mubr.f32.mxu1 %v2207_v47  ;;  %4485 = vmatpush1.bf16.msra.mxu1 %v4484_v5  ;;  %v2446_v5 = vld [vmem:[#allocation9 + $0x388] sm:$0xff]  ;;  %v2447_v47 = vld [vmem:[#allocation9 + $0x390] sm:$0xff] }
 0x440   : > { %4486 = vmatprep.subr.bf16.mxu1 %v7315_v32  ;;  %v4505_v42 = vpack.c.bf16 %v2446_v5, %v2445_v49  ;;  %v2217_v49 = vld [vmem:[#allocation2 + $0xaa] sm:$0xff] }
 0x441   : > { %v6816_v27 = vpop.f32.mrb[72].mxu0 }
 0x442   : > { %3009 = vmatmul.mubr.f32.gmra.mrb[36].mxu1 %v6814_v63  ;;  %v6819_v22 = vpop.f32.mrb[73].mxu0 }
 0x443   : > { %3013 = vmatprep.mubr.f32.mxu1 %v2208_v41  ;;  %4488 = vmatpush1.bf16.msra.mxu1 %v4487_v4  ;;  %v2448_v4 = vld [vmem:[#allocation9 + $0x398] sm:$0xff]  ;;  %v2214_v41 = vld [vmem:[#allocation2 + $0x82] sm:$0xff] }
 0x444   : > { %4489 = vmatprep.subr.bf16.mxu1 %v7315_v32  ;;  %v4508_v53 = vpack.c.bf16 %v2448_v4, %v2447_v47  ;;  %v6874_v47 = vld [vmem:[#allocation2 + $0xa9] sm:$0xff] }
 0x446   : > { %3014 = vmatmul.mubr.f32.gmra.mrb[38].mxu1 %v6822_v57 }
 0x447   : > { %3018 = vmatprep.mubr.f32.mxu1 %v2209_v6  ;;  %4491 = vmatpush1.bf16.msra.mxu1 %v4490_v50  ;;  %v2450_v6 = vld [vmem:[#allocation9 + $0x3a8] sm:$0xff] }
 0x448   : > { %4492 = vmatprep.subr.bf16.mxu1 %v7315_v32  ;;  %v4511_v62 = vpack.c.bf16 %v2450_v6, %v2449_v35  ;;  %v2457_v6 = vld [vmem:[#allocation9 + $0x3e0] sm:$0xff] }
 0x449   : > { %v6828_v17 = vpop.f32.mrb[74].mxu0 }
 0x44a   : > { %3019 = vmatmul.mubr.f32.gmra.mrb[40].mxu1 %v6826_v28  ;;  %v6831_v15 = vpop.f32.mrb[75].mxu0 }
 0x44b   : > { %3023 = vmatprep.mubr.f32.mxu1 %v2210_v37  ;;  %4494 = vmatpush1.bf16.msra.mxu1 %v4493_v61  ;;  %v6858_v61 = vld [vmem:[#allocation2 + $0x81] sm:$0xff] }
 0x44c   : > { %4495 = vmatprep.subr.bf16.mxu1 %v7315_v32  ;;  %v2451_v37 = vld [vmem:[#allocation9 + $0x3b0] sm:$0xff] }
 0x44e   : > { %3024 = vmatmul.mubr.f32.gmra.mrb[42].mxu1 %v6834_v60 }
 0x44f   : > { %3028 = vmatprep.mubr.f32.mxu1 %v2211_v21  ;;  %4497 = vmatpush1.bf16.msra.mxu1 %v4496_v16  ;;  %v2452_v16 = vld [vmem:[#allocation9 + $0x3b8] sm:$0xff]  ;;  %v2216_v21 = vld [vmem:[#allocation2 + $0x9a] sm:$0xff] }
 0x450   : > { %4498 = vmatprep.subr.bf16.mxu1 %v7315_v32  ;;  %v4514_v9 = vpack.c.bf16 %v2452_v16, %v2451_v37  ;;  %v2219_v37 = vld [vmem:[#allocation2 + $0xc2] sm:$0xff] }
 0x451   : > { %v6840_v2 = vpop.f32.mrb[76].mxu0 }
 0x452   : > { %3029 = vmatmul.mubr.f32.gmra.mrb[44].mxu1 %v6838_v29  ;;  %v6843_v51 = vpop.f32.mrb[77].mxu0 }
 0x453   : > { %3033 = vmatprep.mubr.f32.mxu1 %v2212_v19  ;;  %4500 = vmatpush1.bf16.msra.mxu1 %v4499_v46  ;;  %v2454_v19 = vld [vmem:[#allocation9 + $0x3c8] sm:$0xff] }
 0x454   : > { %4501 = vmatprep.subr.bf16.mxu1 %v7315_v32  ;;  %v4517_v5 = vpack.c.bf16 %v2454_v19, %v2453_v31  ;;  %v6886_v31 = vld [vmem:[#allocation2 + $0xc1] sm:$0xff] }
 0x456   : > { %3034 = vmatmul.mubr.f32.gmra.mrb[46].mxu1 %v6846_v10 }
 0x457   : > { %3038 = vmatprep.mubr.f32.mxu1 %v2213_v20  ;;  %4503 = vmatpush1.bf16.msra.mxu1 %v4502_v30  ;;  %v6870_v30 = vld [vmem:[#allocation2 + $0x99] sm:$0xff]  ;;  %v2455_v20 = vld [vmem:[#allocation9 + $0x3d0] sm:$0xff] }
 0x458   : > { %4504 = vmatprep.subr.bf16.mxu1 %v7315_v32 }
 0x459   : > { %v6852_v36 = vpop.f32.mrb[78].mxu0 }
 0x45a   : > { %3039 = vmatmul.mubr.f32.gmra.mrb[48].mxu1 %v6850_v43  ;;  %v6855_v50 = vpop.f32.mrb[79].mxu0 }
 0x45b   : > { %3043 = vmatprep.mubr.f32.mxu1 %v2214_v41  ;;  %4506 = vmatpush1.bf16.msra.mxu1 %v4505_v42  ;;  %v2456_v42 = vld [vmem:[#allocation9 + $0x3d8] sm:$0xff]  ;;  %v2218_v41 = vld [vmem:[#allocation2 + $0xb2] sm:$0xff] }
 0x45c   : > { %4507 = vmatprep.subr.bf16.mxu1 %v7315_v32  ;;  %v4520_v35 = vpack.c.bf16 %v2456_v42, %v2455_v20  ;;  %v6894_v42 = vld [vmem:[#allocation2 + $0xc9] sm:$0xff] }
 0x45e   : > { %3044 = vmatmul.mubr.f32.gmra.mrb[50].mxu1 %v6858_v61 }
 0x45f   : > { %3048 = vmatprep.mubr.f32.mxu1 %v2215_v0  ;;  %4509 = vmatpush1.bf16.msra.mxu1 %v4508_v53  ;;  %v2458_v0 = vld [vmem:[#allocation9 + $0x3e8] sm:$0xff] }
 0x460   : > { %4510 = vmatprep.subr.bf16.mxu1 %v7315_v32  ;;  %v4523_v16 = vpack.c.bf16 %v2458_v0, %v2457_v6 }
 0x461   : > { %v6864_v13 = vpop.f32.mrb[80].mxu0 }
 0x462   : > { %3049 = vmatmul.mubr.f32.gmra.mrb[52].mxu1 %v6862_v3  ;;  %v6867_v46 = vpop.f32.mrb[81].mxu0 }
 0x463   : > { %3053 = vmatprep.mubr.f32.mxu1 %v2216_v21  ;;  %4512 = vmatpush1.bf16.msra.mxu1 %v4511_v62  ;;  %v6882_v62 = vld [vmem:[#allocation2 + $0xb1] sm:$0xff]  ;;  %v2459_v21 = vld [vmem:[#allocation9 + $0x3f0] sm:$0xff] }
 0x464   : > { %4513 = vmatprep.subr.bf16.mxu1 %v7315_v32 }
 0x466   : > { %3054 = vmatmul.mubr.f32.gmra.mrb[54].mxu1 %v6870_v30 }
 0x467   : > { %3058 = vmatprep.mubr.f32.mxu1 %v2217_v49  ;;  %4515 = vmatpush1.bf16.msra.mxu1 %v4514_v9  ;;  %v2460_v9 = vld [vmem:[#allocation9 + $0x3f8] sm:$0xff] }
 0x468   : > { %4516 = vmatprep.subr.bf16.mxu1 %v7315_v32  ;;  %v2220_v49 = vld [vmem:[#allocation2 + $0xca] sm:$0xff]  ;;  %v4526_v20 = vpack.c.bf16 %v2460_v9, %v2459_v21  ;;  %v6946_v9 = vld [vmem:[#allocation2 + $0x182] sm:$0xff] }
 0x469   : > { %v6876_v4 = vpop.f32.mrb[82].mxu0  ;;  %v7323_v21 = vld [vmem:[#allocation60_spill] sm:$0xff] }
 0x46a   : > { %3059 = vmatmul.mubr.f32.gmra.mrb[56].mxu1 %v6874_v47  ;;  %v6879_v53 = vpop.f32.mrb[83].mxu0 }
 0x46b   : > { %3063 = vmatprep.mubr.f32.mxu1 %v2218_v41  ;;  %4518 = vmatpush1.bf16.msra.mxu1 %v4517_v5  ;;  %v7319_v41 = vld [vmem:[#allocation47_spill] sm:$0xff] }
 0x46c   : > { %4519 = vmatprep.subr.bf16.mxu1 %v7315_v32 }
 0x46e   : > { %3064 = vmatmul.mubr.f32.gmra.mrb[58].mxu1 %v6882_v62 }
 0x46f   : > { %3068 = vmatprep.mubr.f32.mxu1 %v2219_v37  ;;  %4521 = vmatpush1.bf16.msra.mxu1 %v4520_v35  ;;  %v6899_v35 = vld [vmem:[#allocation2 + $0xd9] sm:$0xff] }
 0x470   : > { %4522 = vmatprep.subr.bf16.mxu1 %v7315_v32  ;;  %v6915_v37 = vld [vmem:[#allocation2 + $0xf9] sm:$0xff] }
 0x471   : > { %v6888_v19 = vpop.f32.mrb[84].mxu0 }
 0x472   : > { %3069 = vmatmul.mubr.f32.gmra.mrb[60].mxu1 %v6886_v31  ;;  %v6891_v5 = vpop.f32.mrb[85].mxu0 }
 0x473   : > { %3073 = vmatprep.mubr.f32.mxu1 %v2220_v49  ;;  %4524 = vmatpush1.bf16.msra.mxu1 %v4523_v16  ;;  %v6919_v16 = vld [vmem:[#allocation2 + $0x109] sm:$0xff] }
 0x474   : > { %4525 = vmatprep.subr.bf16.mxu1 %v7315_v32  ;;  %v6907_v32 = vld [vmem:[#allocation2 + $0xe1] sm:$0xff] }
 0x476   : > { %3074 = vmatmul.mubr.f32.gmra.mrb[62].mxu1 %v6894_v42 }
 0x477   : > { %3078 = vmatprep.mubr.f32.mxu1 %v6574_v25  ;;  %4527 = vmatpush1.bf16.msra.mxu1 %v4526_v20  ;;  %v6911_v25 = vld [vmem:[#allocation2 + $0xf1] sm:$0xff] }
 0x478   : > { %4560 = vmatprep.subr.bf16.mxu1 %v7319_v41  ;;  %v6951_v20 = vld [vmem:[#allocation2 + $0x18a] sm:$0xff] }
 0x479   : > { %v6901_v6 = vpop.f32.mrb[86].mxu0 }
 0x47a   : > { %3079 = vmatmul.mubr.f32.gmra.mrb[64].mxu1 %v6899_v35  ;;  %v6904_v0 = vpop.f32.mrb[87].mxu0 }
 0x47b   : > { %3083 = vmatprep.mubr.f32.mxu1 %v6578_v7  ;;  %v6923_v7 = vld [vmem:[#allocation2 + $0x111] sm:$0xff] }
 0x47e   : > { %3084 = vmatmul.mubr.f32.gmra.mrb[66].mxu1 %v6907_v32 }
 0x47f   : > { %3088 = vmatprep.mubr.f32.mxu1 %v6590_v52  ;;  %v6927_v52 = vld [vmem:[#allocation2 + $0x121] sm:$0xff] }
 0x482   : > { %3089 = vmatmul.mubr.f32.gmra.mrb[68].mxu1 %v6911_v25 }
 0x483   : > { %3093 = vmatprep.mubr.f32.mxu1 %v6594_v56  ;;  %v6931_v56 = vld [vmem:[#allocation2 + $0x129] sm:$0xff] }
 0x486   : > { %3094 = vmatmul.mubr.f32.gmra.mrb[70].mxu1 %v6915_v37 }
 0x487   : > { %3098 = vmatprep.mubr.f32.mxu1 %v6606_v23  ;;  %v7320_v23 = vld [vmem:[#allocation57_spill] sm:$0xff] }
 0x48a   : > { %3099 = vmatmul.mubr.f32.gmra.mrb[72].mxu1 %v6919_v16 }
 0x48b   : > { %3103 = vmatprep.mubr.f32.mxu1 %v6610_v34  ;;  %v7321_v34 = vld [vmem:[#allocation58_spill] sm:$0xff] }
 0x48e   : > { %3104 = vmatmul.mubr.f32.gmra.mrb[74].mxu1 %v6923_v7 }
 0x48f   : > { %3108 = vmatprep.mubr.f32.mxu1 %v6627_v33  ;;  %v7322_v33 = vld [vmem:[#allocation59_spill] sm:$0xff] }
 0x492   : > { %3109 = vmatmul.mubr.f32.gmra.mrb[76].mxu1 %v6927_v52 }
 0x493   : > { %3113 = vmatprep.mubr.f32.mxu1 %v6631_v8  ;;  %v7324_v8 = vld [vmem:[#allocation63_spill] sm:$0xff] }
 0x496   : > { %3114 = vmatmul.mubr.f32.gmra.mrb[78].mxu1 %v6931_v56 }
 0x497   : > { %3118 = vmatprep.mubr.f32.mxu1 %v7316_v1  ;;  %v7325_v1 = vld [vmem:[#allocation64_spill] sm:$0xff] }
 0x49a   : > { %3119 = vmatmul.mubr.f32.gmra.mrb[80].mxu1 %v7320_v23  ;;  %v7328_v23 = vmax.f32 %v6690_v24, 0.0  ;;  %v2239_v24 = vld [vmem:[#allocation2 + $0x48] sm:$0xff] }
 0x49b   : > { %3123 = vmatprep.mubr.f32.mxu1 %v7317_v59  ;;  %v7326_v59 = vld [vmem:[#allocation65_spill] sm:$0xff] }
 0x49c   : > { %v7327_v49 = vmax.f32 %v7326_v59, 0.0  ;;  %v7334_v59 = vld [vmem:[#allocation53_spill] sm:$0xff] }
 0x49e   : > { %3124 = vmatmul.mubr.f32.gmra.mrb[82].mxu1 %v7321_v34  ;;  %v2237_v34 = vld [vmem:[#allocation2 + $0x30] sm:$0xff] }
 0x49f   : > { %3128 = vmatprep.mubr.f32.mxu1 %v6779_v39 }
 0x4a2   : > { %3129 = vmatmul.mubr.f32.gmra.mrb[84].mxu1 %v7322_v33  ;;  %v7329_v33 = vld [vmem:[#allocation48_spill] sm:$0xff] }
 0x4a3   : > { %3133 = vmatprep.mubr.f32.mxu1 %v6787_v26 }
 0x4a6   : > { %3134 = vmatmul.mubr.f32.gmra.mrb[86].mxu1 %v7323_v21  ;;  %v2238_v21 = vld [vmem:[#allocation2 + $0x38] sm:$0xff] }
 0x4a7   : > { %3138 = vmatprep.mubr.f32.mxu1 %v6793_v58 }
 0x4aa   : > { %3139 = vmatmul.mubr.f32.gmra.mrb[88].mxu1 %v7324_v8  ;;  %v7330_v8 = vld [vmem:[#allocation49_spill] sm:$0xff] }
 0x4ab   : > { %3143 = vmatprep.mubr.f32.mxu1 %v6803_v14 }
 0x4ae   : > { %3144 = vmatmul.mubr.f32.gmra.mrb[90].mxu1 %v7325_v1  ;;  %v7333_v1 = vld [vmem:[#allocation52_spill] sm:$0xff] }
 0x4af   : > { %3148 = vmatprep.mubr.f32.mxu1 %v6946_v9 }
 0x4b2   : > { %3149 = vmatmul.mubr.f32.gmra.mrb[92].mxu1 %v7327_v49  ;;  %v7335_v49 = vld [vmem:[#allocation54_spill] sm:$0xff] }
 0x4b3   : > { %3153 = vmatprep.mubr.f32.mxu1 %v6951_v20 }
 0x4b6   : > { %3154 = vmatmul.mubr.f32.gmra.mrb[94].mxu1 %v7328_v23  ;;  %v2245_v23 = vld [vmem:[#allocation2 + $0x90] sm:$0xff] }
 0x4b7   : > { %3223 = vmatprep.mubr.f32.mxu1 %v6814_v63  ;;  %v7331_v63 = vld [vmem:[#allocation50_spill] sm:$0xff] }
 0x4ba   : > { %3224 = vmatmul.mubr.f32.vlgmr.msra.gmra.mrb[32].mxu1 %v2237_v34  ;;  %v2247_v34 = vld [vmem:[#allocation2 + $0xa8] sm:$0xff] }
 0x4bb   : > { %3228 = vmatprep.mubr.f32.mxu1 %v6822_v57  ;;  %4568 = vmatpush3.bf16.msra.mxu1 %v7319_v41  ;;  %v2240_v57 = vld [vmem:[#allocation2 + $0x50] sm:$0xff]  ;;  %v7332_v41 = vld [vmem:[#allocation51_spill] sm:$0xff] }
 0x4bc   : > { %4561 = vmatprep.subr.bf16.mxu1 %v7329_v33 }
 0x4be   : > { %3229 = vmatmul.mubr.f32.gmra.mrb[34].mxu1 %v2238_v21  ;;  %v2291_v21 = vld [vmem:[#allocation2 + $0x139] sm:$0xff] }
 0x4bf   : > { %3233 = vmatprep.mubr.f32.mxu1 %v6826_v28  ;;  %4569 = vmatpush3.bf16.msra.mxu1 %v7329_v33  ;;  %v2241_v28 = vld [vmem:[#allocation2 + $0x60] sm:$0xff] }
 0x4c0   : > { %4562 = vmatprep.subr.bf16.mxu1 %v7330_v8  ;;  %v2249_v33 = vld [vmem:[#allocation2 + $0xc0] sm:$0xff] }
 0x4c2   : > { %3234 = vmatmul.mubr.f32.gmra.mrb[36].mxu1 %v2239_v24  ;;  %v2293_v24 = vld [vmem:[#allocation2 + $0x151] sm:$0xff] }
 0x4c3   : > { %3238 = vmatprep.mubr.f32.mxu1 %v6834_v60  ;;  %4570 = vmatpush3.bf16.msra.mxu1 %v7330_v8  ;;  %v2242_v60 = vld [vmem:[#allocation2 + $0x68] sm:$0xff] }
 0x4c4   : > { %4563 = vmatprep.subr.bf16.mxu1 %v7331_v63  ;;  %v2292_v8 = vld [vmem:[#allocation2 + $0x141] sm:$0xff] }
 0x4c6   : > { %3239 = vmatmul.mubr.f32.gmra.mrb[38].mxu1 %v2240_v57  ;;  %v2295_v57 = vld [vmem:[#allocation2 + $0x169] sm:$0xff] }
 0x4c7   : > { %3243 = vmatprep.mubr.f32.mxu1 %v6838_v29  ;;  %4571 = vmatpush3.bf16.msra.mxu1 %v7331_v63  ;;  %v2243_v29 = vld [vmem:[#allocation2 + $0x78] sm:$0xff] }
 0x4c8   : > { %4564 = vmatprep.subr.bf16.mxu1 %v7332_v41  ;;  %v2294_v63 = vld [vmem:[#allocation2 + $0x159] sm:$0xff] }
 0x4ca   : > { %3244 = vmatmul.mubr.f32.gmra.mrb[40].mxu1 %v2241_v28  ;;  %v2264_v28 = vld [vmem:[#allocation2 + $0x170] sm:$0xff] }
 0x4cb   : > { %3248 = vmatprep.mubr.f32.mxu1 %v6846_v10  ;;  %4572 = vmatpush3.bf16.msra.mxu1 %v7332_v41  ;;  %v2244_v10 = vld [vmem:[#allocation2 + $0x80] sm:$0xff]  ;;  %v2296_v41 = vld [vmem:[#allocation2 + $0x171] sm:$0xff] }
 0x4cc   : > { %4565 = vmatprep.subr.bf16.mxu1 %v7333_v1 }
 0x4ce   : > { %3249 = vmatmul.mubr.f32.gmra.mrb[42].mxu1 %v2242_v60  ;;  %v2298_v60 = vld [vmem:[#allocation2 + $0x189] sm:$0xff] }
 0x4cf   : > { %3253 = vmatprep.mubr.f32.mxu1 %v6850_v43  ;;  %4573 = vmatpush3.bf16.msra.mxu1 %v7333_v1  ;;  %v2246_v43 = vld [vmem:[#allocation2 + $0x98] sm:$0xff]  ;;  %v2297_v1 = vld [vmem:[#allocation2 + $0x181] sm:$0xff] }
 0x4d0   : > { %4566 = vmatprep.subr.bf16.mxu1 %v7334_v59 }
 0x4d2   : > { %3254 = vmatmul.mubr.f32.gmra.mrb[44].mxu1 %v2243_v29  ;;  %v2300_v29 = vld [vmem:[#allocation2 + $0x1a1] sm:$0xff] }
 0x4d3   : > { %3258 = vmatprep.mubr.f32.mxu1 %v6858_v61  ;;  %4574 = vmatpush3.bf16.msra.mxu1 %v7334_v59  ;;  %v2248_v61 = vld [vmem:[#allocation2 + $0xb0] sm:$0xff]  ;;  %v2299_v59 = vld [vmem:[#allocation2 + $0x199] sm:$0xff] }
 0x4d4   : > { %4567 = vmatprep.subr.bf16.mxu1 %v7335_v49 }
 0x4d6   : > { %3259 = vmatmul.mubr.f32.gmra.mrb[46].mxu1 %v2244_v10  ;;  %v7001_v10 = vld [vmem:[#allocation11] ss:$0 sm:$0xff] }
 0x4d7   : > { %3263 = vmatprep.mubr.f32.mxu1 %v6862_v3  ;;  %4575 = vmatpush3.bf16.msra.mxu1 %v7335_v49  ;;  %v2250_v3 = vld [vmem:[#allocation2 + $0xc8] sm:$0xff]  ;;  %v5150_v49 = vld [vmem:[#allocation2] sm:$0xff] }
 0x4da   : > { %3264 = vmatmul.mubr.f32.gmra.mrb[48].mxu1 %v2245_v23 }
 0x4db   : > { %3268 = vmatprep.mubr.f32.mxu1 %v6870_v30  ;;  %v2251_v30 = vld [vmem:[#allocation2 + $0xd8] sm:$0xff] }
 0x4de   : > { %3269 = vmatmul.mubr.f32.gmra.mrb[50].mxu1 %v2246_v43 }
 0x4df   : > { %3273 = vmatprep.mubr.f32.mxu1 %v6874_v47  ;;  %v2252_v47 = vld [vmem:[#allocation2 + $0xe0] sm:$0xff] }
 0x4e2   : > { %3274 = vmatmul.mubr.f32.gmra.mrb[52].mxu1 %v2247_v34  ;;  %v7336_v34 = vld [vmem:[#allocation17_spill] sm:$0xff] }
 0x4e3   : > { %3278 = vmatprep.mubr.f32.mxu1 %v6882_v62  ;;  %v2253_v62 = vld [vmem:[#allocation2 + $0xf0] sm:$0xff] }
 0x4e6   : > { %3279 = vmatmul.mubr.f32.gmra.mrb[54].mxu1 %v2248_v61 }
 0x4e7   : > { %3283 = vmatprep.mubr.f32.mxu1 %v6886_v31  ;;  %v2254_v31 = vld [vmem:[#allocation2 + $0xf8] sm:$0xff] }
 0x4ea   : > { %3284 = vmatmul.mubr.f32.gmra.mrb[56].mxu1 %v2249_v33 }
 0x4eb   : > { %3288 = vmatprep.mubr.f32.mxu1 %v6894_v42  ;;  %v2255_v42 = vld [vmem:[#allocation2 + $0x108] sm:$0xff] }
 0x4ee   : > { %3289 = vmatmul.mubr.f32.gmra.mrb[58].mxu1 %v2250_v3 }
 0x4ef   : > { %3293 = vmatprep.mubr.f32.mxu1 %v6899_v35  ;;  %v2256_v35 = vld [vmem:[#allocation2 + $0x110] sm:$0xff] }
 0x4f2   : > { %3294 = vmatmul.mubr.f32.gmra.mrb[60].mxu1 %v2251_v30  ;;  %v7337_v30 = vld [vmem:[#allocation18_spill] sm:$0xff] }
 0x4f3   : > { %3298 = vmatprep.mubr.f32.mxu1 %v6907_v32  ;;  %v2257_v32 = vld [vmem:[#allocation2 + $0x120] sm:$0xff] }
 0x4f6   : > { %3299 = vmatmul.mubr.f32.gmra.mrb[62].mxu1 %v2252_v47 }
 0x4f7   : > { %3303 = vmatprep.mubr.f32.mxu1 %v6911_v25  ;;  %v2258_v25 = vld [vmem:[#allocation2 + $0x128] sm:$0xff] }
 0x4fa   : > { %3304 = vmatmul.mubr.f32.gmra.mrb[64].mxu1 %v2253_v62 }
 0x4fb   : > { %3308 = vmatprep.mubr.f32.mxu1 %v6915_v37  ;;  %v2259_v37 = vld [vmem:[#allocation2 + $0x138] sm:$0xff] }
 0x4fe   : > { %3309 = vmatmul.mubr.f32.gmra.mrb[66].mxu1 %v2254_v31 }
 0x4ff   : > { %3313 = vmatprep.mubr.f32.mxu1 %v6919_v16  ;;  %v2260_v16 = vld [vmem:[#allocation2 + $0x140] sm:$0xff] }
 0x502   : > { %3314 = vmatmul.mubr.f32.gmra.mrb[68].mxu1 %v2255_v42 }
 0x503   : > { %3318 = vmatprep.mubr.f32.mxu1 %v6923_v7  ;;  %v2261_v7 = vld [vmem:[#allocation2 + $0x150] sm:$0xff] }
 0x506   : > { %3319 = vmatmul.mubr.f32.gmra.mrb[70].mxu1 %v2256_v35 }
 0x507   : > { %3323 = vmatprep.mubr.f32.mxu1 %v6927_v52  ;;  %v2262_v52 = vld [vmem:[#allocation2 + $0x158] sm:$0xff] }
 0x50a   : > { %3324 = vmatmul.mubr.f32.gmra.mrb[72].mxu1 %v2257_v32 }
 0x50b   : > { %3328 = vmatprep.mubr.f32.mxu1 %v6931_v56  ;;  %v2263_v56 = vld [vmem:[#allocation2 + $0x168] sm:$0xff] }
 0x50e   : > { %3329 = vmatmul.mubr.f32.gmra.mrb[74].mxu1 %v2258_v25 }
 0x50f   : > { %3333 = vmatprep.mubr.f32.mxu1 %v2291_v21 }
 0x512   : > { %3334 = vmatmul.mubr.f32.gmra.mrb[76].mxu1 %v2259_v37 }
 0x513   : > { %3338 = vmatprep.mubr.f32.mxu1 %v2292_v8 }
 0x516   : > { %3339 = vmatmul.mubr.f32.gmra.mrb[78].mxu1 %v2260_v16 }
 0x517   : > { %3343 = vmatprep.mubr.f32.mxu1 %v2293_v24  ;;  %v7339_v24 = vld [vmem:[#allocation20_spill] sm:$0xff] }
 0x51a   : > { %3344 = vmatmul.mubr.f32.gmra.mrb[80].mxu1 %v2261_v7 }
 0x51b   : > { %3348 = vmatprep.mubr.f32.mxu1 %v2294_v63 }
 0x51e   : > { %3349 = vmatmul.mubr.f32.gmra.mrb[82].mxu1 %v2262_v52 }
 0x51f   : > { %3353 = vmatprep.mubr.f32.mxu1 %v2295_v57 }
 0x522   : > { %3354 = vmatmul.mubr.f32.gmra.mrb[84].mxu1 %v2263_v56 }
 0x523   : > { %3358 = vmatprep.mubr.f32.mxu1 %v2296_v41  ;;  %v7340_v41 = vld [vmem:[#allocation21_spill] sm:$0xff] }
 0x526   : > { %3359 = vmatmul.mubr.f32.gmra.mrb[86].mxu1 %v2264_v28 }
 0x527   : > { %3363 = vmatprep.mubr.f32.mxu1 %v2297_v1 }
 0x52a   : > { %3364 = vmatmul.mubr.f32.gmra.mrb[88].mxu1 %v6790_v12  ;;  %v2331_v12 = vld [vmem:[#allocation2 + $0x19a] sm:$0xff] }
 0x52b   : > { %3368 = vmatprep.mubr.f32.mxu1 %v2298_v60 }
 0x52e   : > { %3369 = vmatmul.mubr.f32.gmra.mrb[90].mxu1 %v6798_v55  ;;  %v2332_v55 = vld [vmem:[#allocation2 + $0x1a2] sm:$0xff] }
 0x52f   : > { %3373 = vmatprep.mubr.f32.mxu1 %v2299_v59 }
 0x532   : > { %3374 = vmatmul.mubr.f32.gmra.mrb[92].mxu1 %v5150_v49 }
 0x533   : > { %3378 = vmatprep.mubr.f32.mxu1 %v2300_v29 }
 0x536   : > { %3379 = vmatmul.mubr.f32.gmra.mrb[94].mxu1 %v5150_v49  ;;  %v7341_v49 = vld [vmem:[#allocation22_spill] sm:$0xff] }
 0x537   : > { %4100 = vmatprep.mubr.f32.mxu1 %v6779_v39 }
 0x53a   : > { %4101 = vmatmul.mubr.f32.vlgmr.msra.gmra.mrb[96].mxu1 %v6787_v26 }
 0x53b   : > { %4103 = vmatprep.mubr.f32.mxu1 %v6793_v58 }
 0x53e   : > { %4104 = vmatmul.mubr.f32.gmra.mrb[98].mxu1 %v6803_v14 }
 0x53f   : > { %4106 = vmatprep.mubr.f32.mxu1 %v6946_v9 }
 0x542   : > { %4107 = vmatmul.mubr.f32.gmra.mrb[100].mxu1 %v6951_v20 }
 0x543   : > { %4109 = vmatprep.mubr.f32.mxu1 %v2331_v12 }
 0x546   : > { %4110 = vmatmul.mubr.f32.gmra.mrb[102].mxu1 %v2332_v55 }
 0x58d   : > { %v3225_v23 = vpop.f32.mrb[32].mxu1 }
 0x58e   : > { %v4608_v39 = vadd.f32 %v7001_v10, %v3225_v23  ;;  %v3227_v43 = vpop.f32.mrb[33].mxu1 }
 0x590   : > { %v3451_v26 = vadd.f32 %v4608_v39, %v6774_v11 }
 0x591   : > { %v3230_v58 = vpop.f32.mrb[34].mxu1 }
 0x592   : > { %v3609_v14 = vadd.f32 %v7336_v34, %v3451_v26  ;;  %v4609_v9 = vadd.f32 %v7001_v10, %v3230_v58  ;;  %v3232_v61 = vpop.f32.mrb[35].mxu1  ;;  %v7342_v26 = vld [vmem:[#allocation23_spill] sm:$0xff] }
 0x594   : > { %v3641_v33 = vmax.f32 %v3609_v14, 0.0  ;;  %v3456_v20 = vadd.f32 %v4609_v9, %v6771_v44  ;;  %v7338_v44 = vld [vmem:[#allocation19_spill] sm:$0xff] }
 0x595   : > { %v3235_v3 = vpop.f32.mrb[36].mxu1 }
 0x596   : > { %3673 = vst [vmem:[%s7010_s24] sm:$0xff] %v3641_v33  ;;  %v3610_v47 = vadd.f32 %v7337_v30, %v3456_v20  ;;  %v4610_v11 = vadd.f32 %v7001_v10, %v3235_v3  ;;  %v3237_v62 = vpop.f32.mrb[37].mxu1  ;;  %v7343_v33 = vld [vmem:[#allocation24_spill] sm:$0xff] }
 0x597   : > { %v7344_v62 = vld [vmem:[#allocation25_spill] sm:$0xff] }
 0x598   : > { %v3642_v31 = vmax.f32 %v3610_v47, 0.0  ;;  %v3461_v42 = vadd.f32 %v4610_v11, %v6784_v38 }
 0x599   : > { %v3240_v35 = vpop.f32.mrb[38].mxu1 }
 0x59a   : > { %3674 = vst [vmem:[%s7010_s24 + $0x8] sm:$0xff] %v3642_v31  ;;  %v3611_v32 = vadd.f32 %v7338_v44, %v3461_v42  ;;  %v4611_v25 = vadd.f32 %v7001_v10, %v3240_v35  ;;  %v3242_v21 = vpop.f32.mrb[39].mxu1 }
 0x59c   : > { %v3643_v37 = vmax.f32 %v3611_v32, 0.0  ;;  %v3466_v8 = vadd.f32 %v4611_v25, %v6781_v54  ;;  %v7345_v25 = vld [vmem:[#allocation26_spill] sm:$0xff] }
 0x59d   : > { %v3245_v16 = vpop.f32.mrb[40].mxu1 }
 0x59e   : > { %3675 = vst [vmem:[%s7010_s24 + $0x10] sm:$0xff] %v3643_v37  ;;  %v3612_v7 = vadd.f32 %v7339_v24, %v3466_v8  ;;  %v4612_v63 = vadd.f32 %v7001_v10, %v3245_v16  ;;  %v3247_v52 = vpop.f32.mrb[41].mxu1 }
 0x5a0   : > { %v3644_v38 = vmax.f32 %v3612_v7, 0.0  ;;  %v3471_v57 = vadd.f32 %v4612_v63, %v6800_v48  ;;  %v7346_v7 = vld [vmem:[#allocation27_spill] sm:$0xff] }
 0x5a1   : > { %v3250_v56 = vpop.f32.mrb[42].mxu1 }
 0x5a2   : > { %3676 = vst [vmem:[%s7010_s24 + $0x18] sm:$0xff] %v3644_v38  ;;  %v3613_v28 = vadd.f32 %v7340_v41, %v3471_v57  ;;  %v4613_v1 = vadd.f32 %v7001_v10, %v3250_v56  ;;  %v3252_v60 = vpop.f32.mrb[43].mxu1  ;;  %v7347_v41 = vld [vmem:[#allocation28_spill] sm:$0xff] }
 0x5a4   : > { %v3645_v54 = vmax.f32 %v3613_v28, 0.0  ;;  %v3476_v59 = vadd.f32 %v4613_v1, %v6795_v18 }
 0x5a5   : > { %v3255_v29 = vpop.f32.mrb[44].mxu1 }
 0x5a6   : > { %3677 = vst [vmem:[%s7010_s24 + $0x20] sm:$0xff] %v3645_v54  ;;  %v3614_v12 = vadd.f32 %v7341_v49, %v3476_v59  ;;  %v4614_v55 = vadd.f32 %v7001_v10, %v3255_v29  ;;  %v3257_v23 = vpop.f32.mrb[45].mxu1  ;;  %v7348_v29 = vld [vmem:[#allocation29_spill] sm:$0xff] }
 0x5a8   : > { %v3646_v48 = vmax.f32 %v3614_v12, 0.0  ;;  %v3481_v39 = vadd.f32 %v4614_v55, %v6809_v40 }
 0x5a9   : > { %v3260_v43 = vpop.f32.mrb[46].mxu1 }
 0x5aa   : > { %3678 = vst [vmem:[%s7010_s24 + $0x28] sm:$0xff] %v3646_v48  ;;  %v3615_v58 = vadd.f32 %v7342_v26, %v3481_v39  ;;  %v4615_v34 = vadd.f32 %v7001_v10, %v3260_v43  ;;  %v3262_v14 = vpop.f32.mrb[47].mxu1  ;;  %v7349_v39 = vld [vmem:[#allocation30_spill] sm:$0xff] }
 0x5ac   : > { %v3647_v18 = vmax.f32 %v3615_v58, 0.0  ;;  %v3486_v9 = vadd.f32 %v4615_v34, %v6807_v45 }
 0x5ad   : > { %v3265_v61 = vpop.f32.mrb[48].mxu1 }
 0x5ae   : > { %3679 = vst [vmem:[%s7010_s24 + $0x30] sm:$0xff] %v3647_v18  ;;  %v3616_v20 = vadd.f32 %v7343_v33, %v3486_v9  ;;  %v4616_v3 = vadd.f32 %v7001_v10, %v3265_v61  ;;  %v3267_v30 = vpop.f32.mrb[49].mxu1  ;;  %v7350_v18 = vld [vmem:[#allocation31_spill] sm:$0xff] }
 0x5af   : > { %v7351_v30 = vld [vmem:[#allocation32_spill] sm:$0xff] }
 0x5b0   : > { %v3648_v40 = vmax.f32 %v3616_v20, 0.0  ;;  %v3491_v47 = vadd.f32 %v4616_v3, %v6819_v22 }
 0x5b1   : > { %v3270_v11 = vpop.f32.mrb[50].mxu1 }
 0x5b2   : > { %3680 = vst [vmem:[%s7010_s24 + $0x38] sm:$0xff] %v3648_v40  ;;  %v3617_v31 = vadd.f32 %v7344_v62, %v3491_v47  ;;  %v4617_v42 = vadd.f32 %v7001_v10, %v3270_v11  ;;  %v3272_v35 = vpop.f32.mrb[51].mxu1 }
 0x5b4   : > { %v3649_v45 = vmax.f32 %v3617_v31, 0.0  ;;  %v3496_v44 = vadd.f32 %v4617_v42, %v6816_v27  ;;  %v7352_v42 = vld [vmem:[#allocation33_spill] sm:$0xff] }
 0x5b5   : > { %v3275_v32 = vpop.f32.mrb[52].mxu1 }
 0x5b6   : > { %3681 = vst [vmem:[%s7010_s24 + $0x40] sm:$0xff] %v3649_v45  ;;  %v3618_v21 = vadd.f32 %v7345_v25, %v3496_v44  ;;  %v4618_v37 = vadd.f32 %v7001_v10, %v3275_v32  ;;  %v3277_v8 = vpop.f32.mrb[53].mxu1 }
 0x5b8   : > { %v3650_v22 = vmax.f32 %v3618_v21, 0.0  ;;  %v3501_v16 = vadd.f32 %v4618_v37, %v6831_v15  ;;  %v7353_v21 = vld [vmem:[#allocation34_spill] sm:$0xff] }
 0x5b9   : > { %v3280_v24 = vpop.f32.mrb[54].mxu1 }
 0x5ba   : > { %3682 = vst [vmem:[%s7010_s24 + $0x48] sm:$0xff] %v3650_v22  ;;  %v3619_v63 = vadd.f32 %v7346_v7, %v3501_v16  ;;  %v4619_v52 = vadd.f32 %v7001_v10, %v3280_v24  ;;  %v3282_v38 = vpop.f32.mrb[55].mxu1  ;;  %v7354_v7 = vld [vmem:[#allocation35_spill] sm:$0xff] }
 0x5bc   : > { %v3651_v27 = vmax.f32 %v3619_v63, 0.0  ;;  %v3506_v57 = vadd.f32 %v4619_v52, %v6828_v17 }
 0x5bd   : > { %v3285_v56 = vpop.f32.mrb[56].mxu1 }
 0x5be   : > { %3683 = vst [vmem:[%s7010_s24 + $0x50] sm:$0xff] %v3651_v27  ;;  %v3620_v28 = vadd.f32 %v7347_v41, %v3506_v57  ;;  %v4620_v1 = vadd.f32 %v7001_v10, %v3285_v56  ;;  %v3287_v60 = vpop.f32.mrb[57].mxu1  ;;  %v7355_v56 = vld [vmem:[#allocation36_spill] sm:$0xff] }
 0x5c0   : > { %v3652_v15 = vmax.f32 %v3620_v28, 0.0  ;;  %v3511_v54 = vadd.f32 %v4620_v1, %v6843_v51 }
 0x5c1   : > { %v3290_v59 = vpop.f32.mrb[58].mxu1 }
 0x5c2   : > { %3684 = vst [vmem:[%s7010_s24 + $0x58] sm:$0xff] %v3652_v15  ;;  %v3621_v49 = vadd.f32 %v7348_v29, %v3511_v54  ;;  %v4621_v12 = vadd.f32 %v7001_v10, %v3290_v59  ;;  %v3292_v55 = vpop.f32.mrb[59].mxu1  ;;  %v7356_v54 = vld [vmem:[#allocation37_spill] sm:$0xff] }
 0x5c4   : > { %v3653_v17 = vmax.f32 %v3621_v49, 0.0  ;;  %v3516_v23 = vadd.f32 %v4621_v12, %v6840_v2 }
 0x5c5   : > { %v3295_v48 = vpop.f32.mrb[60].mxu1 }
 0x5c6   : > { %3685 = vst [vmem:[%s7010_s24 + $0x60] sm:$0xff] %v3653_v17  ;;  %v3622_v43 = vadd.f32 %v7349_v39, %v3516_v23  ;;  %v4622_v26 = vadd.f32 %v7001_v10, %v3295_v48  ;;  %v3297_v58 = vpop.f32.mrb[61].mxu1  ;;  %v7357_v17 = vld [vmem:[#allocation38_spill] sm:$0xff] }
 0x5c7   : > { %v7358_v58 = vld [vmem:[#allocation39_spill] sm:$0xff] }
 0x5c8   : > { %v3654_v51 = vmax.f32 %v3622_v43, 0.0  ;;  %v3521_v34 = vadd.f32 %v4622_v26, %v6855_v50 }
 0x5c9   : > { %v3300_v14 = vpop.f32.mrb[62].mxu1 }
 0x5ca   : > { %3686 = vst [vmem:[%s7010_s24 + $0x68] sm:$0xff] %v3654_v51  ;;  %v3623_v9 = vadd.f32 %v7350_v18, %v3521_v34  ;;  %v4623_v61 = vadd.f32 %v7001_v10, %v3300_v14  ;;  %v3302_v33 = vpop.f32.mrb[63].mxu1 }
 0x5cc   : > { %v3655_v2 = vmax.f32 %v3623_v9, 0.0  ;;  %v3526_v20 = vadd.f32 %v4623_v61, %v6852_v36  ;;  %v7359_v61 = vld [vmem:[#allocation40_spill] sm:$0xff] }
 0x5cd   : > { %v3305_v3 = vpop.f32.mrb[64].mxu1 }
 0x5ce   : > { %3687 = vst [vmem:[%s7010_s24 + $0x70] sm:$0xff] %v3655_v2  ;;  %v3624_v40 = vadd.f32 %v7351_v30, %v3526_v20  ;;  %v4624_v47 = vadd.f32 %v7001_v10, %v3305_v3  ;;  %v3307_v11 = vpop.f32.mrb[65].mxu1 }
 0x5d0   : > { %v3656_v50 = vmax.f32 %v3624_v40, 0.0  ;;  %v3531_v62 = vadd.f32 %v4624_v47, %v6867_v46 }
 0x5d1   : > { %v3310_v31 = vpop.f32.mrb[66].mxu1 }
 0x5d2   : > { %3688 = vst [vmem:[%s7010_s24 + $0x78] sm:$0xff] %v3656_v50  ;;  %v3625_v35 = vadd.f32 %v7352_v42, %v3531_v62  ;;  %v4625_v45 = vadd.f32 %v7001_v10, %v3310_v31  ;;  %v3312_v44 = vpop.f32.mrb[67].mxu1 }
 0x5d4   : > { %v3657_v36 = vmax.f32 %v3625_v35, 0.0  ;;  %v3536_v32 = vadd.f32 %v4625_v45, %v6864_v13 }
 0x5d5   : > { %v3315_v25 = vpop.f32.mrb[68].mxu1 }
 0x5d6   : > { %3689 = vst [vmem:[%s7010_s24 + $0x80] sm:$0xff] %v3657_v36  ;;  %v3626_v37 = vadd.f32 %v7353_v21, %v3536_v32  ;;  %v4626_v8 = vadd.f32 %v7001_v10, %v3315_v25  ;;  %v3317_v22 = vpop.f32.mrb[69].mxu1 }
 0x5d8   : > { %v3658_v46 = vmax.f32 %v3626_v37, 0.0  ;;  %v3541_v16 = vadd.f32 %v4626_v8, %v6879_v53 }
 0x5d9   : > { %v3320_v24 = vpop.f32.mrb[70].mxu1 }
 0x5da   : > { %3690 = vst [vmem:[%s7010_s24 + $0x88] sm:$0xff] %v3658_v46  ;;  %v3627_v63 = vadd.f32 %v7354_v7, %v3541_v16  ;;  %v4627_v52 = vadd.f32 %v7001_v10, %v3320_v24  ;;  %v3322_v38 = vpop.f32.mrb[71].mxu1  ;;  %v7360_v46 = vld [vmem:[#allocation42_spill] sm:$0xff]  ;;  %v7361_v7 = vld [vmem:[#allocation41_spill] sm:$0xff] }
 0x5dc   : > { %v3659_v13 = vmax.f32 %v3627_v63, 0.0  ;;  %v3546_v27 = vadd.f32 %v4627_v52, %v6876_v4 }
 0x5dd   : > { %v3325_v57 = vpop.f32.mrb[72].mxu1 }
 0x5de   : > { %3691 = vst [vmem:[%s7010_s24 + $0x90] sm:$0xff] %v3659_v13  ;;  %v3628_v41 = vadd.f32 %v7355_v56, %v3546_v27  ;;  %v4628_v28 = vadd.f32 %v7001_v10, %v3325_v57  ;;  %v3327_v1 = vpop.f32.mrb[73].mxu1 }
 0x5e0   : > { %v3660_v53 = vmax.f32 %v3628_v41, 0.0  ;;  %v3551_v60 = vadd.f32 %v4628_v28, %v6891_v5  ;;  %v7362_v28 = vld [vmem:[#allocation44_spill] sm:$0xff] }
 0x5e1   : > { %v3330_v15 = vpop.f32.mrb[74].mxu1 }
 0x5e2   : > { %3692 = vst [vmem:[%s7010_s24 + $0x98] sm:$0xff] %v3660_v53  ;;  %v3629_v59 = vadd.f32 %v7356_v54, %v3551_v60  ;;  %v4629_v29 = vadd.f32 %v7001_v10, %v3330_v15  ;;  %v3332_v49 = vpop.f32.mrb[75].mxu1  ;;  %v7363_v60 = vld [vmem:[#allocation43_spill] sm:$0xff] }
 0x5e4   : > { %v3661_v4 = vmax.f32 %v3629_v59, 0.0  ;;  %v3556_v12 = vadd.f32 %v4629_v29, %v6888_v19 }
 0x5e5   : > { %v3335_v55 = vpop.f32.mrb[76].mxu1 }
 0x5e6   : > { %3693 = vst [vmem:[%s7010_s24 + $0xa0] sm:$0xff] %v3661_v4  ;;  %v3630_v23 = vadd.f32 %v7357_v17, %v3556_v12  ;;  %v4630_v48 = vadd.f32 %v7001_v10, %v3335_v55  ;;  %v3337_v39 = vpop.f32.mrb[77].mxu1  ;;  %v7364_v17 = vld [vmem:[#allocation46_spill] sm:$0xff] }
 0x5e7   : > { %v7365_v39 = vld [vmem:[#allocation45_spill] sm:$0xff] }
 0x5e8   : > { %v3662_v5 = vmax.f32 %v3630_v23, 0.0  ;;  %v3561_v43 = vadd.f32 %v4630_v48, %v6904_v0 }
 0x5e9   : > { %v3340_v26 = vpop.f32.mrb[78].mxu1 }
 0x5ea   : > { %3694 = vst [vmem:[%s7010_s24 + $0xa8] sm:$0xff] %v3662_v5  ;;  %v3631_v51 = vadd.f32 %v7358_v58, %v3561_v43  ;;  %v4631_v34 = vadd.f32 %v7001_v10, %v3340_v26  ;;  %v3342_v14 = vpop.f32.mrb[79].mxu1 }
 0x5ec   : > { %v3663_v19 = vmax.f32 %v3631_v51, 0.0  ;;  %v3566_v18 = vadd.f32 %v4631_v34, %v6901_v6 }
 0x5ed   : > { %v3345_v9 = vpop.f32.mrb[80].mxu1 }
 0x5ee   : > { %3695 = vst [vmem:[%s7010_s24 + $0xb0] sm:$0xff] %v3663_v19  ;;  %v3632_v33 = vadd.f32 %v7359_v61, %v3566_v18  ;;  %v3347_v2 = vpop.f32.mrb[81].mxu1  ;;  %v4632_v32 = vadd.f32 %v7001_v10, %v3345_v9  ;;  %v7366_v19 = vld [vmem:[#allocation56_spill] sm:$0xff] }
 0x5f0   : > { %v3664_v20 = vmax.f32 %v3632_v33, 0.0 }
 0x5f1   : > { %v3350_v3 = vpop.f32.mrb[82].mxu1 }
 0x5f2   : > { %3696 = vst [vmem:[%s7010_s24 + $0xb8] sm:$0xff] %v3664_v20  ;;  %v3352_v30 = vpop.f32.mrb[83].mxu1  ;;  %v4633_v36 = vadd.f32 %v7001_v10, %v3350_v3 }
 0x5f5   : > { %v3355_v0 = vpop.f32.mrb[84].mxu1 }
 0x5f6   : > { %v3357_v40 = vpop.f32.mrb[85].mxu1  ;;  %v4634_v24 = vadd.f32 %v7001_v10, %v3355_v0 }
 0x5f9   : > { %v3360_v47 = vpop.f32.mrb[86].mxu1 }
 0x5fa   : > { %v3362_v11 = vpop.f32.mrb[87].mxu1  ;;  %v4635_v22 = vadd.f32 %v7001_v10, %v3360_v47 }
 0x5fd   : > { %v3365_v50 = vpop.f32.mrb[88].mxu1 }
 0x5fe   : > { %v3367_v62 = vpop.f32.mrb[89].mxu1  ;;  %v4636_v53 = vadd.f32 %v7001_v10, %v3365_v50 }
 0x601   : > { %v3370_v31 = vpop.f32.mrb[90].mxu1 }
 0x602   : > { %v3372_v42 = vpop.f32.mrb[91].mxu1  ;;  %v4637_v41 = vadd.f32 %v7001_v10, %v3370_v31 }
 0x605   : > { %v3375_v35 = vpop.f32.mrb[92].mxu1 }
 0x606   : > { %v3377_v45 = vpop.f32.mrb[93].mxu1  ;;  %v4638_v48 = vadd.f32 %v7001_v10, %v3375_v35 }
 0x609   : > { %v3380_v6 = vpop.f32.mrb[94].mxu1 }
 0x60a   : > { %v3382_v44 = vpop.f32.mrb[95].mxu1  ;;  %v4639_v55 = vadd.f32 %v7001_v10, %v3380_v6  ;;  %v7367_v10 = vld [vmem:[#allocation55_spill] sm:$0xff] }
 0x60d   : > { %v4102_v25 = vpop.f32.mrb[96].mxu1 }
 0x60e   : > { %v3576_v21 = vadd.f32 %v4633_v36, %v4102_v25  ;;  %v3570_v37 = vpop.f32.mrb[97].mxu1 }
 0x60f   : > { %v3571_v8 = vadd.f32 %v4632_v32, %v3570_v37 }
 0x610   : > { %v3634_v16 = vadd.f32 %v7360_v46, %v3576_v21 }
 0x611   : > { %v3633_v63 = vadd.f32 %v7361_v7, %v3571_v8  ;;  %v4105_v52 = vpop.f32.mrb[98].mxu1 }
 0x612   : > { %v3666_v38 = vmax.f32 %v3634_v16, 0.0  ;;  %v3586_v13 = vadd.f32 %v4635_v22, %v4105_v52  ;;  %v3580_v27 = vpop.f32.mrb[99].mxu1 }
 0x613   : > { %v3665_v57 = vmax.f32 %v3633_v63, 0.0  ;;  %v3581_v56 = vadd.f32 %v4634_v24, %v3580_v27 }
 0x614   : > { %3698 = vst [vmem:[%s7010_s24 + $0xc8] sm:$0xff] %v3666_v38  ;;  %v3636_v1 = vadd.f32 %v7362_v28, %v3586_v13 }
 0x615   : > { %3697 = vst [vmem:[%s7010_s24 + $0xc0] sm:$0xff] %v3665_v57  ;;  %v3635_v15 = vadd.f32 %v7363_v60, %v3581_v56  ;;  %v4108_v54 = vpop.f32.mrb[100].mxu1 }
 0x616   : > { %v3668_v59 = vmax.f32 %v3636_v1, 0.0  ;;  %v3596_v29 = vadd.f32 %v4637_v41, %v4108_v54  ;;  %v3590_v49 = vpop.f32.mrb[101].mxu1 }
 0x617   : > { %v3667_v4 = vmax.f32 %v3635_v15, 0.0  ;;  %v3591_v12 = vadd.f32 %v4636_v53, %v3590_v49 }
 0x618   : > { %3700 = vst [vmem:[%s7010_s24 + $0xd8] sm:$0xff] %v3668_v59  ;;  %v3638_v23 = vadd.f32 %v7364_v17, %v3596_v29 }
 0x619   : > { %3699 = vst [vmem:[%s7010_s24 + $0xd0] sm:$0xff] %v3667_v4  ;;  %v3637_v5 = vadd.f32 %v7365_v39, %v3591_v12  ;;  %v4111_v43 = vpop.f32.mrb[102].mxu1 }
 0x61a   : > { %v3670_v26 = vmax.f32 %v3638_v23, 0.0  ;;  %v3606_v58 = vadd.f32 %v4639_v55, %v4111_v43  ;;  %v3600_v51 = vpop.f32.mrb[103].mxu1 }
 0x61b   : > { %v3669_v34 = vmax.f32 %v3637_v5, 0.0  ;;  %v3601_v14 = vadd.f32 %v4638_v48, %v3600_v51 }
 0x61c   : > { %3702 = vst [vmem:[%s7010_s24 + $0xe8] sm:$0xff] %v3670_v26  ;;  %v3640_v18 = vadd.f32 %v7366_v19, %v3606_v58 }
 0x61d   : > { %3701 = vst [vmem:[%s7010_s24 + $0xe0] sm:$0xff] %v3669_v34  ;;  %v3639_v9 = vadd.f32 %v7367_v10, %v3601_v14 }
 0x61e   : > { %v3672_v61 = vmax.f32 %v3640_v18, 0.0 }
 0x61f   : > { %v3671_v33 = vmax.f32 %v3639_v9, 0.0 }
 0x620   : > { %3704 = vst [vmem:[%s7010_s24 + $0xf8] sm:$0xff] %v3672_v61 }
 0x621   : > { %3703 = vst [vmem:[%s7010_s24 + $0xf0] sm:$0xff] %v3671_v33 }
 0x622   : > { %5306 = shalt.err (!%p5303_p13)
}
 0x623   : > { %s5307_s29 = scalar_lea.hbm %s7130_s6, 4096  ;;  %s5311_s13 = scalar_lea.hbm %s7183_s5, 8192 }
 0x624   : > { %p5308_p9 = scmp.ne.s32.totalorder %s7130_s6, %s5307_s29  ;;  %p5312_p6 = scmp.lt.u32.totalorder %s7130_s6, %s7183_s5 }
 0x625   : > { %p5313_p4 = scmp.lt.u32.totalorder %s5311_s13, %s5307_s29  ;;  %p5315_p3 = scmp.lt.u32.totalorder %s5307_s29, %s7130_s6 }
 0x626   : > { %p5309_p0 = pnand %p5308_p9, %p5576_p10 }
 0x627   : > { %p5314_p8 = por %p5313_p4, %p5312_p6 }
 0x628   : > { %p5310_p11 = pneg %p5309_p0 }
 0x629   : > { %p5316_p5 = por %p5315_p3, %p5314_p8 }
 0x62b   : > { %p5317_p7 = pnand %p5316_p5, %p5310_p11 }
 0x62d   : > { %5320 = shalt.err (!%p5317_p7)
}
 0x62e   : > { %s5379_s26 = smov 128   ;;  %s5380_s27 = smov 8  }
 0x62f   : > { %5042 = dma.vmem_to_hbm [thread:$0]  (%p5576_p10), %s7132_s23, 4096, %s7130_s6, %s3706_s22, %s5379_s26, %s5379_s26, %s5380_s27  }
 0x630 PF: > { %s3734_s16 = sand.u32 1, %s5355_s18   ;;  %p7368_p12 = scmp.ne.s32.totalorder %s7252_s25, 0 }
 0x631   : > { %p7369_p1 = scmp.ge.s32.totalorder %s5367_s21, 2  ;;  %s3735_s17 = scalar_lea.sflag [#allocation5], %s3734_s16 }
 0x633   : > { %p5062_p2 = pnand %p7369_p1, %p7368_p12 }
 0x635   : > { %5350 = dma.done.wait (!%p5062_p2), %s3735_s17, 4096  }
 0x636   : > { %5352 = vsyncadd (!%p5062_p2), %s3735_s17, 4294963200  ;;  %p20_p13 = scmp.ge.s32.totalorder %s5566_s14, 4   ;;  %s7370_s18 = smov %s5359_s19 }
 0x637   : > { %s7371_s19 = smov %s5363_s20  ;;  %s7372_s20 = smov %s5582_s10 }
 0x638   : > { %s7373_s21 = smov %s5566_s14  ;;  %22 = sbr.rel (!%p20_p13) target bundleno = 7 (0x7), region = 103 }
 0x63f   :  { %3740 = vsyncpa [#allocation4], 1 }
 0x640   :  { %3742 = vsyncpa [#allocation4 + $0x1], 1 }
 0x641   :  { %3743 = vsyncpa [#allocation7], 1 }
 0x642   :  { %3744 = vsyncpa [#allocation10], 1 }
 0x643   :  { %3745 = vsyncpa [#allocation5], 1 }
 0x644   :  { %3747 = vsyncpa [#allocation5 + $0x1], 1 }

</bundles_post_ra>
